<compile_context>
chip_gen: v7x
topology: tpu7x:2x2x1
jax: 0.10.0
libtpu: 0.0.40
codegen_flags: <defaults>
</compile_context>

<pallas_src>
import functools

import jax
import jax.numpy as jnp
from jax.experimental import pallas as pl
from jax.experimental.pallas import tpu as pltpu

EPS = 1e-5
# Tap order matches a PyTorch (Cout, Cin, 3, 3) weight flattened row-major:
# tap = ky*3 + kx with dy = ky-1, dx = kx-1 (cross-correlation, like Conv2d).
TAPS = tuple((dy, dx) for dy in (-1, 0, 1) for dx in (-1, 0, 1))


# ----------------------------------------------------------------------------
# Kernel
# ----------------------------------------------------------------------------
def _block_kernel(x_ref, masks_ref, w_ref, bn_ref, o_ref, *, n_img, c, im_w):
    """conv1+bn1+relu+conv2+bn2+residual+relu, fused, on an (N*C, H*W) slab."""
    x = x_ref[...]              # (N*C, H*W)   conv1 input / residual
    masks = masks_ref[...]      # (9, H*W)     per-tap SAME-padding masks
    wc = w_ref[...]             # (N*C, 2*C*9) per-(stage, d, tap) weight columns
    bn = bn_ref[...]            # (N*C, 4)     [g1, be1, g2, be2]

    nrows, p = x.shape          # nrows = N*C, p = H*W (lane axis)

    # Per-diagonal sublane select masks for the in-group channel roll:
    # take the "no group wrap" roll where (row % C) < C - d.
    row = jax.lax.broadcasted_iota(jnp.int32, (nrows, 1), 0)
    co = row % c
    gmask = [None] + [co < (c - d) for d in range(1, c)]

    def conv3x3(z, stage):
        """3x3 SAME cross-correlation (no bias) via full-slab shifted FMAs.

        out[n, co] = sum_{d, tap} w[co, (co+d)%C, tap] *
                     (channel-roll-by-d within each image)(z) lane-shifted by tap
        Every FMA covers the whole (N*C, H*W) slab -> full vreg occupancy.
        """
        acc = None
        for d in range(c):
            if d == 0:
                zd = z
            else:
                # Channel roll by d *within* each image's C-row group:
                # two global sublane rotates blended with a per-row select.
                a = pltpu.roll(z, (nrows - d) % nrows, 0)   # row r <- row r+d
                b = pltpu.roll(z, c - d, 0)                 # row r <- row r+d-C
                zd = jnp.where(gmask[d], a, b)
            for tap, (dy, dx) in enumerate(TAPS):
                s = dy * im_w + dx
                if s == 0:
                    sh = zd                                  # center tap: mask all-ones
                else:
                    # lane rotate: sh[:, q] = zd[:, q + s]; the mask zeroes taps
                    # falling outside the image (zero padding + no row bleed).
                    sh = pltpu.roll(zd, (-s) % p, 1) * masks[tap:tap + 1, :]
                idx = stage * c * 9 + d * 9 + tap
                term = wc[:, idx:idx + 1] * sh               # (N*C,1) * (N*C,P)
                acc = term if acc is None else acc + term
        return acc

    def bn_train(y, gamma, beta):
        """BatchNorm2d (training): per-channel batch stats, biased variance,
        single pass (sum & sum-of-squares), rsqrt folded into one scale."""
        yy = y * y
        ty, tyy = y, yy
        for k in range(1, n_img):           # fold the other images' rows onto
            ty = ty + pltpu.roll(y, k * c, 0)    # the same-channel row
            tyy = tyy + pltpu.roll(yy, k * c, 0)
        inv = 1.0 / float(n_img * p)
        m = jnp.sum(ty, axis=1, keepdims=True) * inv           # (N*C, 1)
        msq = jnp.sum(tyy, axis=1, keepdims=True) * inv
        var = jnp.maximum(msq - m * m, 0.0)                    # biased variance
        scale = jax.lax.rsqrt(var + EPS) * gamma               # EUP rsqrt
        return y * scale + (beta - m * scale)

    # stage 1: conv1 -> bn1 -> relu   (conv bias cancels under training-mode BN)
    h = jnp.maximum(bn_train(conv3x3(x, 0), bn[:, 0:1], bn[:, 1:2]), 0.0)
    # stage 2: conv2 -> bn2 -> +residual -> relu  (h never leaves the chip)
    y = bn_train(conv3x3(h, 1), bn[:, 2:3], bn[:, 3:4]) + x
    o_ref[...] = jnp.maximum(y, 0.0)


# ----------------------------------------------------------------------------
# Wrapper (layout plumbing only — no transposes, no im2col, tiny param prep)
# ----------------------------------------------------------------------------
def _boundary_masks(h, w):
    """(9, H*W) f32: masks[tap, q] = 1 iff pixel q's (dy, dx) neighbour lies
    inside the image (implements the SAME-conv zero padding); shared across
    the batch since each image owns its own sublane rows."""
    yy, xx = jnp.meshgrid(jnp.arange(h), jnp.arange(w), indexing="ij")
    yy = yy.reshape(-1)
    xx = xx.reshape(-1)
    rows = []
    for dy, dx in TAPS:
        ok = (yy + dy >= 0) & (yy + dy < h) & (xx + dx >= 0) & (xx + dx < w)
        rows.append(ok.astype(jnp.float32))
    return jnp.stack(rows, axis=0)


def _weight_cols(wgt, n_img):
    """(N*C, C*9) weight columns: column d*9+tap, row n*C+co holds
    w[co, (co+d)%C, tap]  (diagonal decomposition of the CxC channel mix)."""
    c = wgt.shape[0]
    w9 = wgt.reshape(c, c, 9)
    co = jnp.arange(c)
    cols = [w9[co, (co + d) % c, :] for d in range(c)]   # each (C, 9)
    return jnp.tile(jnp.concatenate(cols, axis=1), (n_img, 1))


@jax.jit
def convnet_block(x_nchw, w1, w2, g1, be1, g2, be2):
    """Forward pass of ConvnetBlock.  x_nchw: (N, C, H, W) float32.
    Conv biases are intentionally omitted: a per-channel constant shift
    cancels exactly under training-mode BatchNorm (the reference keeps them)."""
    n, c, h, w = x_nchw.shape
    p = h * w
    # Pure reshape (no transpose): rows are (image, channel), pixels on lanes.
    x2d = x_nchw.astype(jnp.float32).reshape(n * c, p)
    masks = _boundary_masks(h, w)
    wcols = jnp.concatenate([_weight_cols(w1, n), _weight_cols(w2, n)], axis=1)
    bnpar = jnp.tile(jnp.stack([g1, be1, g2, be2], axis=1), (n, 1))   # (N*C, 4)

    kernel = functools.partial(_block_kernel, n_img=n, c=c, im_w=w)
    y2d = pl.pallas_call(
        kernel,
        out_shape=jax.ShapeDtypeStruct((n * c, p), jnp.float32),
        in_specs=[pl.BlockSpec(memory_space=pltpu.MemorySpace.VMEM)] * 4,
        out_specs=pl.BlockSpec(memory_space=pltpu.MemorySpace.VMEM),
    )(x2d, masks, wcols, bnpar)
    return y2d.reshape(n, c, h, w)


# ----------------------------------------------------------------------------
# Pure-JAX reference (keeps the conv bias -> verifies the in-kernel fold)
# ----------------------------------------------------------------------------
def reference_block(x, w1, b1, g1, be1, w2, b2, g2, be2):
    def conv(z, wgt, b):
        out = jax.lax.conv_general_dilated(
            z, wgt, (1, 1), "SAME",
            dimension_numbers=("NCHW", "OIHW", "NCHW"))
        return out + b.reshape(1, -1, 1, 1)

    def bn(z, g, be):
        m = z.mean((0, 2, 3), keepdims=True)
        v = ((z - m) ** 2).mean((0, 2, 3), keepdims=True)
        return ((z - m) * jax.lax.rsqrt(v + EPS) * g.reshape(1, -1, 1, 1)
                + be.reshape(1, -1, 1, 1))

    h = jax.nn.relu(bn(conv(x, w1, b1), g1, be1))
    return jax.nn.relu(bn(conv(h, w2, b2), g2, be2) + x)


# ----------------------------------------------------------------------------
# Main
# ----------------------------------------------------------------------------
if __name__ == "__main__":
    N, C, H, W = 2, 4, 16, 16      # filters = 4
    key = jax.random.PRNGKey(0)
    k = jax.random.split(key, 9)

    # deterministic synthetic parameters (shapes match the PyTorch module)
    w1 = 0.1 * jax.random.normal(k[0], (C, C, 3, 3), jnp.float32)   # conv1.weight
    b1 = 0.1 * jax.random.normal(k[1], (C,), jnp.float32)           # conv1.bias
    w2 = 0.1 * jax.random.normal(k[2], (C, C, 3, 3), jnp.float32)   # conv2.weight
    b2 = 0.1 * jax.random.normal(k[3], (C,), jnp.float32)           # conv2.bias
    g1 = 1.0 + 0.1 * jax.random.normal(k[4], (C,), jnp.float32)     # bn1.weight
    be1 = 0.1 * jax.random.normal(k[5], (C,), jnp.float32)          # bn1.bias
    g2 = 1.0 + 0.1 * jax.random.normal(k[6], (C,), jnp.float32)     # bn2.weight
    be2 = 0.1 * jax.random.normal(k[7], (C,), jnp.float32)          # bn2.bias

    x = jax.random.normal(k[8], (N, C, H, W), jnp.float32)          # NCHW input

    out = jax.block_until_ready(convnet_block(x, w1, w2, g1, be1, g2, be2))
    ref = jax.block_until_ready(
        reference_block(x, w1, b1, g1, be1, w2, b2, g2, be2))

    assert out.shape == (N, C, H, W)
    err = float(jnp.max(jnp.abs(out - ref)))
    assert jnp.allclose(out, ref, atol=2e-3, rtol=2e-3), err

    print("KERNEL_OK")
</pallas_src>

<mosaic_0001>
module attributes {stable_mosaic.version = 11 : i64} {
  func.func @_block_kernel(%arg0: memref<8x256xf32, #tpu.memory_space<vmem>>, %arg1: memref<9x256xf32, #tpu.memory_space<vmem>>, %arg2: memref<8x72xf32, #tpu.memory_space<vmem>>, %arg3: memref<8x4xf32, #tpu.memory_space<vmem>>, %arg4: memref<8x256xf32, #tpu.memory_space<vmem>>) attributes {dimension_semantics = [], scalar_prefetch = 0 : i64, scratch_operands = 0 : i64, tpu.core_type = #tpu.core_type<tc>} {
    %c0 = arith.constant 0 : index
    %c0_0 = arith.constant 0 : index
    %0 = vector.load %arg0[%c0, %c0_0] : memref<8x256xf32, #tpu.memory_space<vmem>>, vector<8x256xf32>
    %c0_1 = arith.constant 0 : index
    %c0_2 = arith.constant 0 : index
    %1 = vector.load %arg1[%c0_1, %c0_2] : memref<9x256xf32, #tpu.memory_space<vmem>>, vector<9x256xf32>
    %c0_3 = arith.constant 0 : index
    %c0_4 = arith.constant 0 : index
    %2 = vector.load %arg2[%c0_3, %c0_4] : memref<8x72xf32, #tpu.memory_space<vmem>>, vector<8x72xf32>
    %c0_5 = arith.constant 0 : index
    %c0_6 = arith.constant 0 : index
    %3 = vector.load %arg3[%c0_5, %c0_6] : memref<8x4xf32, #tpu.memory_space<vmem>>, vector<8x4xf32>
    %4 = tpu.iota {dimensions = array<i32: 0>} : vector<8x1xi32>
    %c4_i32 = arith.constant 4 : i32
    %c0_i32 = arith.constant 0 : i32
    %5 = arith.cmpi eq, %c4_i32, %c0_i32 : i32
    %c1_i32 = arith.constant 1 : i32
    %6 = arith.select %5, %c1_i32, %c4_i32 : i32
    %7 = vector.broadcast %6 : i32 to vector<8x1xi32>
    %8 = arith.remsi %4, %7 : vector<8x1xi32>
    %c0_i32_7 = arith.constant 0 : i32
    %9 = vector.broadcast %c0_i32_7 : i32 to vector<8x1xi32>
    %10 = arith.cmpi ne, %8, %9 : vector<8x1xi32>
    %c0_i32_8 = arith.constant 0 : i32
    %11 = vector.broadcast %c0_i32_8 : i32 to vector<8x1xi32>
    %12 = arith.cmpi slt, %8, %11 : vector<8x1xi32>
    %c0_i32_9 = arith.constant 0 : i32
    %13 = arith.cmpi slt, %6, %c0_i32_9 : i32
    %14 = vector.broadcast %13 : i1 to vector<8x1xi1>
    %15 = vector.broadcast %14 : vector<8x1xi1> to vector<8x1xi1>
    %16 = arith.xori %12, %15 : vector<8x1xi1>
    %17 = arith.andi %16, %10 : vector<8x1xi1>
    %18 = vector.broadcast %6 : i32 to vector<8x1xi32>
    %19 = arith.addi %8, %18 : vector<8x1xi32>
    %20 = arith.select %17, %19, %8 : vector<8x1xi1>, vector<8x1xi32>
    %c3_i32 = arith.constant 3 : i32
    %21 = vector.broadcast %c3_i32 : i32 to vector<8x1xi32>
    %22 = arith.cmpi slt, %20, %21 : vector<8x1xi32>
    %c2_i32 = arith.constant 2 : i32
    %23 = vector.broadcast %c2_i32 : i32 to vector<8x1xi32>
    %24 = arith.cmpi slt, %20, %23 : vector<8x1xi32>
    %c1_i32_10 = arith.constant 1 : i32
    %25 = vector.broadcast %c1_i32_10 : i32 to vector<8x1xi32>
    %26 = arith.cmpi slt, %20, %25 : vector<8x1xi32>
    %c17_i32 = arith.constant 17 : i32
    %27 = tpu.dynamic_rotate %0 by %c17_i32 dim 1 : vector<8x256xf32>, i32 -> vector<8x256xf32>
    %28 = vector.extract_strided_slice %1 {offsets = [0, 0], sizes = [1, 256], strides = [1, 1]} : vector<9x256xf32> to vector<1x256xf32>
    %29 = vector.broadcast %28 : vector<1x256xf32> to vector<8x256xf32>
    %30 = arith.mulf %27, %29 : vector<8x256xf32>
    %31 = vector.extract_strided_slice %2 {offsets = [0, 0], sizes = [8, 1], strides = [1, 1]} : vector<8x72xf32> to vector<8x1xf32>
    %32 = vector.broadcast %31 : vector<8x1xf32> to vector<8x256xf32>
    %33 = arith.mulf %32, %30 : vector<8x256xf32>
    %c16_i32 = arith.constant 16 : i32
    %34 = tpu.dynamic_rotate %0 by %c16_i32 dim 1 : vector<8x256xf32>, i32 -> vector<8x256xf32>
    %35 = vector.extract_strided_slice %1 {offsets = [1, 0], sizes = [1, 256], strides = [1, 1]} : vector<9x256xf32> to vector<1x256xf32>
    %36 = vector.broadcast %35 : vector<1x256xf32> to vector<8x256xf32>
    %37 = arith.mulf %34, %36 : vector<8x256xf32>
    %38 = vector.extract_strided_slice %2 {offsets = [0, 1], sizes = [8, 1], strides = [1, 1]} : vector<8x72xf32> to vector<8x1xf32>
    %39 = vector.broadcast %38 : vector<8x1xf32> to vector<8x256xf32>
    %40 = arith.mulf %39, %37 : vector<8x256xf32>
    %41 = arith.addf %33, %40 : vector<8x256xf32>
    %c15_i32 = arith.constant 15 : i32
    %42 = tpu.dynamic_rotate %0 by %c15_i32 dim 1 : vector<8x256xf32>, i32 -> vector<8x256xf32>
    %43 = vector.extract_strided_slice %1 {offsets = [2, 0], sizes = [1, 256], strides = [1, 1]} : vector<9x256xf32> to vector<1x256xf32>
    %44 = vector.broadcast %43 : vector<1x256xf32> to vector<8x256xf32>
    %45 = arith.mulf %42, %44 : vector<8x256xf32>
    %46 = vector.extract_strided_slice %2 {offsets = [0, 2], sizes = [8, 1], strides = [1, 1]} : vector<8x72xf32> to vector<8x1xf32>
    %47 = vector.broadcast %46 : vector<8x1xf32> to vector<8x256xf32>
    %48 = arith.mulf %47, %45 : vector<8x256xf32>
    %49 = arith.addf %41, %48 : vector<8x256xf32>
    %c1_i32_11 = arith.constant 1 : i32
    %50 = tpu.dynamic_rotate %0 by %c1_i32_11 dim 1 : vector<8x256xf32>, i32 -> vector<8x256xf32>
    %51 = vector.extract_strided_slice %1 {offsets = [3, 0], sizes = [1, 256], strides = [1, 1]} : vector<9x256xf32> to vector<1x256xf32>
    %52 = vector.broadcast %51 : vector<1x256xf32> to vector<8x256xf32>
    %53 = arith.mulf %50, %52 : vector<8x256xf32>
    %54 = vector.extract_strided_slice %2 {offsets = [0, 3], sizes = [8, 1], strides = [1, 1]} : vector<8x72xf32> to vector<8x1xf32>
    %55 = vector.broadcast %54 : vector<8x1xf32> to vector<8x256xf32>
    %56 = arith.mulf %55, %53 : vector<8x256xf32>
    %57 = arith.addf %49, %56 : vector<8x256xf32>
    %58 = vector.extract_strided_slice %2 {offsets = [0, 4], sizes = [8, 1], strides = [1, 1]} : vector<8x72xf32> to vector<8x1xf32>
    %59 = vector.broadcast %58 : vector<8x1xf32> to vector<8x256xf32>
    %60 = arith.mulf %59, %0 : vector<8x256xf32>
    %61 = arith.addf %57, %60 : vector<8x256xf32>
    %c255_i32 = arith.constant 255 : i32
    %62 = tpu.dynamic_rotate %0 by %c255_i32 dim 1 : vector<8x256xf32>, i32 -> vector<8x256xf32>
    %63 = vector.extract_strided_slice %1 {offsets = [5, 0], sizes = [1, 256], strides = [1, 1]} : vector<9x256xf32> to vector<1x256xf32>
    %64 = vector.broadcast %63 : vector<1x256xf32> to vector<8x256xf32>
    %65 = arith.mulf %62, %64 : vector<8x256xf32>
    %66 = vector.extract_strided_slice %2 {offsets = [0, 5], sizes = [8, 1], strides = [1, 1]} : vector<8x72xf32> to vector<8x1xf32>
    %67 = vector.broadcast %66 : vector<8x1xf32> to vector<8x256xf32>
    %68 = arith.mulf %67, %65 : vector<8x256xf32>
    %69 = arith.addf %61, %68 : vector<8x256xf32>
    %c241_i32 = arith.constant 241 : i32
    %70 = tpu.dynamic_rotate %0 by %c241_i32 dim 1 : vector<8x256xf32>, i32 -> vector<8x256xf32>
    %71 = vector.extract_strided_slice %1 {offsets = [6, 0], sizes = [1, 256], strides = [1, 1]} : vector<9x256xf32> to vector<1x256xf32>
    %72 = vector.broadcast %71 : vector<1x256xf32> to vector<8x256xf32>
    %73 = arith.mulf %70, %72 : vector<8x256xf32>
    %74 = vector.extract_strided_slice %2 {offsets = [0, 6], sizes = [8, 1], strides = [1, 1]} : vector<8x72xf32> to vector<8x1xf32>
    %75 = vector.broadcast %74 : vector<8x1xf32> to vector<8x256xf32>
    %76 = arith.mulf %75, %73 : vector<8x256xf32>
    %77 = arith.addf %69, %76 : vector<8x256xf32>
    %c240_i32 = arith.constant 240 : i32
    %78 = tpu.dynamic_rotate %0 by %c240_i32 dim 1 : vector<8x256xf32>, i32 -> vector<8x256xf32>
    %79 = vector.extract_strided_slice %1 {offsets = [7, 0], sizes = [1, 256], strides = [1, 1]} : vector<9x256xf32> to vector<1x256xf32>
    %80 = vector.broadcast %79 : vector<1x256xf32> to vector<8x256xf32>
    %81 = arith.mulf %78, %80 : vector<8x256xf32>
    %82 = vector.extract_strided_slice %2 {offsets = [0, 7], sizes = [8, 1], strides = [1, 1]} : vector<8x72xf32> to vector<8x1xf32>
    %83 = vector.broadcast %82 : vector<8x1xf32> to vector<8x256xf32>
    %84 = arith.mulf %83, %81 : vector<8x256xf32>
    %85 = arith.addf %77, %84 : vector<8x256xf32>
    %c239_i32 = arith.constant 239 : i32
    %86 = tpu.dynamic_rotate %0 by %c239_i32 dim 1 : vector<8x256xf32>, i32 -> vector<8x256xf32>
    %87 = vector.extract_strided_slice %1 {offsets = [8, 0], sizes = [1, 256], strides = [1, 1]} : vector<9x256xf32> to vector<1x256xf32>
    %88 = vector.broadcast %87 : vector<1x256xf32> to vector<8x256xf32>
    %89 = arith.mulf %86, %88 : vector<8x256xf32>
    %90 = vector.extract_strided_slice %2 {offsets = [0, 8], sizes = [8, 1], strides = [1, 1]} : vector<8x72xf32> to vector<8x1xf32>
    %91 = vector.broadcast %90 : vector<8x1xf32> to vector<8x256xf32>
    %92 = arith.mulf %91, %89 : vector<8x256xf32>
    %93 = arith.addf %85, %92 : vector<8x256xf32>
    %c7_i32 = arith.constant 7 : i32
    %94 = tpu.dynamic_rotate %0 by %c7_i32 dim 0 : vector<8x256xf32>, i32 -> vector<8x256xf32>
    %c3_i32_12 = arith.constant 3 : i32
    %95 = tpu.dynamic_rotate %0 by %c3_i32_12 dim 0 : vector<8x256xf32>, i32 -> vector<8x256xf32>
    %96 = vector.shape_cast %22 : vector<8x1xi1> to vector<8x1xi1>
    %97 = vector.broadcast %96 : vector<8x1xi1> to vector<8x256xi1>
    %98 = arith.select %97, %94, %95 : vector<8x256xi1>, vector<8x256xf32>
    %c17_i32_13 = arith.constant 17 : i32
    %99 = tpu.dynamic_rotate %98 by %c17_i32_13 dim 1 : vector<8x256xf32>, i32 -> vector<8x256xf32>
    %100 = vector.extract_strided_slice %1 {offsets = [0, 0], sizes = [1, 256], strides = [1, 1]} : vector<9x256xf32> to vector<1x256xf32>
    %101 = vector.broadcast %100 : vector<1x256xf32> to vector<8x256xf32>
    %102 = arith.mulf %99, %101 : vector<8x256xf32>
    %103 = vector.extract_strided_slice %2 {offsets = [0, 9], sizes = [8, 1], strides = [1, 1]} : vector<8x72xf32> to vector<8x1xf32>
    %104 = vector.broadcast %103 : vector<8x1xf32> to vector<8x256xf32>
    %105 = arith.mulf %104, %102 : vector<8x256xf32>
    %106 = arith.addf %93, %105 : vector<8x256xf32>
    %c16_i32_14 = arith.constant 16 : i32
    %107 = tpu.dynamic_rotate %98 by %c16_i32_14 dim 1 : vector<8x256xf32>, i32 -> vector<8x256xf32>
    %108 = vector.extract_strided_slice %1 {offsets = [1, 0], sizes = [1, 256], strides = [1, 1]} : vector<9x256xf32> to vector<1x256xf32>
    %109 = vector.broadcast %108 : vector<1x256xf32> to vector<8x256xf32>
    %110 = arith.mulf %107, %109 : vector<8x256xf32>
    %111 = vector.extract_strided_slice %2 {offsets = [0, 10], sizes = [8, 1], strides = [1, 1]} : vector<8x72xf32> to vector<8x1xf32>
    %112 = vector.broadcast %111 : vector<8x1xf32> to vector<8x256xf32>
    %113 = arith.mulf %112, %110 : vector<8x256xf32>
    %114 = arith.addf %106, %113 : vector<8x256xf32>
    %c15_i32_15 = arith.constant 15 : i32
    %115 = tpu.dynamic_rotate %98 by %c15_i32_15 dim 1 : vector<8x256xf32>, i32 -> vector<8x256xf32>
    %116 = vector.extract_strided_slice %1 {offsets = [2, 0], sizes = [1, 256], strides = [1, 1]} : vector<9x256xf32> to vector<1x256xf32>
    %117 = vector.broadcast %116 : vector<1x256xf32> to vector<8x256xf32>
    %118 = arith.mulf %115, %117 : vector<8x256xf32>
    %119 = vector.extract_strided_slice %2 {offsets = [0, 11], sizes = [8, 1], strides = [1, 1]} : vector<8x72xf32> to vector<8x1xf32>
    %120 = vector.broadcast %119 : vector<8x1xf32> to vector<8x256xf32>
    %121 = arith.mulf %120, %118 : vector<8x256xf32>
    %122 = arith.addf %114, %121 : vector<8x256xf32>
    %c1_i32_16 = arith.constant 1 : i32
    %123 = tpu.dynamic_rotate %98 by %c1_i32_16 dim 1 : vector<8x256xf32>, i32 -> vector<8x256xf32>
    %124 = vector.extract_strided_slice %1 {offsets = [3, 0], sizes = [1, 256], strides = [1, 1]} : vector<9x256xf32> to vector<1x256xf32>
    %125 = vector.broadcast %124 : vector<1x256xf32> to vector<8x256xf32>
    %126 = arith.mulf %123, %125 : vector<8x256xf32>
    %127 = vector.extract_strided_slice %2 {offsets = [0, 12], sizes = [8, 1], strides = [1, 1]} : vector<8x72xf32> to vector<8x1xf32>
    %128 = vector.broadcast %127 : vector<8x1xf32> to vector<8x256xf32>
    %129 = arith.mulf %128, %126 : vector<8x256xf32>
    %130 = arith.addf %122, %129 : vector<8x256xf32>
    %131 = vector.extract_strided_slice %2 {offsets = [0, 13], sizes = [8, 1], strides = [1, 1]} : vector<8x72xf32> to vector<8x1xf32>
    %132 = vector.broadcast %131 : vector<8x1xf32> to vector<8x256xf32>
    %133 = arith.mulf %132, %98 : vector<8x256xf32>
    %134 = arith.addf %130, %133 : vector<8x256xf32>
    %c255_i32_17 = arith.constant 255 : i32
    %135 = tpu.dynamic_rotate %98 by %c255_i32_17 dim 1 : vector<8x256xf32>, i32 -> vector<8x256xf32>
    %136 = vector.extract_strided_slice %1 {offsets = [5, 0], sizes = [1, 256], strides = [1, 1]} : vector<9x256xf32> to vector<1x256xf32>
    %137 = vector.broadcast %136 : vector<1x256xf32> to vector<8x256xf32>
    %138 = arith.mulf %135, %137 : vector<8x256xf32>
    %139 = vector.extract_strided_slice %2 {offsets = [0, 14], sizes = [8, 1], strides = [1, 1]} : vector<8x72xf32> to vector<8x1xf32>
    %140 = vector.broadcast %139 : vector<8x1xf32> to vector<8x256xf32>
    %141 = arith.mulf %140, %138 : vector<8x256xf32>
    %142 = arith.addf %134, %141 : vector<8x256xf32>
    %c241_i32_18 = arith.constant 241 : i32
    %143 = tpu.dynamic_rotate %98 by %c241_i32_18 dim 1 : vector<8x256xf32>, i32 -> vector<8x256xf32>
    %144 = vector.extract_strided_slice %1 {offsets = [6, 0], sizes = [1, 256], strides = [1, 1]} : vector<9x256xf32> to vector<1x256xf32>
    %145 = vector.broadcast %144 : vector<1x256xf32> to vector<8x256xf32>
    %146 = arith.mulf %143, %145 : vector<8x256xf32>
    %147 = vector.extract_strided_slice %2 {offsets = [0, 15], sizes = [8, 1], strides = [1, 1]} : vector<8x72xf32> to vector<8x1xf32>
    %148 = vector.broadcast %147 : vector<8x1xf32> to vector<8x256xf32>
    %149 = arith.mulf %148, %146 : vector<8x256xf32>
    %150 = arith.addf %142, %149 : vector<8x256xf32>
    %c240_i32_19 = arith.constant 240 : i32
    %151 = tpu.dynamic_rotate %98 by %c240_i32_19 dim 1 : vector<8x256xf32>, i32 -> vector<8x256xf32>
    %152 = vector.extract_strided_slice %1 {offsets = [7, 0], sizes = [1, 256], strides = [1, 1]} : vector<9x256xf32> to vector<1x256xf32>
    %153 = vector.broadcast %152 : vector<1x256xf32> to vector<8x256xf32>
    %154 = arith.mulf %151, %153 : vector<8x256xf32>
    %155 = vector.extract_strided_slice %2 {offsets = [0, 16], sizes = [8, 1], strides = [1, 1]} : vector<8x72xf32> to vector<8x1xf32>
    %156 = vector.broadcast %155 : vector<8x1xf32> to vector<8x256xf32>
    %157 = arith.mulf %156, %154 : vector<8x256xf32>
    %158 = arith.addf %150, %157 : vector<8x256xf32>
    %c239_i32_20 = arith.constant 239 : i32
    %159 = tpu.dynamic_rotate %98 by %c239_i32_20 dim 1 : vector<8x256xf32>, i32 -> vector<8x256xf32>
    %160 = vector.extract_strided_slice %1 {offsets = [8, 0], sizes = [1, 256], strides = [1, 1]} : vector<9x256xf32> to vector<1x256xf32>
    %161 = vector.broadcast %160 : vector<1x256xf32> to vector<8x256xf32>
    %162 = arith.mulf %159, %161 : vector<8x256xf32>
    %163 = vector.extract_strided_slice %2 {offsets = [0, 17], sizes = [8, 1], strides = [1, 1]} : vector<8x72xf32> to vector<8x1xf32>
    %164 = vector.broadcast %163 : vector<8x1xf32> to vector<8x256xf32>
    %165 = arith.mulf %164, %162 : vector<8x256xf32>
    %166 = arith.addf %158, %165 : vector<8x256xf32>
    %c6_i32 = arith.constant 6 : i32
    %167 = tpu.dynamic_rotate %0 by %c6_i32 dim 0 : vector<8x256xf32>, i32 -> vector<8x256xf32>
    %c2_i32_21 = arith.constant 2 : i32
    %168 = tpu.dynamic_rotate %0 by %c2_i32_21 dim 0 : vector<8x256xf32>, i32 -> vector<8x256xf32>
    %169 = vector.shape_cast %24 : vector<8x1xi1> to vector<8x1xi1>
    %170 = vector.broadcast %169 : vector<8x1xi1> to vector<8x256xi1>
    %171 = arith.select %170, %167, %168 : vector<8x256xi1>, vector<8x256xf32>
    %c17_i32_22 = arith.constant 17 : i32
    %172 = tpu.dynamic_rotate %171 by %c17_i32_22 dim 1 : vector<8x256xf32>, i32 -> vector<8x256xf32>
    %173 = vector.extract_strided_slice %1 {offsets = [0, 0], sizes = [1, 256], strides = [1, 1]} : vector<9x256xf32> to vector<1x256xf32>
    %174 = vector.broadcast %173 : vector<1x256xf32> to vector<8x256xf32>
    %175 = arith.mulf %172, %174 : vector<8x256xf32>
    %176 = vector.extract_strided_slice %2 {offsets = [0, 18], sizes = [8, 1], strides = [1, 1]} : vector<8x72xf32> to vector<8x1xf32>
    %177 = vector.broadcast %176 : vector<8x1xf32> to vector<8x256xf32>
    %178 = arith.mulf %177, %175 : vector<8x256xf32>
    %179 = arith.addf %166, %178 : vector<8x256xf32>
    %c16_i32_23 = arith.constant 16 : i32
    %180 = tpu.dynamic_rotate %171 by %c16_i32_23 dim 1 : vector<8x256xf32>, i32 -> vector<8x256xf32>
    %181 = vector.extract_strided_slice %1 {offsets = [1, 0], sizes = [1, 256], strides = [1, 1]} : vector<9x256xf32> to vector<1x256xf32>
    %182 = vector.broadcast %181 : vector<1x256xf32> to vector<8x256xf32>
    %183 = arith.mulf %180, %182 : vector<8x256xf32>
    %184 = vector.extract_strided_slice %2 {offsets = [0, 19], sizes = [8, 1], strides = [1, 1]} : vector<8x72xf32> to vector<8x1xf32>
    %185 = vector.broadcast %184 : vector<8x1xf32> to vector<8x256xf32>
    %186 = arith.mulf %185, %183 : vector<8x256xf32>
    %187 = arith.addf %179, %186 : vector<8x256xf32>
    %c15_i32_24 = arith.constant 15 : i32
    %188 = tpu.dynamic_rotate %171 by %c15_i32_24 dim 1 : vector<8x256xf32>, i32 -> vector<8x256xf32>
    %189 = vector.extract_strided_slice %1 {offsets = [2, 0], sizes = [1, 256], strides = [1, 1]} : vector<9x256xf32> to vector<1x256xf32>
    %190 = vector.broadcast %189 : vector<1x256xf32> to vector<8x256xf32>
    %191 = arith.mulf %188, %190 : vector<8x256xf32>
    %192 = vector.extract_strided_slice %2 {offsets = [0, 20], sizes = [8, 1], strides = [1, 1]} : vector<8x72xf32> to vector<8x1xf32>
    %193 = vector.broadcast %192 : vector<8x1xf32> to vector<8x256xf32>
    %194 = arith.mulf %193, %191 : vector<8x256xf32>
    %195 = arith.addf %187, %194 : vector<8x256xf32>
    %c1_i32_25 = arith.constant 1 : i32
    %196 = tpu.dynamic_rotate %171 by %c1_i32_25 dim 1 : vector<8x256xf32>, i32 -> vector<8x256xf32>
    %197 = vector.extract_strided_slice %1 {offsets = [3, 0], sizes = [1, 256], strides = [1, 1]} : vector<9x256xf32> to vector<1x256xf32>
    %198 = vector.broadcast %197 : vector<1x256xf32> to vector<8x256xf32>
    %199 = arith.mulf %196, %198 : vector<8x256xf32>
    %200 = vector.extract_strided_slice %2 {offsets = [0, 21], sizes = [8, 1], strides = [1, 1]} : vector<8x72xf32> to vector<8x1xf32>
    %201 = vector.broadcast %200 : vector<8x1xf32> to vector<8x256xf32>
    %202 = arith.mulf %201, %199 : vector<8x256xf32>
    %203 = arith.addf %195, %202 : vector<8x256xf32>
    %204 = vector.extract_strided_slice %2 {offsets = [0, 22], sizes = [8, 1], strides = [1, 1]} : vector<8x72xf32> to vector<8x1xf32>
    %205 = vector.broadcast %204 : vector<8x1xf32> to vector<8x256xf32>
    %206 = arith.mulf %205, %171 : vector<8x256xf32>
    %207 = arith.addf %203, %206 : vector<8x256xf32>
    %c255_i32_26 = arith.constant 255 : i32
    %208 = tpu.dynamic_rotate %171 by %c255_i32_26 dim 1 : vector<8x256xf32>, i32 -> vector<8x256xf32>
    %209 = vector.extract_strided_slice %1 {offsets = [5, 0], sizes = [1, 256], strides = [1, 1]} : vector<9x256xf32> to vector<1x256xf32>
    %210 = vector.broadcast %209 : vector<1x256xf32> to vector<8x256xf32>
    %211 = arith.mulf %208, %210 : vector<8x256xf32>
    %212 = vector.extract_strided_slice %2 {offsets = [0, 23], sizes = [8, 1], strides = [1, 1]} : vector<8x72xf32> to vector<8x1xf32>
    %213 = vector.broadcast %212 : vector<8x1xf32> to vector<8x256xf32>
    %214 = arith.mulf %213, %211 : vector<8x256xf32>
    %215 = arith.addf %207, %214 : vector<8x256xf32>
    %c241_i32_27 = arith.constant 241 : i32
    %216 = tpu.dynamic_rotate %171 by %c241_i32_27 dim 1 : vector<8x256xf32>, i32 -> vector<8x256xf32>
    %217 = vector.extract_strided_slice %1 {offsets = [6, 0], sizes = [1, 256], strides = [1, 1]} : vector<9x256xf32> to vector<1x256xf32>
    %218 = vector.broadcast %217 : vector<1x256xf32> to vector<8x256xf32>
    %219 = arith.mulf %216, %218 : vector<8x256xf32>
    %220 = vector.extract_strided_slice %2 {offsets = [0, 24], sizes = [8, 1], strides = [1, 1]} : vector<8x72xf32> to vector<8x1xf32>
    %221 = vector.broadcast %220 : vector<8x1xf32> to vector<8x256xf32>
    %222 = arith.mulf %221, %219 : vector<8x256xf32>
    %223 = arith.addf %215, %222 : vector<8x256xf32>
    %c240_i32_28 = arith.constant 240 : i32
    %224 = tpu.dynamic_rotate %171 by %c240_i32_28 dim 1 : vector<8x256xf32>, i32 -> vector<8x256xf32>
    %225 = vector.extract_strided_slice %1 {offsets = [7, 0], sizes = [1, 256], strides = [1, 1]} : vector<9x256xf32> to vector<1x256xf32>
    %226 = vector.broadcast %225 : vector<1x256xf32> to vector<8x256xf32>
    %227 = arith.mulf %224, %226 : vector<8x256xf32>
    %228 = vector.extract_strided_slice %2 {offsets = [0, 25], sizes = [8, 1], strides = [1, 1]} : vector<8x72xf32> to vector<8x1xf32>
    %229 = vector.broadcast %228 : vector<8x1xf32> to vector<8x256xf32>
    %230 = arith.mulf %229, %227 : vector<8x256xf32>
    %231 = arith.addf %223, %230 : vector<8x256xf32>
    %c239_i32_29 = arith.constant 239 : i32
    %232 = tpu.dynamic_rotate %171 by %c239_i32_29 dim 1 : vector<8x256xf32>, i32 -> vector<8x256xf32>
    %233 = vector.extract_strided_slice %1 {offsets = [8, 0], sizes = [1, 256], strides = [1, 1]} : vector<9x256xf32> to vector<1x256xf32>
    %234 = vector.broadcast %233 : vector<1x256xf32> to vector<8x256xf32>
    %235 = arith.mulf %232, %234 : vector<8x256xf32>
    %236 = vector.extract_strided_slice %2 {offsets = [0, 26], sizes = [8, 1], strides = [1, 1]} : vector<8x72xf32> to vector<8x1xf32>
    %237 = vector.broadcast %236 : vector<8x1xf32> to vector<8x256xf32>
    %238 = arith.mulf %237, %235 : vector<8x256xf32>
    %239 = arith.addf %231, %238 : vector<8x256xf32>
    %c5_i32 = arith.constant 5 : i32
    %240 = tpu.dynamic_rotate %0 by %c5_i32 dim 0 : vector<8x256xf32>, i32 -> vector<8x256xf32>
    %c1_i32_30 = arith.constant 1 : i32
    %241 = tpu.dynamic_rotate %0 by %c1_i32_30 dim 0 : vector<8x256xf32>, i32 -> vector<8x256xf32>
    %242 = vector.shape_cast %26 : vector<8x1xi1> to vector<8x1xi1>
    %243 = vector.broadcast %242 : vector<8x1xi1> to vector<8x256xi1>
    %244 = arith.select %243, %240, %241 : vector<8x256xi1>, vector<8x256xf32>
    %c17_i32_31 = arith.constant 17 : i32
    %245 = tpu.dynamic_rotate %244 by %c17_i32_31 dim 1 : vector<8x256xf32>, i32 -> vector<8x256xf32>
    %246 = vector.extract_strided_slice %1 {offsets = [0, 0], sizes = [1, 256], strides = [1, 1]} : vector<9x256xf32> to vector<1x256xf32>
    %247 = vector.broadcast %246 : vector<1x256xf32> to vector<8x256xf32>
    %248 = arith.mulf %245, %247 : vector<8x256xf32>
    %249 = vector.extract_strided_slice %2 {offsets = [0, 27], sizes = [8, 1], strides = [1, 1]} : vector<8x72xf32> to vector<8x1xf32>
    %250 = vector.broadcast %249 : vector<8x1xf32> to vector<8x256xf32>
    %251 = arith.mulf %250, %248 : vector<8x256xf32>
    %252 = arith.addf %239, %251 : vector<8x256xf32>
    %c16_i32_32 = arith.constant 16 : i32
    %253 = tpu.dynamic_rotate %244 by %c16_i32_32 dim 1 : vector<8x256xf32>, i32 -> vector<8x256xf32>
    %254 = vector.extract_strided_slice %1 {offsets = [1, 0], sizes = [1, 256], strides = [1, 1]} : vector<9x256xf32> to vector<1x256xf32>
    %255 = vector.broadcast %254 : vector<1x256xf32> to vector<8x256xf32>
    %256 = arith.mulf %253, %255 : vector<8x256xf32>
    %257 = vector.extract_strided_slice %2 {offsets = [0, 28], sizes = [8, 1], strides = [1, 1]} : vector<8x72xf32> to vector<8x1xf32>
    %258 = vector.broadcast %257 : vector<8x1xf32> to vector<8x256xf32>
    %259 = arith.mulf %258, %256 : vector<8x256xf32>
    %260 = arith.addf %252, %259 : vector<8x256xf32>
    %c15_i32_33 = arith.constant 15 : i32
    %261 = tpu.dynamic_rotate %244 by %c15_i32_33 dim 1 : vector<8x256xf32>, i32 -> vector<8x256xf32>
    %262 = vector.extract_strided_slice %1 {offsets = [2, 0], sizes = [1, 256], strides = [1, 1]} : vector<9x256xf32> to vector<1x256xf32>
    %263 = vector.broadcast %262 : vector<1x256xf32> to vector<8x256xf32>
    %264 = arith.mulf %261, %263 : vector<8x256xf32>
    %265 = vector.extract_strided_slice %2 {offsets = [0, 29], sizes = [8, 1], strides = [1, 1]} : vector<8x72xf32> to vector<8x1xf32>
    %266 = vector.broadcast %265 : vector<8x1xf32> to vector<8x256xf32>
    %267 = arith.mulf %266, %264 : vector<8x256xf32>
    %268 = arith.addf %260, %267 : vector<8x256xf32>
    %c1_i32_34 = arith.constant 1 : i32
    %269 = tpu.dynamic_rotate %244 by %c1_i32_34 dim 1 : vector<8x256xf32>, i32 -> vector<8x256xf32>
    %270 = vector.extract_strided_slice %1 {offsets = [3, 0], sizes = [1, 256], strides = [1, 1]} : vector<9x256xf32> to vector<1x256xf32>
    %271 = vector.broadcast %270 : vector<1x256xf32> to vector<8x256xf32>
    %272 = arith.mulf %269, %271 : vector<8x256xf32>
    %273 = vector.extract_strided_slice %2 {offsets = [0, 30], sizes = [8, 1], strides = [1, 1]} : vector<8x72xf32> to vector<8x1xf32>
    %274 = vector.broadcast %273 : vector<8x1xf32> to vector<8x256xf32>
    %275 = arith.mulf %274, %272 : vector<8x256xf32>
    %276 = arith.addf %268, %275 : vector<8x256xf32>
    %277 = vector.extract_strided_slice %2 {offsets = [0, 31], sizes = [8, 1], strides = [1, 1]} : vector<8x72xf32> to vector<8x1xf32>
    %278 = vector.broadcast %277 : vector<8x1xf32> to vector<8x256xf32>
    %279 = arith.mulf %278, %244 : vector<8x256xf32>
    %280 = arith.addf %276, %279 : vector<8x256xf32>
    %c255_i32_35 = arith.constant 255 : i32
    %281 = tpu.dynamic_rotate %244 by %c255_i32_35 dim 1 : vector<8x256xf32>, i32 -> vector<8x256xf32>
    %282 = vector.extract_strided_slice %1 {offsets = [5, 0], sizes = [1, 256], strides = [1, 1]} : vector<9x256xf32> to vector<1x256xf32>
    %283 = vector.broadcast %282 : vector<1x256xf32> to vector<8x256xf32>
    %284 = arith.mulf %281, %283 : vector<8x256xf32>
    %285 = vector.extract_strided_slice %2 {offsets = [0, 32], sizes = [8, 1], strides = [1, 1]} : vector<8x72xf32> to vector<8x1xf32>
    %286 = vector.broadcast %285 : vector<8x1xf32> to vector<8x256xf32>
    %287 = arith.mulf %286, %284 : vector<8x256xf32>
    %288 = arith.addf %280, %287 : vector<8x256xf32>
    %c241_i32_36 = arith.constant 241 : i32
    %289 = tpu.dynamic_rotate %244 by %c241_i32_36 dim 1 : vector<8x256xf32>, i32 -> vector<8x256xf32>
    %290 = vector.extract_strided_slice %1 {offsets = [6, 0], sizes = [1, 256], strides = [1, 1]} : vector<9x256xf32> to vector<1x256xf32>
    %291 = vector.broadcast %290 : vector<1x256xf32> to vector<8x256xf32>
    %292 = arith.mulf %289, %291 : vector<8x256xf32>
    %293 = vector.extract_strided_slice %2 {offsets = [0, 33], sizes = [8, 1], strides = [1, 1]} : vector<8x72xf32> to vector<8x1xf32>
    %294 = vector.broadcast %293 : vector<8x1xf32> to vector<8x256xf32>
    %295 = arith.mulf %294, %292 : vector<8x256xf32>
    %296 = arith.addf %288, %295 : vector<8x256xf32>
    %c240_i32_37 = arith.constant 240 : i32
    %297 = tpu.dynamic_rotate %244 by %c240_i32_37 dim 1 : vector<8x256xf32>, i32 -> vector<8x256xf32>
    %298 = vector.extract_strided_slice %1 {offsets = [7, 0], sizes = [1, 256], strides = [1, 1]} : vector<9x256xf32> to vector<1x256xf32>
    %299 = vector.broadcast %298 : vector<1x256xf32> to vector<8x256xf32>
    %300 = arith.mulf %297, %299 : vector<8x256xf32>
    %301 = vector.extract_strided_slice %2 {offsets = [0, 34], sizes = [8, 1], strides = [1, 1]} : vector<8x72xf32> to vector<8x1xf32>
    %302 = vector.broadcast %301 : vector<8x1xf32> to vector<8x256xf32>
    %303 = arith.mulf %302, %300 : vector<8x256xf32>
    %304 = arith.addf %296, %303 : vector<8x256xf32>
    %c239_i32_38 = arith.constant 239 : i32
    %305 = tpu.dynamic_rotate %244 by %c239_i32_38 dim 1 : vector<8x256xf32>, i32 -> vector<8x256xf32>
    %306 = vector.extract_strided_slice %1 {offsets = [8, 0], sizes = [1, 256], strides = [1, 1]} : vector<9x256xf32> to vector<1x256xf32>
    %307 = vector.broadcast %306 : vector<1x256xf32> to vector<8x256xf32>
    %308 = arith.mulf %305, %307 : vector<8x256xf32>
    %309 = vector.extract_strided_slice %2 {offsets = [0, 35], sizes = [8, 1], strides = [1, 1]} : vector<8x72xf32> to vector<8x1xf32>
    %310 = vector.broadcast %309 : vector<8x1xf32> to vector<8x256xf32>
    %311 = arith.mulf %310, %308 : vector<8x256xf32>
    %312 = arith.addf %304, %311 : vector<8x256xf32>
    %313 = vector.extract_strided_slice %3 {offsets = [0, 0], sizes = [8, 1], strides = [1, 1]} : vector<8x4xf32> to vector<8x1xf32>
    %314 = vector.extract_strided_slice %3 {offsets = [0, 1], sizes = [8, 1], strides = [1, 1]} : vector<8x4xf32> to vector<8x1xf32>
    %315 = arith.mulf %312, %312 : vector<8x256xf32>
    %c4_i32_39 = arith.constant 4 : i32
    %316 = tpu.dynamic_rotate %312 by %c4_i32_39 dim 0 : vector<8x256xf32>, i32 -> vector<8x256xf32>
    %317 = arith.addf %312, %316 : vector<8x256xf32>
    %c4_i32_40 = arith.constant 4 : i32
    %318 = tpu.dynamic_rotate %315 by %c4_i32_40 dim 0 : vector<8x256xf32>, i32 -> vector<8x256xf32>
    %319 = arith.addf %315, %318 : vector<8x256xf32>
    %cst = arith.constant dense<0.000000e+00> : vector<8xf32>
    %320 = vector.multi_reduction <add>, %317, %cst [1] : vector<8x256xf32> to vector<8xf32>
    %321 = vector.shape_cast %320 : vector<8xf32> to vector<8x1xf32>
    %cst_41 = arith.constant 0.001953125 : f32
    %322 = vector.broadcast %cst_41 : f32 to vector<8x1xf32>
    %323 = arith.mulf %321, %322 : vector<8x1xf32>
    %cst_42 = arith.constant dense<0.000000e+00> : vector<8xf32>
    %324 = vector.multi_reduction <add>, %319, %cst_42 [1] : vector<8x256xf32> to vector<8xf32>
    %325 = vector.shape_cast %324 : vector<8xf32> to vector<8x1xf32>
    %cst_43 = arith.constant 0.001953125 : f32
    %326 = vector.broadcast %cst_43 : f32 to vector<8x1xf32>
    %327 = arith.mulf %325, %326 : vector<8x1xf32>
    %328 = arith.mulf %323, %323 : vector<8x1xf32>
    %329 = arith.subf %327, %328 : vector<8x1xf32>
    %cst_44 = arith.constant 0.000000e+00 : f32
    %330 = vector.broadcast %cst_44 : f32 to vector<8x1xf32>
    %331 = arith.maximumf %329, %330 : vector<8x1xf32>
    %cst_45 = arith.constant 9.99999974E-6 : f32
    %332 = vector.broadcast %cst_45 : f32 to vector<8x1xf32>
    %333 = arith.addf %331, %332 : vector<8x1xf32>
    %334 = math.rsqrt %333 : vector<8x1xf32>
    %335 = arith.mulf %334, %313 : vector<8x1xf32>
    %336 = vector.broadcast %335 : vector<8x1xf32> to vector<8x256xf32>
    %337 = arith.mulf %312, %336 : vector<8x256xf32>
    %338 = arith.mulf %323, %335 : vector<8x1xf32>
    %339 = arith.subf %314, %338 : vector<8x1xf32>
    %340 = vector.broadcast %339 : vector<8x1xf32> to vector<8x256xf32>
    %341 = arith.addf %337, %340 : vector<8x256xf32>
    %cst_46 = arith.constant 0.000000e+00 : f32
    %342 = vector.broadcast %cst_46 : f32 to vector<8x256xf32>
    %343 = arith.maximumf %341, %342 : vector<8x256xf32>
    %c17_i32_47 = arith.constant 17 : i32
    %344 = tpu.dynamic_rotate %343 by %c17_i32_47 dim 1 : vector<8x256xf32>, i32 -> vector<8x256xf32>
    %345 = vector.extract_strided_slice %1 {offsets = [0, 0], sizes = [1, 256], strides = [1, 1]} : vector<9x256xf32> to vector<1x256xf32>
    %346 = vector.broadcast %345 : vector<1x256xf32> to vector<8x256xf32>
    %347 = arith.mulf %344, %346 : vector<8x256xf32>
    %348 = vector.extract_strided_slice %2 {offsets = [0, 36], sizes = [8, 1], strides = [1, 1]} : vector<8x72xf32> to vector<8x1xf32>
    %349 = vector.broadcast %348 : vector<8x1xf32> to vector<8x256xf32>
    %350 = arith.mulf %349, %347 : vector<8x256xf32>
    %c16_i32_48 = arith.constant 16 : i32
    %351 = tpu.dynamic_rotate %343 by %c16_i32_48 dim 1 : vector<8x256xf32>, i32 -> vector<8x256xf32>
    %352 = vector.extract_strided_slice %1 {offsets = [1, 0], sizes = [1, 256], strides = [1, 1]} : vector<9x256xf32> to vector<1x256xf32>
    %353 = vector.broadcast %352 : vector<1x256xf32> to vector<8x256xf32>
    %354 = arith.mulf %351, %353 : vector<8x256xf32>
    %355 = vector.extract_strided_slice %2 {offsets = [0, 37], sizes = [8, 1], strides = [1, 1]} : vector<8x72xf32> to vector<8x1xf32>
    %356 = vector.broadcast %355 : vector<8x1xf32> to vector<8x256xf32>
    %357 = arith.mulf %356, %354 : vector<8x256xf32>
    %358 = arith.addf %350, %357 : vector<8x256xf32>
    %c15_i32_49 = arith.constant 15 : i32
    %359 = tpu.dynamic_rotate %343 by %c15_i32_49 dim 1 : vector<8x256xf32>, i32 -> vector<8x256xf32>
    %360 = vector.extract_strided_slice %1 {offsets = [2, 0], sizes = [1, 256], strides = [1, 1]} : vector<9x256xf32> to vector<1x256xf32>
    %361 = vector.broadcast %360 : vector<1x256xf32> to vector<8x256xf32>
    %362 = arith.mulf %359, %361 : vector<8x256xf32>
    %363 = vector.extract_strided_slice %2 {offsets = [0, 38], sizes = [8, 1], strides = [1, 1]} : vector<8x72xf32> to vector<8x1xf32>
    %364 = vector.broadcast %363 : vector<8x1xf32> to vector<8x256xf32>
    %365 = arith.mulf %364, %362 : vector<8x256xf32>
    %366 = arith.addf %358, %365 : vector<8x256xf32>
    %c1_i32_50 = arith.constant 1 : i32
    %367 = tpu.dynamic_rotate %343 by %c1_i32_50 dim 1 : vector<8x256xf32>, i32 -> vector<8x256xf32>
    %368 = vector.extract_strided_slice %1 {offsets = [3, 0], sizes = [1, 256], strides = [1, 1]} : vector<9x256xf32> to vector<1x256xf32>
    %369 = vector.broadcast %368 : vector<1x256xf32> to vector<8x256xf32>
    %370 = arith.mulf %367, %369 : vector<8x256xf32>
    %371 = vector.extract_strided_slice %2 {offsets = [0, 39], sizes = [8, 1], strides = [1, 1]} : vector<8x72xf32> to vector<8x1xf32>
    %372 = vector.broadcast %371 : vector<8x1xf32> to vector<8x256xf32>
    %373 = arith.mulf %372, %370 : vector<8x256xf32>
    %374 = arith.addf %366, %373 : vector<8x256xf32>
    %375 = vector.extract_strided_slice %2 {offsets = [0, 40], sizes = [8, 1], strides = [1, 1]} : vector<8x72xf32> to vector<8x1xf32>
    %376 = vector.broadcast %375 : vector<8x1xf32> to vector<8x256xf32>
    %377 = arith.mulf %376, %343 : vector<8x256xf32>
    %378 = arith.addf %374, %377 : vector<8x256xf32>
    %c255_i32_51 = arith.constant 255 : i32
    %379 = tpu.dynamic_rotate %343 by %c255_i32_51 dim 1 : vector<8x256xf32>, i32 -> vector<8x256xf32>
    %380 = vector.extract_strided_slice %1 {offsets = [5, 0], sizes = [1, 256], strides = [1, 1]} : vector<9x256xf32> to vector<1x256xf32>
    %381 = vector.broadcast %380 : vector<1x256xf32> to vector<8x256xf32>
    %382 = arith.mulf %379, %381 : vector<8x256xf32>
    %383 = vector.extract_strided_slice %2 {offsets = [0, 41], sizes = [8, 1], strides = [1, 1]} : vector<8x72xf32> to vector<8x1xf32>
    %384 = vector.broadcast %383 : vector<8x1xf32> to vector<8x256xf32>
    %385 = arith.mulf %384, %382 : vector<8x256xf32>
    %386 = arith.addf %378, %385 : vector<8x256xf32>
    %c241_i32_52 = arith.constant 241 : i32
    %387 = tpu.dynamic_rotate %343 by %c241_i32_52 dim 1 : vector<8x256xf32>, i32 -> vector<8x256xf32>
    %388 = vector.extract_strided_slice %1 {offsets = [6, 0], sizes = [1, 256], strides = [1, 1]} : vector<9x256xf32> to vector<1x256xf32>
    %389 = vector.broadcast %388 : vector<1x256xf32> to vector<8x256xf32>
    %390 = arith.mulf %387, %389 : vector<8x256xf32>
    %391 = vector.extract_strided_slice %2 {offsets = [0, 42], sizes = [8, 1], strides = [1, 1]} : vector<8x72xf32> to vector<8x1xf32>
    %392 = vector.broadcast %391 : vector<8x1xf32> to vector<8x256xf32>
    %393 = arith.mulf %392, %390 : vector<8x256xf32>
    %394 = arith.addf %386, %393 : vector<8x256xf32>
    %c240_i32_53 = arith.constant 240 : i32
    %395 = tpu.dynamic_rotate %343 by %c240_i32_53 dim 1 : vector<8x256xf32>, i32 -> vector<8x256xf32>
    %396 = vector.extract_strided_slice %1 {offsets = [7, 0], sizes = [1, 256], strides = [1, 1]} : vector<9x256xf32> to vector<1x256xf32>
    %397 = vector.broadcast %396 : vector<1x256xf32> to vector<8x256xf32>
    %398 = arith.mulf %395, %397 : vector<8x256xf32>
    %399 = vector.extract_strided_slice %2 {offsets = [0, 43], sizes = [8, 1], strides = [1, 1]} : vector<8x72xf32> to vector<8x1xf32>
    %400 = vector.broadcast %399 : vector<8x1xf32> to vector<8x256xf32>
    %401 = arith.mulf %400, %398 : vector<8x256xf32>
    %402 = arith.addf %394, %401 : vector<8x256xf32>
    %c239_i32_54 = arith.constant 239 : i32
    %403 = tpu.dynamic_rotate %343 by %c239_i32_54 dim 1 : vector<8x256xf32>, i32 -> vector<8x256xf32>
    %404 = vector.extract_strided_slice %1 {offsets = [8, 0], sizes = [1, 256], strides = [1, 1]} : vector<9x256xf32> to vector<1x256xf32>
    %405 = vector.broadcast %404 : vector<1x256xf32> to vector<8x256xf32>
    %406 = arith.mulf %403, %405 : vector<8x256xf32>
    %407 = vector.extract_strided_slice %2 {offsets = [0, 44], sizes = [8, 1], strides = [1, 1]} : vector<8x72xf32> to vector<8x1xf32>
    %408 = vector.broadcast %407 : vector<8x1xf32> to vector<8x256xf32>
    %409 = arith.mulf %408, %406 : vector<8x256xf32>
    %410 = arith.addf %402, %409 : vector<8x256xf32>
    %c7_i32_55 = arith.constant 7 : i32
    %411 = tpu.dynamic_rotate %343 by %c7_i32_55 dim 0 : vector<8x256xf32>, i32 -> vector<8x256xf32>
    %c3_i32_56 = arith.constant 3 : i32
    %412 = tpu.dynamic_rotate %343 by %c3_i32_56 dim 0 : vector<8x256xf32>, i32 -> vector<8x256xf32>
    %413 = vector.shape_cast %22 : vector<8x1xi1> to vector<8x1xi1>
    %414 = vector.broadcast %413 : vector<8x1xi1> to vector<8x256xi1>
    %415 = arith.select %414, %411, %412 : vector<8x256xi1>, vector<8x256xf32>
    %c17_i32_57 = arith.constant 17 : i32
    %416 = tpu.dynamic_rotate %415 by %c17_i32_57 dim 1 : vector<8x256xf32>, i32 -> vector<8x256xf32>
    %417 = vector.extract_strided_slice %1 {offsets = [0, 0], sizes = [1, 256], strides = [1, 1]} : vector<9x256xf32> to vector<1x256xf32>
    %418 = vector.broadcast %417 : vector<1x256xf32> to vector<8x256xf32>
    %419 = arith.mulf %416, %418 : vector<8x256xf32>
    %420 = vector.extract_strided_slice %2 {offsets = [0, 45], sizes = [8, 1], strides = [1, 1]} : vector<8x72xf32> to vector<8x1xf32>
    %421 = vector.broadcast %420 : vector<8x1xf32> to vector<8x256xf32>
    %422 = arith.mulf %421, %419 : vector<8x256xf32>
    %423 = arith.addf %410, %422 : vector<8x256xf32>
    %c16_i32_58 = arith.constant 16 : i32
    %424 = tpu.dynamic_rotate %415 by %c16_i32_58 dim 1 : vector<8x256xf32>, i32 -> vector<8x256xf32>
    %425 = vector.extract_strided_slice %1 {offsets = [1, 0], sizes = [1, 256], strides = [1, 1]} : vector<9x256xf32> to vector<1x256xf32>
    %426 = vector.broadcast %425 : vector<1x256xf32> to vector<8x256xf32>
    %427 = arith.mulf %424, %426 : vector<8x256xf32>
    %428 = vector.extract_strided_slice %2 {offsets = [0, 46], sizes = [8, 1], strides = [1, 1]} : vector<8x72xf32> to vector<8x1xf32>
    %429 = vector.broadcast %428 : vector<8x1xf32> to vector<8x256xf32>
    %430 = arith.mulf %429, %427 : vector<8x256xf32>
    %431 = arith.addf %423, %430 : vector<8x256xf32>
    %c15_i32_59 = arith.constant 15 : i32
    %432 = tpu.dynamic_rotate %415 by %c15_i32_59 dim 1 : vector<8x256xf32>, i32 -> vector<8x256xf32>
    %433 = vector.extract_strided_slice %1 {offsets = [2, 0], sizes = [1, 256], strides = [1, 1]} : vector<9x256xf32> to vector<1x256xf32>
    %434 = vector.broadcast %433 : vector<1x256xf32> to vector<8x256xf32>
    %435 = arith.mulf %432, %434 : vector<8x256xf32>
    %436 = vector.extract_strided_slice %2 {offsets = [0, 47], sizes = [8, 1], strides = [1, 1]} : vector<8x72xf32> to vector<8x1xf32>
    %437 = vector.broadcast %436 : vector<8x1xf32> to vector<8x256xf32>
    %438 = arith.mulf %437, %435 : vector<8x256xf32>
    %439 = arith.addf %431, %438 : vector<8x256xf32>
    %c1_i32_60 = arith.constant 1 : i32
    %440 = tpu.dynamic_rotate %415 by %c1_i32_60 dim 1 : vector<8x256xf32>, i32 -> vector<8x256xf32>
    %441 = vector.extract_strided_slice %1 {offsets = [3, 0], sizes = [1, 256], strides = [1, 1]} : vector<9x256xf32> to vector<1x256xf32>
    %442 = vector.broadcast %441 : vector<1x256xf32> to vector<8x256xf32>
    %443 = arith.mulf %440, %442 : vector<8x256xf32>
    %444 = vector.extract_strided_slice %2 {offsets = [0, 48], sizes = [8, 1], strides = [1, 1]} : vector<8x72xf32> to vector<8x1xf32>
    %445 = vector.broadcast %444 : vector<8x1xf32> to vector<8x256xf32>
    %446 = arith.mulf %445, %443 : vector<8x256xf32>
    %447 = arith.addf %439, %446 : vector<8x256xf32>
    %448 = vector.extract_strided_slice %2 {offsets = [0, 49], sizes = [8, 1], strides = [1, 1]} : vector<8x72xf32> to vector<8x1xf32>
    %449 = vector.broadcast %448 : vector<8x1xf32> to vector<8x256xf32>
    %450 = arith.mulf %449, %415 : vector<8x256xf32>
    %451 = arith.addf %447, %450 : vector<8x256xf32>
    %c255_i32_61 = arith.constant 255 : i32
    %452 = tpu.dynamic_rotate %415 by %c255_i32_61 dim 1 : vector<8x256xf32>, i32 -> vector<8x256xf32>
    %453 = vector.extract_strided_slice %1 {offsets = [5, 0], sizes = [1, 256], strides = [1, 1]} : vector<9x256xf32> to vector<1x256xf32>
    %454 = vector.broadcast %453 : vector<1x256xf32> to vector<8x256xf32>
    %455 = arith.mulf %452, %454 : vector<8x256xf32>
    %456 = vector.extract_strided_slice %2 {offsets = [0, 50], sizes = [8, 1], strides = [1, 1]} : vector<8x72xf32> to vector<8x1xf32>
    %457 = vector.broadcast %456 : vector<8x1xf32> to vector<8x256xf32>
    %458 = arith.mulf %457, %455 : vector<8x256xf32>
    %459 = arith.addf %451, %458 : vector<8x256xf32>
    %c241_i32_62 = arith.constant 241 : i32
    %460 = tpu.dynamic_rotate %415 by %c241_i32_62 dim 1 : vector<8x256xf32>, i32 -> vector<8x256xf32>
    %461 = vector.extract_strided_slice %1 {offsets = [6, 0], sizes = [1, 256], strides = [1, 1]} : vector<9x256xf32> to vector<1x256xf32>
    %462 = vector.broadcast %461 : vector<1x256xf32> to vector<8x256xf32>
    %463 = arith.mulf %460, %462 : vector<8x256xf32>
    %464 = vector.extract_strided_slice %2 {offsets = [0, 51], sizes = [8, 1], strides = [1, 1]} : vector<8x72xf32> to vector<8x1xf32>
    %465 = vector.broadcast %464 : vector<8x1xf32> to vector<8x256xf32>
    %466 = arith.mulf %465, %463 : vector<8x256xf32>
    %467 = arith.addf %459, %466 : vector<8x256xf32>
    %c240_i32_63 = arith.constant 240 : i32
    %468 = tpu.dynamic_rotate %415 by %c240_i32_63 dim 1 : vector<8x256xf32>, i32 -> vector<8x256xf32>
    %469 = vector.extract_strided_slice %1 {offsets = [7, 0], sizes = [1, 256], strides = [1, 1]} : vector<9x256xf32> to vector<1x256xf32>
    %470 = vector.broadcast %469 : vector<1x256xf32> to vector<8x256xf32>
    %471 = arith.mulf %468, %470 : vector<8x256xf32>
    %472 = vector.extract_strided_slice %2 {offsets = [0, 52], sizes = [8, 1], strides = [1, 1]} : vector<8x72xf32> to vector<8x1xf32>
    %473 = vector.broadcast %472 : vector<8x1xf32> to vector<8x256xf32>
    %474 = arith.mulf %473, %471 : vector<8x256xf32>
    %475 = arith.addf %467, %474 : vector<8x256xf32>
    %c239_i32_64 = arith.constant 239 : i32
    %476 = tpu.dynamic_rotate %415 by %c239_i32_64 dim 1 : vector<8x256xf32>, i32 -> vector<8x256xf32>
    %477 = vector.extract_strided_slice %1 {offsets = [8, 0], sizes = [1, 256], strides = [1, 1]} : vector<9x256xf32> to vector<1x256xf32>
    %478 = vector.broadcast %477 : vector<1x256xf32> to vector<8x256xf32>
    %479 = arith.mulf %476, %478 : vector<8x256xf32>
    %480 = vector.extract_strided_slice %2 {offsets = [0, 53], sizes = [8, 1], strides = [1, 1]} : vector<8x72xf32> to vector<8x1xf32>
    %481 = vector.broadcast %480 : vector<8x1xf32> to vector<8x256xf32>
    %482 = arith.mulf %481, %479 : vector<8x256xf32>
    %483 = arith.addf %475, %482 : vector<8x256xf32>
    %c6_i32_65 = arith.constant 6 : i32
    %484 = tpu.dynamic_rotate %343 by %c6_i32_65 dim 0 : vector<8x256xf32>, i32 -> vector<8x256xf32>
    %c2_i32_66 = arith.constant 2 : i32
    %485 = tpu.dynamic_rotate %343 by %c2_i32_66 dim 0 : vector<8x256xf32>, i32 -> vector<8x256xf32>
    %486 = vector.shape_cast %24 : vector<8x1xi1> to vector<8x1xi1>
    %487 = vector.broadcast %486 : vector<8x1xi1> to vector<8x256xi1>
    %488 = arith.select %487, %484, %485 : vector<8x256xi1>, vector<8x256xf32>
    %c17_i32_67 = arith.constant 17 : i32
    %489 = tpu.dynamic_rotate %488 by %c17_i32_67 dim 1 : vector<8x256xf32>, i32 -> vector<8x256xf32>
    %490 = vector.extract_strided_slice %1 {offsets = [0, 0], sizes = [1, 256], strides = [1, 1]} : vector<9x256xf32> to vector<1x256xf32>
    %491 = vector.broadcast %490 : vector<1x256xf32> to vector<8x256xf32>
    %492 = arith.mulf %489, %491 : vector<8x256xf32>
    %493 = vector.extract_strided_slice %2 {offsets = [0, 54], sizes = [8, 1], strides = [1, 1]} : vector<8x72xf32> to vector<8x1xf32>
    %494 = vector.broadcast %493 : vector<8x1xf32> to vector<8x256xf32>
    %495 = arith.mulf %494, %492 : vector<8x256xf32>
    %496 = arith.addf %483, %495 : vector<8x256xf32>
    %c16_i32_68 = arith.constant 16 : i32
    %497 = tpu.dynamic_rotate %488 by %c16_i32_68 dim 1 : vector<8x256xf32>, i32 -> vector<8x256xf32>
    %498 = vector.extract_strided_slice %1 {offsets = [1, 0], sizes = [1, 256], strides = [1, 1]} : vector<9x256xf32> to vector<1x256xf32>
    %499 = vector.broadcast %498 : vector<1x256xf32> to vector<8x256xf32>
    %500 = arith.mulf %497, %499 : vector<8x256xf32>
    %501 = vector.extract_strided_slice %2 {offsets = [0, 55], sizes = [8, 1], strides = [1, 1]} : vector<8x72xf32> to vector<8x1xf32>
    %502 = vector.broadcast %501 : vector<8x1xf32> to vector<8x256xf32>
    %503 = arith.mulf %502, %500 : vector<8x256xf32>
    %504 = arith.addf %496, %503 : vector<8x256xf32>
    %c15_i32_69 = arith.constant 15 : i32
    %505 = tpu.dynamic_rotate %488 by %c15_i32_69 dim 1 : vector<8x256xf32>, i32 -> vector<8x256xf32>
    %506 = vector.extract_strided_slice %1 {offsets = [2, 0], sizes = [1, 256], strides = [1, 1]} : vector<9x256xf32> to vector<1x256xf32>
    %507 = vector.broadcast %506 : vector<1x256xf32> to vector<8x256xf32>
    %508 = arith.mulf %505, %507 : vector<8x256xf32>
    %509 = vector.extract_strided_slice %2 {offsets = [0, 56], sizes = [8, 1], strides = [1, 1]} : vector<8x72xf32> to vector<8x1xf32>
    %510 = vector.broadcast %509 : vector<8x1xf32> to vector<8x256xf32>
    %511 = arith.mulf %510, %508 : vector<8x256xf32>
    %512 = arith.addf %504, %511 : vector<8x256xf32>
    %c1_i32_70 = arith.constant 1 : i32
    %513 = tpu.dynamic_rotate %488 by %c1_i32_70 dim 1 : vector<8x256xf32>, i32 -> vector<8x256xf32>
    %514 = vector.extract_strided_slice %1 {offsets = [3, 0], sizes = [1, 256], strides = [1, 1]} : vector<9x256xf32> to vector<1x256xf32>
    %515 = vector.broadcast %514 : vector<1x256xf32> to vector<8x256xf32>
    %516 = arith.mulf %513, %515 : vector<8x256xf32>
    %517 = vector.extract_strided_slice %2 {offsets = [0, 57], sizes = [8, 1], strides = [1, 1]} : vector<8x72xf32> to vector<8x1xf32>
    %518 = vector.broadcast %517 : vector<8x1xf32> to vector<8x256xf32>
    %519 = arith.mulf %518, %516 : vector<8x256xf32>
    %520 = arith.addf %512, %519 : vector<8x256xf32>
    %521 = vector.extract_strided_slice %2 {offsets = [0, 58], sizes = [8, 1], strides = [1, 1]} : vector<8x72xf32> to vector<8x1xf32>
    %522 = vector.broadcast %521 : vector<8x1xf32> to vector<8x256xf32>
    %523 = arith.mulf %522, %488 : vector<8x256xf32>
    %524 = arith.addf %520, %523 : vector<8x256xf32>
    %c255_i32_71 = arith.constant 255 : i32
    %525 = tpu.dynamic_rotate %488 by %c255_i32_71 dim 1 : vector<8x256xf32>, i32 -> vector<8x256xf32>
    %526 = vector.extract_strided_slice %1 {offsets = [5, 0], sizes = [1, 256], strides = [1, 1]} : vector<9x256xf32> to vector<1x256xf32>
    %527 = vector.broadcast %526 : vector<1x256xf32> to vector<8x256xf32>
    %528 = arith.mulf %525, %527 : vector<8x256xf32>
    %529 = vector.extract_strided_slice %2 {offsets = [0, 59], sizes = [8, 1], strides = [1, 1]} : vector<8x72xf32> to vector<8x1xf32>
    %530 = vector.broadcast %529 : vector<8x1xf32> to vector<8x256xf32>
    %531 = arith.mulf %530, %528 : vector<8x256xf32>
    %532 = arith.addf %524, %531 : vector<8x256xf32>
    %c241_i32_72 = arith.constant 241 : i32
    %533 = tpu.dynamic_rotate %488 by %c241_i32_72 dim 1 : vector<8x256xf32>, i32 -> vector<8x256xf32>
    %534 = vector.extract_strided_slice %1 {offsets = [6, 0], sizes = [1, 256], strides = [1, 1]} : vector<9x256xf32> to vector<1x256xf32>
    %535 = vector.broadcast %534 : vector<1x256xf32> to vector<8x256xf32>
    %536 = arith.mulf %533, %535 : vector<8x256xf32>
    %537 = vector.extract_strided_slice %2 {offsets = [0, 60], sizes = [8, 1], strides = [1, 1]} : vector<8x72xf32> to vector<8x1xf32>
    %538 = vector.broadcast %537 : vector<8x1xf32> to vector<8x256xf32>
    %539 = arith.mulf %538, %536 : vector<8x256xf32>
    %540 = arith.addf %532, %539 : vector<8x256xf32>
    %c240_i32_73 = arith.constant 240 : i32
    %541 = tpu.dynamic_rotate %488 by %c240_i32_73 dim 1 : vector<8x256xf32>, i32 -> vector<8x256xf32>
    %542 = vector.extract_strided_slice %1 {offsets = [7, 0], sizes = [1, 256], strides = [1, 1]} : vector<9x256xf32> to vector<1x256xf32>
    %543 = vector.broadcast %542 : vector<1x256xf32> to vector<8x256xf32>
    %544 = arith.mulf %541, %543 : vector<8x256xf32>
    %545 = vector.extract_strided_slice %2 {offsets = [0, 61], sizes = [8, 1], strides = [1, 1]} : vector<8x72xf32> to vector<8x1xf32>
    %546 = vector.broadcast %545 : vector<8x1xf32> to vector<8x256xf32>
    %547 = arith.mulf %546, %544 : vector<8x256xf32>
    %548 = arith.addf %540, %547 : vector<8x256xf32>
    %c239_i32_74 = arith.constant 239 : i32
    %549 = tpu.dynamic_rotate %488 by %c239_i32_74 dim 1 : vector<8x256xf32>, i32 -> vector<8x256xf32>
    %550 = vector.extract_strided_slice %1 {offsets = [8, 0], sizes = [1, 256], strides = [1, 1]} : vector<9x256xf32> to vector<1x256xf32>
    %551 = vector.broadcast %550 : vector<1x256xf32> to vector<8x256xf32>
    %552 = arith.mulf %549, %551 : vector<8x256xf32>
    %553 = vector.extract_strided_slice %2 {offsets = [0, 62], sizes = [8, 1], strides = [1, 1]} : vector<8x72xf32> to vector<8x1xf32>
    %554 = vector.broadcast %553 : vector<8x1xf32> to vector<8x256xf32>
    %555 = arith.mulf %554, %552 : vector<8x256xf32>
    %556 = arith.addf %548, %555 : vector<8x256xf32>
    %c5_i32_75 = arith.constant 5 : i32
    %557 = tpu.dynamic_rotate %343 by %c5_i32_75 dim 0 : vector<8x256xf32>, i32 -> vector<8x256xf32>
    %c1_i32_76 = arith.constant 1 : i32
    %558 = tpu.dynamic_rotate %343 by %c1_i32_76 dim 0 : vector<8x256xf32>, i32 -> vector<8x256xf32>
    %559 = vector.shape_cast %26 : vector<8x1xi1> to vector<8x1xi1>
    %560 = vector.broadcast %559 : vector<8x1xi1> to vector<8x256xi1>
    %561 = arith.select %560, %557, %558 : vector<8x256xi1>, vector<8x256xf32>
    %c17_i32_77 = arith.constant 17 : i32
    %562 = tpu.dynamic_rotate %561 by %c17_i32_77 dim 1 : vector<8x256xf32>, i32 -> vector<8x256xf32>
    %563 = vector.extract_strided_slice %1 {offsets = [0, 0], sizes = [1, 256], strides = [1, 1]} : vector<9x256xf32> to vector<1x256xf32>
    %564 = vector.broadcast %563 : vector<1x256xf32> to vector<8x256xf32>
    %565 = arith.mulf %562, %564 : vector<8x256xf32>
    %566 = vector.extract_strided_slice %2 {offsets = [0, 63], sizes = [8, 1], strides = [1, 1]} : vector<8x72xf32> to vector<8x1xf32>
    %567 = vector.broadcast %566 : vector<8x1xf32> to vector<8x256xf32>
    %568 = arith.mulf %567, %565 : vector<8x256xf32>
    %569 = arith.addf %556, %568 : vector<8x256xf32>
    %c16_i32_78 = arith.constant 16 : i32
    %570 = tpu.dynamic_rotate %561 by %c16_i32_78 dim 1 : vector<8x256xf32>, i32 -> vector<8x256xf32>
    %571 = vector.extract_strided_slice %1 {offsets = [1, 0], sizes = [1, 256], strides = [1, 1]} : vector<9x256xf32> to vector<1x256xf32>
    %572 = vector.broadcast %571 : vector<1x256xf32> to vector<8x256xf32>
    %573 = arith.mulf %570, %572 : vector<8x256xf32>
    %574 = vector.extract_strided_slice %2 {offsets = [0, 64], sizes = [8, 1], strides = [1, 1]} : vector<8x72xf32> to vector<8x1xf32>
    %575 = vector.broadcast %574 : vector<8x1xf32> to vector<8x256xf32>
    %576 = arith.mulf %575, %573 : vector<8x256xf32>
    %577 = arith.addf %569, %576 : vector<8x256xf32>
    %c15_i32_79 = arith.constant 15 : i32
    %578 = tpu.dynamic_rotate %561 by %c15_i32_79 dim 1 : vector<8x256xf32>, i32 -> vector<8x256xf32>
    %579 = vector.extract_strided_slice %1 {offsets = [2, 0], sizes = [1, 256], strides = [1, 1]} : vector<9x256xf32> to vector<1x256xf32>
    %580 = vector.broadcast %579 : vector<1x256xf32> to vector<8x256xf32>
    %581 = arith.mulf %578, %580 : vector<8x256xf32>
    %582 = vector.extract_strided_slice %2 {offsets = [0, 65], sizes = [8, 1], strides = [1, 1]} : vector<8x72xf32> to vector<8x1xf32>
    %583 = vector.broadcast %582 : vector<8x1xf32> to vector<8x256xf32>
    %584 = arith.mulf %583, %581 : vector<8x256xf32>
    %585 = arith.addf %577, %584 : vector<8x256xf32>
    %c1_i32_80 = arith.constant 1 : i32
    %586 = tpu.dynamic_rotate %561 by %c1_i32_80 dim 1 : vector<8x256xf32>, i32 -> vector<8x256xf32>
    %587 = vector.extract_strided_slice %1 {offsets = [3, 0], sizes = [1, 256], strides = [1, 1]} : vector<9x256xf32> to vector<1x256xf32>
    %588 = vector.broadcast %587 : vector<1x256xf32> to vector<8x256xf32>
    %589 = arith.mulf %586, %588 : vector<8x256xf32>
    %590 = vector.extract_strided_slice %2 {offsets = [0, 66], sizes = [8, 1], strides = [1, 1]} : vector<8x72xf32> to vector<8x1xf32>
    %591 = vector.broadcast %590 : vector<8x1xf32> to vector<8x256xf32>
    %592 = arith.mulf %591, %589 : vector<8x256xf32>
    %593 = arith.addf %585, %592 : vector<8x256xf32>
    %594 = vector.extract_strided_slice %2 {offsets = [0, 67], sizes = [8, 1], strides = [1, 1]} : vector<8x72xf32> to vector<8x1xf32>
    %595 = vector.broadcast %594 : vector<8x1xf32> to vector<8x256xf32>
    %596 = arith.mulf %595, %561 : vector<8x256xf32>
    %597 = arith.addf %593, %596 : vector<8x256xf32>
    %c255_i32_81 = arith.constant 255 : i32
    %598 = tpu.dynamic_rotate %561 by %c255_i32_81 dim 1 : vector<8x256xf32>, i32 -> vector<8x256xf32>
    %599 = vector.extract_strided_slice %1 {offsets = [5, 0], sizes = [1, 256], strides = [1, 1]} : vector<9x256xf32> to vector<1x256xf32>
    %600 = vector.broadcast %599 : vector<1x256xf32> to vector<8x256xf32>
    %601 = arith.mulf %598, %600 : vector<8x256xf32>
    %602 = vector.extract_strided_slice %2 {offsets = [0, 68], sizes = [8, 1], strides = [1, 1]} : vector<8x72xf32> to vector<8x1xf32>
    %603 = vector.broadcast %602 : vector<8x1xf32> to vector<8x256xf32>
    %604 = arith.mulf %603, %601 : vector<8x256xf32>
    %605 = arith.addf %597, %604 : vector<8x256xf32>
    %c241_i32_82 = arith.constant 241 : i32
    %606 = tpu.dynamic_rotate %561 by %c241_i32_82 dim 1 : vector<8x256xf32>, i32 -> vector<8x256xf32>
    %607 = vector.extract_strided_slice %1 {offsets = [6, 0], sizes = [1, 256], strides = [1, 1]} : vector<9x256xf32> to vector<1x256xf32>
    %608 = vector.broadcast %607 : vector<1x256xf32> to vector<8x256xf32>
    %609 = arith.mulf %606, %608 : vector<8x256xf32>
    %610 = vector.extract_strided_slice %2 {offsets = [0, 69], sizes = [8, 1], strides = [1, 1]} : vector<8x72xf32> to vector<8x1xf32>
    %611 = vector.broadcast %610 : vector<8x1xf32> to vector<8x256xf32>
    %612 = arith.mulf %611, %609 : vector<8x256xf32>
    %613 = arith.addf %605, %612 : vector<8x256xf32>
    %c240_i32_83 = arith.constant 240 : i32
    %614 = tpu.dynamic_rotate %561 by %c240_i32_83 dim 1 : vector<8x256xf32>, i32 -> vector<8x256xf32>
    %615 = vector.extract_strided_slice %1 {offsets = [7, 0], sizes = [1, 256], strides = [1, 1]} : vector<9x256xf32> to vector<1x256xf32>
    %616 = vector.broadcast %615 : vector<1x256xf32> to vector<8x256xf32>
    %617 = arith.mulf %614, %616 : vector<8x256xf32>
    %618 = vector.extract_strided_slice %2 {offsets = [0, 70], sizes = [8, 1], strides = [1, 1]} : vector<8x72xf32> to vector<8x1xf32>
    %619 = vector.broadcast %618 : vector<8x1xf32> to vector<8x256xf32>
    %620 = arith.mulf %619, %617 : vector<8x256xf32>
    %621 = arith.addf %613, %620 : vector<8x256xf32>
    %c239_i32_84 = arith.constant 239 : i32
    %622 = tpu.dynamic_rotate %561 by %c239_i32_84 dim 1 : vector<8x256xf32>, i32 -> vector<8x256xf32>
    %623 = vector.extract_strided_slice %1 {offsets = [8, 0], sizes = [1, 256], strides = [1, 1]} : vector<9x256xf32> to vector<1x256xf32>
    %624 = vector.broadcast %623 : vector<1x256xf32> to vector<8x256xf32>
    %625 = arith.mulf %622, %624 : vector<8x256xf32>
    %626 = vector.extract_strided_slice %2 {offsets = [0, 71], sizes = [8, 1], strides = [1, 1]} : vector<8x72xf32> to vector<8x1xf32>
    %627 = vector.broadcast %626 : vector<8x1xf32> to vector<8x256xf32>
    %628 = arith.mulf %627, %625 : vector<8x256xf32>
    %629 = arith.addf %621, %628 : vector<8x256xf32>
    %630 = vector.extract_strided_slice %3 {offsets = [0, 2], sizes = [8, 1], strides = [1, 1]} : vector<8x4xf32> to vector<8x1xf32>
    %631 = vector.extract_strided_slice %3 {offsets = [0, 3], sizes = [8, 1], strides = [1, 1]} : vector<8x4xf32> to vector<8x1xf32>
    %632 = arith.mulf %629, %629 : vector<8x256xf32>
    %c4_i32_85 = arith.constant 4 : i32
    %633 = tpu.dynamic_rotate %629 by %c4_i32_85 dim 0 : vector<8x256xf32>, i32 -> vector<8x256xf32>
    %634 = arith.addf %629, %633 : vector<8x256xf32>
    %c4_i32_86 = arith.constant 4 : i32
    %635 = tpu.dynamic_rotate %632 by %c4_i32_86 dim 0 : vector<8x256xf32>, i32 -> vector<8x256xf32>
    %636 = arith.addf %632, %635 : vector<8x256xf32>
    %cst_87 = arith.constant dense<0.000000e+00> : vector<8xf32>
    %637 = vector.multi_reduction <add>, %634, %cst_87 [1] : vector<8x256xf32> to vector<8xf32>
    %638 = vector.shape_cast %637 : vector<8xf32> to vector<8x1xf32>
    %cst_88 = arith.constant 0.001953125 : f32
    %639 = vector.broadcast %cst_88 : f32 to vector<8x1xf32>
    %640 = arith.mulf %638, %639 : vector<8x1xf32>
    %cst_89 = arith.constant dense<0.000000e+00> : vector<8xf32>
    %641 = vector.multi_reduction <add>, %636, %cst_89 [1] : vector<8x256xf32> to vector<8xf32>
    %642 = vector.shape_cast %641 : vector<8xf32> to vector<8x1xf32>
    %cst_90 = arith.constant 0.001953125 : f32
    %643 = vector.broadcast %cst_90 : f32 to vector<8x1xf32>
    %644 = arith.mulf %642, %643 : vector<8x1xf32>
    %645 = arith.mulf %640, %640 : vector<8x1xf32>
    %646 = arith.subf %644, %645 : vector<8x1xf32>
    %cst_91 = arith.constant 0.000000e+00 : f32
    %647 = vector.broadcast %cst_91 : f32 to vector<8x1xf32>
    %648 = arith.maximumf %646, %647 : vector<8x1xf32>
    %cst_92 = arith.constant 9.99999974E-6 : f32
    %649 = vector.broadcast %cst_92 : f32 to vector<8x1xf32>
    %650 = arith.addf %648, %649 : vector<8x1xf32>
    %651 = math.rsqrt %650 : vector<8x1xf32>
    %652 = arith.mulf %651, %630 : vector<8x1xf32>
    %653 = vector.broadcast %652 : vector<8x1xf32> to vector<8x256xf32>
    %654 = arith.mulf %629, %653 : vector<8x256xf32>
    %655 = arith.mulf %640, %652 : vector<8x1xf32>
    %656 = arith.subf %631, %655 : vector<8x1xf32>
    %657 = vector.broadcast %656 : vector<8x1xf32> to vector<8x256xf32>
    %658 = arith.addf %654, %657 : vector<8x256xf32>
    %659 = arith.addf %658, %0 : vector<8x256xf32>
    %cst_93 = arith.constant 0.000000e+00 : f32
    %660 = vector.broadcast %cst_93 : f32 to vector<8x256xf32>
    %661 = arith.maximumf %659, %660 : vector<8x256xf32>
    %c0_94 = arith.constant 0 : index
    %c0_95 = arith.constant 0 : index
    %662 = vector.load %arg4[%c0_94, %c0_95] : memref<8x256xf32, #tpu.memory_space<vmem>>, vector<8x256xf32>
    tpu.vector_store %arg4[%c0_94, %c0_95], %661 {strides = array<i32>} : memref<8x256xf32, #tpu.memory_space<vmem>>, vector<8x256xf32>,
    return
  }
}

</mosaic_0001>

<bundles_post_ra>
// kernel: convnet_block.1
= control target key start
LH: loop header
LB: loop body
LE: loop exit
PB: predicated region body
PF: predicated region fallthrough
CT: control target
= control target key end

     0   :  { %v3057_v0 = vmov 2   ;;  %v3060_v2 = vmov 0   ;;  %s1513_s19 = smov 17   ;;  %v3059_v4 = vmov 1   ;;  %v1515_v6 = vmov 6   ;;  %s1516_s22 = smov 16   ;;  %s3052_s2 = inlined_call_operand.vmem [shape: f32[8,72], index: 2, kind: input, shape index: {}]   ;;  %s3053_s0 = inlined_call_operand.vmem [shape: f32[8,256], index: 0, kind: input, shape index: {}]   ;;  %s3054_s1 = inlined_call_operand.vmem [shape: f32[9,256], index: 1, kind: input, shape index: {}]   ;;  %s3055_s3 = inlined_call_operand.vmem [shape: f32[8,4], index: 3, kind: input, shape index: {}]   ;;  %s3056_s4 = inlined_call_operand.vmem [shape: f32[8,256], index: 4, kind: output, shape index: {}]  }
   0x1   :  { %1427 = vset.pattern.permute.xlu1 %v3057_v0  ;;  %v1620_v1 = vld [vmem:[%s3052_s2] sm:$0xff]  ;;  %1425 = vset.pattern.permute.xlu0 %v3060_v2  ;;  %v1637_v5 = vld [vmem:[%s3053_s0 + $0x8] sm:$0xff]  ;;  %v3058_v7 = vmov 3   ;;  %s1518_s23 = smov 15   ;;  %v1519_v8 = vmov 4   ;;  %v1520_v9 = vmov 5   ;;  %v3061_v15 = vlaneseq }
   0x2   :  { %111 = vperm.xlu1 %1427, %v1620_v1   ;;  %63 = vperm.xlu0 %1425, %v1620_v1   ;;  %v1628_v3 = vld [vmem:[%s3053_s0] sm:$0xff]  ;;  %s1521_s24 = smov 1   ;;  %s1522_s25 = smov 127   ;;  %v1523_v10 = vmov 8   ;;  %v1525_v11 = vmov 7   ;;  %v1526_v12 = vmov 9  }
   0x3   :  { %s1524_s26 = smov 113   ;;  %v1527_v13 = vmov 10   ;;  %v1528_v14 = vmov 15   ;;  %s1529_s27 = smov 112   ;;  %v1530_v16 = vmov 11   ;;  %v1673_v17 = vshrl.u32 %v3061_v15, 7 }
   0x4   :  { %v1531_v19 = vmov 12   ;;  %s1532_s28 = smov 111   ;;  %v251_v20 = vrot.slane %v1628_v3, 1  ;;  %v253_v21 = vrot.slane %v1628_v3, 5  ;;  %v1533_v22 = vmov 13  }
   0x5   :  { %v1679_v18 = vand.u32 3, %v1673_v17  ;;  %v252_v24 = vrot.slane %v1637_v5, 1  ;;  %v254_v25 = vrot.slane %v1637_v5, 5  ;;  %v1534_v26 = vmov 14  }
   0x6   :  { %42 = vrot.lane.b32.xlu1 %v1628_v3, %s1513_s19  ;;  %1426 = vset.pattern.permute.xlu0 %v3059_v4  ;;  %v1535_v28 = vmov 17   ;;  %v1536_v29 = vmov 18   ;;  %v1537_v30 = vmov 19   ;;  %v1538_v31 = vmov 20  }
   0x7   :  { %86 = vperm.xlu0 %1426, %v1620_v1   ;;  %1431 = vset.pattern.permute.xlu1 %v1515_v6  ;;  %3101 = vst [vmem:[#allocation2_spill] sm:$0xff] %v1679_v18  ;;  %vm39_vm0 = vcmp.lt.s32.totalorder %v1679_v18, 3  ;;  %v1539_v32 = vmov 21   ;;  %v1540_v33 = vmov 16   ;;  %v1541_v34 = vmov 22  }
   0x8   :  { %v1692_v23 = vsel %vm39_vm0, %v251_v20, %v253_v21  ;;  %v1700_v27 = vsel %vm39_vm0, %v252_v24, %v254_v25  ;;  %v396_v35 = vrot.slane %v1637_v5, 2  ;;  %v398_v36 = vrot.slane %v1637_v5, 6 }
   0x9   :  { %3102 = vst [vmem:[#allocation3_spill] sm:$0xff] %v1692_v23  ;;  %3103 = vst [vmem:[#allocation4_spill] sm:$0xff] %v1700_v27  ;;  %v1542_v37 = vmov 23   ;;  %vm40_vm1 = vcmp.lt.s32.totalorder %v1679_v18, 2  ;;  %v1543_v38 = vmov 24   ;;  %v395_v39 = vrot.slane %v1628_v3, 2 }
   0xa   :  { %44 = vrot.lane.b32.xlu1 %v1637_v5, %s1513_s19  ;;  %v397_v40 = vrot.slane %v1628_v3, 6  ;;  %v1741_v41 = vsel %vm40_vm1, %v396_v35, %v398_v36  ;;  %v1544_v42 = vmov 26   ;;  %v1545_v44 = vmov 27  }
   0xb   :  { %68 = vrot.lane.b32.xlu0 %v1628_v3, %s1516_s22  ;;  %3104 = vst [vmem:[#allocation5_spill] sm:$0xff] %v1741_v41  ;;  %v1546_v46 = vmov 28   ;;  %v1547_v48 = vmov 29   ;;  %v1548_v50 = vmov 30   ;;  %v1549_v53 = vmov 31  }
   0xc   :  { %1428 = vset.pattern.permute.xlu0 %v3058_v7  ;;  %v1749_v43 = vsel %vm40_vm1, %v395_v39, %v397_v40  ;;  %v540_v55 = vrot.slane %v1637_v5, 3  ;;  %v542_v56 = vrot.slane %v1637_v5, 7  ;;  %v1550_v57 = vmov 32  }
   0xd   :  { %3105 = vst [vmem:[#allocation6_spill] sm:$0xff] %v1749_v43  ;;  %vm41_vm2 = vcmp.lt.s32.totalorder %v1679_v18, 1  ;;  %v539_v59 = vrot.slane %v1628_v3, 3  ;;  %v541_v60 = vrot.slane %v1628_v3, 7  ;;  %v1551_v62 = vmov 35  }
   0xe   :  { %70 = vrot.lane.b32.xlu1 %v1637_v5, %s1516_s22  ;;  %v1801_v61 = vsel %vm41_vm2, %v540_v55, %v542_v56  ;;  %v1555_v4 = vmov 38  }
   0xf   :  { %136 = vperm.xlu0 %1428, %v1620_v1   ;;  %3106 = vst [vmem:[#allocation7_spill] sm:$0xff] %v1801_v61  ;;  %v1811_v6 = vsel %vm41_vm2, %v539_v59, %v541_v60 }
  0x10   :  { %3107 = vst [vmem:[#allocation8_spill] sm:$0xff] %v1811_v6 }
  0x12   :  { %93 = vrot.lane.b32.xlu1 %v1628_v3, %s1518_s23 }
  0x13   :  { %1429 = vset.pattern.permute.xlu0 %v1519_v8 }
  0x14   :  { %144 = vperm.xlu0 %1429, %v1620_v1  }
  0x16   :  { %95 = vrot.lane.b32.xlu1 %v1637_v5, %s1518_s23 }
  0x18   :  { %1430 = vset.pattern.permute.xlu0 %v1520_v9 }
  0x19   :  { %169 = vperm.xlu0 %1430, %v1620_v1  }
  0x1a   :  { %118 = vrot.lane.b32.xlu1 %v1628_v3, %s1521_s24 }
  0x1d   :  { %153 = vrot.lane.b32.xlu0 %v1637_v5, %s1522_s25 }
  0x1e   :  { %120 = vrot.lane.b32.xlu1 %v1637_v5, %s1521_s24  ;;  %1433 = vset.pattern.permute.xlu0 %v1523_v10  ;;  %v1552_v10 = vmov 25  }
  0x21   :  { %176 = vrot.lane.b32.xlu0 %v1628_v3, %s1524_s26 }
  0x22   :  { %194 = vperm.xlu1 %1431, %v1620_v1  }
  0x25   :  { %244 = vperm.xlu0 %1433, %v1620_v1  }
  0x26   :  { %151 = vrot.lane.b32.xlu1 %v1628_v3, %s1522_s25 }
  0x27   :  { %1432 = vset.pattern.permute.xlu1 %v1525_v11 }
  0x29   :  { %1434 = vset.pattern.permute.xlu0 %v1526_v12 }
  0x2a   :  { %219 = vperm.xlu1 %1432, %v1620_v1   ;;  %268 = vperm.xlu0 %1434, %v1620_v1  }
  0x2e   :  { %178 = vrot.lane.b32.xlu1 %v1637_v5, %s1524_s26  ;;  %1435 = vset.pattern.permute.xlu0 %v1527_v13  ;;  %v1553_v13 = vmov 33  }
  0x2f   :  { %284 = vperm.xlu0 %1435, %v1620_v1   ;;  %1440 = vset.pattern.permute.xlu1 %v1528_v14 }
  0x32   :  { %201 = vrot.lane.b32.xlu1 %v1628_v3, %s1529_s27 }
  0x33   :  { %1436 = vset.pattern.permute.xlu0 %v1530_v16 }
  0x34   :  { %300 = vperm.xlu0 %1436, %v1620_v1  }
  0x36   :  { %203 = vrot.lane.b32.xlu1 %v1637_v5, %s1529_s27 }
  0x38   :  { %1437 = vset.pattern.permute.xlu0 %v1531_v19 }
  0x39   :  { %316 = vperm.xlu0 %1437, %v1620_v1  }
  0x3a   :  { %226 = vrot.lane.b32.xlu1 %v1628_v3, %s1532_s28 }
  0x3d   :  { %1438 = vset.pattern.permute.xlu0 %v1533_v22 }
  0x3e   :  { %228 = vrot.lane.b32.xlu1 %v1637_v5, %s1532_s28  ;;  %324 = vperm.xlu0 %1438, %v1620_v1  }
  0x42   :  { %259 = vrot.lane.b32.xlu1 %v1692_v23, %s1513_s19  ;;  %1439 = vset.pattern.permute.xlu0 %v1534_v26 }
  0x43   :  { %340 = vperm.xlu0 %1439, %v1620_v1  }
  0x46   :  { %261 = vrot.lane.b32.xlu1 %v1700_v27, %s1513_s19 }
  0x47   :  { %333 = vrot.lane.b32.xlu0 %v1700_v27, %s1522_s25 }
  0x48   :  { %1442 = vset.pattern.permute.xlu0 %v1535_v28 }
  0x4a   :  { %275 = vrot.lane.b32.xlu1 %v1692_v23, %s1516_s22 }
  0x4b   :  { %347 = vrot.lane.b32.xlu0 %v1692_v23, %s1524_s26 }
  0x4e   :  { %277 = vrot.lane.b32.xlu1 %v1700_v27, %s1516_s22 }
  0x4f   :  { %388 = vperm.xlu0 %1442, %v1620_v1  }
  0x52   :  { %291 = vrot.lane.b32.xlu1 %v1692_v23, %s1518_s23 }
  0x53   :  { %1443 = vset.pattern.permute.xlu0 %v1536_v29 }
  0x54   :  { %412 = vperm.xlu0 %1443, %v1620_v1  }
  0x56   :  { %293 = vrot.lane.b32.xlu1 %v1700_v27, %s1518_s23 }
  0x58   :  { %1444 = vset.pattern.permute.xlu0 %v1537_v30 }
  0x59   :  { %428 = vperm.xlu0 %1444, %v1620_v1  }
  0x5a   :  { %307 = vrot.lane.b32.xlu1 %v1692_v23, %s1521_s24 }
  0x5d   :  { %1445 = vset.pattern.permute.xlu0 %v1538_v31 }
  0x5e   :  { %309 = vrot.lane.b32.xlu1 %v1700_v27, %s1521_s24  ;;  %444 = vperm.xlu0 %1445, %v1620_v1  }
  0x62   :  { %356 = vperm.xlu1 %1440, %v1620_v1   ;;  %1446 = vset.pattern.permute.xlu0 %v1539_v32 }
  0x63   :  { %460 = vperm.xlu0 %1446, %v1620_v1  }
  0x66   :  { %331 = vrot.lane.b32.xlu1 %v1692_v23, %s1522_s25 }
  0x67   :  { %1441 = vset.pattern.permute.xlu1 %v1540_v33  ;;  %1447 = vset.pattern.permute.xlu0 %v1541_v34 }
  0x68   :  { %468 = vperm.xlu0 %1447, %v1620_v1  }
  0x6a   :  { %372 = vperm.xlu1 %1441, %v1620_v1  }
  0x6c   :  { %1448 = vset.pattern.permute.xlu0 %v1542_v37 }
  0x6d   :  { %484 = vperm.xlu0 %1448, %v1620_v1  }
  0x6e   :  { %349 = vrot.lane.b32.xlu1 %v1700_v27, %s1524_s26 }
  0x6f   :  { %1449 = vset.pattern.permute.xlu1 %v1543_v38 }
  0x71   :  { %477 = vrot.lane.b32.xlu0 %v1741_v41, %s1522_s25 }
  0x72   :  { %363 = vrot.lane.b32.xlu1 %v1692_v23, %s1529_s27  ;;  %1451 = vset.pattern.permute.xlu0 %v1544_v42 }
  0x75   :  { %491 = vrot.lane.b32.xlu0 %v1749_v43, %s1524_s26 }
  0x76   :  { %365 = vrot.lane.b32.xlu1 %v1700_v27, %s1529_s27 }
  0x79   :  { %532 = vperm.xlu0 %1451, %v1620_v1  }
  0x7a   :  { %379 = vrot.lane.b32.xlu1 %v1692_v23, %s1532_s28 }
  0x7d   :  { %1452 = vset.pattern.permute.xlu0 %v1545_v44 }
  0x7e   :  { %381 = vrot.lane.b32.xlu1 %v1700_v27, %s1532_s28  ;;  %556 = vperm.xlu0 %1452, %v1620_v1  }
  0x81   :  { %v1761_v45 = vpop.permute.xlu1 %111  ;;  %v1840_v19 = vpop.permute.xlu0 %63 }
  0x82   :  { %403 = vrot.lane.b32.xlu1 %v1749_v43, %s1513_s19  ;;  %1453 = vset.pattern.permute.xlu0 %v1546_v46  ;;  %v1554_v46 = vmov 34  }
  0x83   :  { %572 = vperm.xlu0 %1453, %v1620_v1  }
  0x85   :  { %v1766_v47 = vpop.permute.xlu1 %42 }
  0x86   :  { %405 = vrot.lane.b32.xlu1 %v1741_v41, %s1513_s19  ;;  %v1850_v22 = vpop.permute.xlu0 %86 }
  0x87   :  { %1454 = vset.pattern.permute.xlu0 %v1547_v48 }
  0x88   :  { %588 = vperm.xlu0 %1454, %v1620_v1  }
  0x89   :  { %v1771_v49 = vpop.permute.xlu1 %44 }
  0x8a   :  { %419 = vrot.lane.b32.xlu1 %v1749_v43, %s1516_s22  ;;  %v1856_v25 = vpop.permute.xlu0 %68 }
  0x8c   :  { %1455 = vset.pattern.permute.xlu0 %v1548_v50 }
  0x8d   :  { %v1775_v51 = vpop.permute.xlu1 %70  ;;  %604 = vperm.xlu0 %1455, %v1620_v1  }
  0x8e   :  { %421 = vrot.lane.b32.xlu1 %v1741_v41, %s1516_s22  ;;  %v1862_v28 = vpop.permute.xlu0 %136 }
  0x91   :  { %v1780_v52 = vpop.permute.xlu1 %93  ;;  %1456 = vset.pattern.permute.xlu0 %v1549_v53 }
  0x92   :  { %435 = vrot.lane.b32.xlu1 %v1749_v43, %s1518_s23  ;;  %612 = vperm.xlu0 %1456, %v1620_v1  }
  0x93   :  { %v1872_v31 = vpop.permute.xlu0 %144 }
  0x95   :  { %v1785_v54 = vpop.permute.xlu1 %95 }
  0x96   :  { %437 = vrot.lane.b32.xlu1 %v1741_v41, %s1518_s23  ;;  %1457 = vset.pattern.permute.xlu0 %v1550_v57 }
  0x97   :  { %628 = vperm.xlu0 %1457, %v1620_v1  }
  0x98   :  { %v1878_v33 = vpop.permute.xlu0 %169 }
  0x99   :  { %v1792_v58 = vpop.permute.xlu1 %118 }
  0x9a   :  { %451 = vrot.lane.b32.xlu1 %v1749_v43, %s1521_s24 }
  0x9b   :  { %621 = vrot.lane.b32.xlu0 %v1801_v61, %s1522_s25 }
  0x9c   :  { %1460 = vset.pattern.permute.xlu0 %v1551_v62  ;;  %v1888_v36 = vpop.permute.xlu0 %153 }
  0x9d   :  { %v1805_v63 = vpop.permute.xlu1 %120 }
  0x9e   :  { %453 = vrot.lane.b32.xlu1 %v1741_v41, %s1521_s24 }
  0x9f   :  { %635 = vrot.lane.b32.xlu0 %v1811_v6, %s1524_s26 }
  0xa0   :  { %v1894_v38 = vpop.permute.xlu0 %176 }
  0xa1   :  { %v1815_v8 = vpop.permute.xlu1 %194 }
  0xa2   :  { %500 = vperm.xlu1 %1449, %v1620_v1  }
  0xa3   :  { %676 = vperm.xlu0 %1460, %v1620_v1  }
  0xa4   :  { %v1899_v40 = vpop.permute.xlu0 %244 }
  0xa5   :  { %v1819_v9 = vpop.permute.xlu1 %151 }
  0xa6   :  { %475 = vrot.lane.b32.xlu1 %v1749_v43, %s1522_s25 }
  0xa7   :  { %1450 = vset.pattern.permute.xlu1 %v1552_v10  ;;  %667 = vrot.lane.b32.xlu0 %v1811_v6, %s1532_s28 }
  0xa8   :  { %1463 = vset.pattern.permute.xlu0 %v1555_v4  ;;  %v102_v4 = vsub.s32 2, %v1673_v17 }
  0xa9   :  { %v1825_v11 = vpop.permute.xlu1 %219  ;;  %v1905_v44 = vpop.permute.xlu0 %268 }
  0xaa   :  { %516 = vperm.xlu1 %1450, %v1620_v1  }
  0xad   :  { %v1828_v12 = vpop.permute.xlu1 %178 }
  0xae   :  { %493 = vrot.lane.b32.xlu1 %v1741_v41, %s1524_s26  ;;  %v1910_v50 = vpop.permute.xlu0 %284 }
  0xaf   :  { %1458 = vset.pattern.permute.xlu1 %v1553_v13 }
  0xb1   :  { %v1832_v14 = vpop.permute.xlu1 %201 }
  0xb2   :  { %507 = vrot.lane.b32.xlu1 %v1749_v43, %s1529_s27 }
  0xb3   :  { %v1916_v55 = vpop.permute.xlu0 %300 }
  0xb5   :  { %v1836_v16 = vpop.permute.xlu1 %203 }
  0xb6   :  { %509 = vrot.lane.b32.xlu1 %v1741_v41, %s1529_s27 }
  0xb9   :  { %v1842_v20 = vpop.permute.xlu1 %226 }
  0xba   :  { %523 = vrot.lane.b32.xlu1 %v1749_v43, %s1532_s28  ;;  %v77_v43 = vsub.s32 1, %v1673_v17 }
  0xbd   :  { %v1846_v21 = vpop.permute.xlu1 %228 }
  0xbe   :  { %525 = vrot.lane.b32.xlu1 %v1741_v41, %s1532_s28 }
  0xc1   :  { %v1852_v24 = vpop.permute.xlu1 %259 }
  0xc2   :  { %547 = vrot.lane.b32.xlu1 %v1811_v6, %s1513_s19 }
  0xc5   :  { %v1858_v26 = vpop.permute.xlu1 %261 }
  0xc6   :  { %549 = vrot.lane.b32.xlu1 %v1801_v61, %s1513_s19 }
  0xc9   :  { %v1864_v29 = vpop.permute.xlu1 %275 }
  0xca   :  { %563 = vrot.lane.b32.xlu1 %v1811_v6, %s1516_s22 }
  0xcd   :  { %v1868_v30 = vpop.permute.xlu1 %277 }
  0xce   :  { %565 = vrot.lane.b32.xlu1 %v1801_v61, %s1516_s22 }
  0xd1   :  { %v1874_v32 = vpop.permute.xlu1 %291 }
  0xd2   :  { %579 = vrot.lane.b32.xlu1 %v1811_v6, %s1518_s23 }
  0xd5   :  { %v1880_v34 = vpop.permute.xlu1 %293 }
  0xd6   :  { %581 = vrot.lane.b32.xlu1 %v1801_v61, %s1518_s23 }
  0xd9   :  { %v1884_v35 = vpop.permute.xlu1 %307 }
  0xda   :  { %595 = vrot.lane.b32.xlu1 %v1811_v6, %s1521_s24 }
  0xdd   :  { %v1890_v37 = vpop.permute.xlu1 %309 }
  0xde   :  { %597 = vrot.lane.b32.xlu1 %v1801_v61, %s1521_s24 }
  0xe1   :  { %v1896_v39 = vpop.permute.xlu1 %356 }
  0xe2   :  { %3108 = vst [vmem:[#allocation9_spill] sm:$0xff] %v1896_v39  ;;  %644 = vperm.xlu1 %1458, %v1620_v1  }
  0xe5   :  { %v1901_v42 = vpop.permute.xlu1 %331 }
  0xe6   :  { %619 = vrot.lane.b32.xlu1 %v1811_v6, %s1522_s25 }
  0xe7   :  { %1459 = vset.pattern.permute.xlu1 %v1554_v46 }
  0xe9   :  { %v1907_v48 = vpop.permute.xlu1 %372 }
  0xea   :  { %3109 = vst [vmem:[#allocation10_spill] sm:$0xff] %v1907_v48  ;;  %660 = vperm.xlu1 %1459, %v1620_v1   ;;  %v1926_v1 = vpop.permute.xlu0 %316 }
  0xed   :  { %v1912_v53 = vpop.permute.xlu1 %349 }
  0xee   :  { %3110 = vst [vmem:[#allocation11_spill] sm:$0xff] %v1912_v53  ;;  %637 = vrot.lane.b32.xlu1 %v1801_v61, %s1524_s26  ;;  %v1932_v60 = vpop.permute.xlu0 %324 }
  0xef   :  { %3114 = vst [vmem:[#allocation15_spill] sm:$0xff] %v1932_v60 }
  0xf1   :  { %v1918_v56 = vpop.permute.xlu1 %363 }
  0xf2   :  { %3111 = vst [vmem:[#allocation12_spill] sm:$0xff] %v1918_v56  ;;  %651 = vrot.lane.b32.xlu1 %v1811_v6, %s1529_s27  ;;  %v1938_v13 = vpop.permute.xlu0 %340  ;;  %v3124_v6 = vlaneseq }
  0xf3   :  { %3117 = vst [vmem:[#allocation18_spill] sm:$0xff] %v1938_v13 }
  0xf4   :  { %v1955_v41 = vand.u32 127, %v3124_v6  ;;  %v1971_v6 = vld [vmem:[%s3054_s1 + $0x8] sm:$0xff] }
  0xf5   :  { %v1922_v57 = vpop.permute.xlu1 %365 }
  0xf6   :  { %3112 = vst [vmem:[#allocation13_spill] sm:$0xff] %v1922_v57  ;;  %653 = vrot.lane.b32.xlu1 %v1801_v61, %s1529_s27  ;;  %v1942_v0 = vpop.permute.xlu0 %333  ;;  %vm72_vm3 = vcmp.lt.s32.totalorder %v1955_v41, 16  ;;  %vm48_vm4 = vcmp.lt.s32.totalorder %v1955_v41, 17  ;;  %vm97_vm5 = vcmp.lt.s32.totalorder %v1955_v41, 15  ;;  %vm122_vm6 = vcmp.lt.s32.totalorder %v1955_v41, 1 }
  0xf7   :  { %v74_v39 = vsel %vm72_vm3, %v1775_v51, %v1856_v25  ;;  %v98_v56 = vsel %vm97_vm5, %v1780_v52, %v1785_v54  ;;  %v99_v57 = vsel %vm97_vm5, %v1785_v54, %v1780_v52  ;;  %v123_v27 = vsel %vm122_vm6, %v1792_v58, %v1805_v63 }
  0xf8   :  { %v124_v52 = vsel %vm122_vm6, %v1805_v63, %v1792_v58  ;;  %vm155_vm7 = vcmp.lt.s32.totalorder %v1955_v41, 127  ;;  %vm180_vm8 = vcmp.lt.s32.totalorder %v1955_v41, 113  ;;  %vm205_vm9 = vcmp.lt.s32.totalorder %v1955_v41, 112 }
  0xf9   :  { %v1928_v59 = vpop.permute.xlu1 %379  ;;  %vm230_vm10 = vcmp.lt.s32.totalorder %v1955_v41, 111 }
  0xfa   :  { %3113 = vst [vmem:[#allocation14_spill] sm:$0xff] %v1928_v59  ;;  %669 = vrot.lane.b32.xlu1 %v1801_v61, %s1532_s28  ;;  %v1946_v2 = vpop.permute.xlu0 %347  ;;  %v127_v59 = vsub.s32 3, %v1673_v17 }
  0xfb   :  { %3120 = vst [vmem:[#allocation21_spill] sm:$0xff] %v1946_v2 }
  0xfd   :  { %v1934_v62 = vpop.permute.xlu1 %381 }
  0xfe   :  { %3115 = vst [vmem:[#allocation16_spill] sm:$0xff] %v1934_v62  ;;  %v1950_v18 = vpop.permute.xlu0 %388  ;;  %v49_v62 = vsel %vm48_vm4, %v1766_v47, %v1771_v49 }
  0xff   :  { %3122 = vst [vmem:[#allocation23_spill] sm:$0xff] %v1950_v18  ;;  %v19_v18 = vld [vmem:[%s3054_s1] sm:$0xff] }
 0x101   :  { %v1936_v10 = vpop.permute.xlu1 %403 }
 0x102   :  { %3116 = vst [vmem:[#allocation17_spill] sm:$0xff] %v1936_v10  ;;  %v1958_v48 = vpop.permute.xlu0 %412 }
 0x103   :  { %3125 = vst [vmem:[#allocation25_spill] sm:$0xff] %v1958_v48  ;;  %v1974_v48 = vrot.slane %v19_v18, %v77_v43 }
 0x105   :  { %v1940_v46 = vpop.permute.xlu1 %405 }
 0x106   :  { %3118 = vst [vmem:[#allocation19_spill] sm:$0xff] %v1940_v46  ;;  %v73_v46 = vsel %vm72_vm3, %v1856_v25, %v1775_v51  ;;  %v50_v51 = vsel %vm48_vm4, %v1771_v49, %v1766_v47  ;;  %v2009_v25 = vrot.slane %v1971_v6, %v102_v4  ;;  %v2024_v49 = vrot.slane %v19_v18, %v127_v59 }
 0x108   :  { %v133_v2 = vmul.f32 %v2024_v49, %v124_v52 }
 0x109   :  { %v1944_v7 = vpop.permute.xlu1 %419 }
 0x10a   :  { %3119 = vst [vmem:[#allocation20_spill] sm:$0xff] %v1944_v7  ;;  %v53_v7 = vsub.s32 0, %v1673_v17 }
 0x10d   :  { %v1948_v15 = vpop.permute.xlu1 %421 }
 0x10e   :  { %3121 = vst [vmem:[#allocation22_spill] sm:$0xff] %v1948_v15 }
 0x111   :  { %v1952_v61 = vpop.permute.xlu1 %435 }
 0x112   :  { %3123 = vst [vmem:[#allocation24_spill] sm:$0xff] %v1952_v61  ;;  %v1977_v61 = vrot.slane %v1971_v6, %v77_v43  ;;  %v1993_v43 = vrot.slane %v19_v18, %v53_v7 }
 0x114   :  { %v84_v13 = vmul.f32 %v1977_v61, %v73_v46 }
 0x115   :  { %v1960_v10 = vpop.permute.xlu1 %437 }
 0x116   :  { %3126 = vst [vmem:[#allocation26_spill] sm:$0xff] %v1960_v10  ;;  %v1979_v10 = vpop.permute.xlu0 %428  ;;  %v90_v60 = vmul.f32 %v1850_v22, %v84_v13 }
 0x117   :  { %3127 = vst [vmem:[#allocation27_spill] sm:$0xff] %v1979_v10  ;;  %v1996_v10 = vrot.slane %v1971_v6, %v53_v7  ;;  %v83_v7 = vmul.f32 %v1974_v48, %v74_v39  ;;  %v59_v39 = vmul.f32 %v1993_v43, %v50_v51  ;;  %v160_v51 = vsub.s32 5, %v1673_v17 }
 0x119   :  { %v1981_v15 = vpop.permute.xlu1 %451  ;;  %v60_v46 = vmul.f32 %v1996_v10, %v49_v62  ;;  %v89_v62 = vmul.f32 %v1850_v22, %v83_v7  ;;  %v66_v58 = vmul.f32 %v1840_v19, %v59_v39  ;;  %v2057_v13 = vrot.slane %v19_v18, %v160_v51 }
 0x11a   :  { %3128 = vst [vmem:[#allocation28_spill] sm:$0xff] %v1981_v15  ;;  %v1998_v15 = vrot.slane %v19_v18, %v102_v4  ;;  %v2027_v4 = vrot.slane %v1971_v6, %v127_v59  ;;  %v2039_v54 = vpop.permute.xlu0 %444  ;;  %v109_v59 = vmul.f32 %v2009_v25, %v98_v56  ;;  %v185_v56 = vsub.s32 6, %v1673_v17 }
 0x11b   :  { %v67_v63 = vmul.f32 %v1840_v19, %v60_v46  ;;  %v139_v46 = vmul.f32 %v1862_v28, %v133_v2 }
 0x11c   :  { %v134_v53 = vmul.f32 %v2027_v4, %v123_v27  ;;  %v115_v22 = vmul.f32 %v1761_v45, %v109_v59  ;;  %v2060_v27 = vrot.slane %v1971_v6, %v160_v51  ;;  %v2080_v59 = vrot.slane %v1971_v6, %v185_v56 }
 0x11d   :  { %v2022_v47 = vpop.permute.xlu1 %453  ;;  %v92_v52 = vadd.f32 %v90_v60, %v67_v63  ;;  %v157_v60 = vsel %vm155_vm7, %v1888_v36, %v1819_v9  ;;  %v181_v51 = vsel %vm180_vm8, %v1894_v38, %v1828_v12  ;;  %v148_v63 = vmul.f32 %v1872_v31, %v1637_v5 }
 0x11e   :  { %3129 = vst [vmem:[#allocation29_spill] sm:$0xff] %v2022_v47  ;;  %v108_v47 = vmul.f32 %v1998_v15, %v99_v57  ;;  %v210_v57 = vsub.s32 7, %v1673_v17  ;;  %v2063_v39 = vpop.permute.xlu0 %460  ;;  %v140_v17 = vmul.f32 %v1862_v28, %v134_v53 }
 0x11f   :  { %v117_v53 = vadd.f32 %v115_v22, %v92_v52  ;;  %v2122_v22 = vld [vmem:[%s3054_s1 + $0x10] ss:$0 sm:$0xff]  ;;  %v2127_v52 = vld [vmem:[%s3054_s1 + $0x18] ss:$0 sm:$0xff] }
 0x120   :  { %v114_v7 = vmul.f32 %v1761_v45, %v108_v47  ;;  %v156_v45 = vsel %vm155_vm7, %v1819_v9, %v1888_v36  ;;  %v2077_v47 = vrot.slane %v19_v18, %v185_v56  ;;  %v2083_v2 = vrot.slane %v19_v18, %v210_v57 }
 0x121   :  { %v2046_v23 = vpop.permute.xlu1 %500  ;;  %v182_v9 = vsel %vm180_vm8, %v1828_v12, %v1894_v38  ;;  %v166_v36 = vmul.f32 %v2057_v13, %v156_v45 }
 0x122   :  { %3130 = vst [vmem:[#allocation30_spill] sm:$0xff] %v2046_v23  ;;  %v91_v23 = vadd.f32 %v89_v62, %v66_v58  ;;  %v167_v62 = vmul.f32 %v2060_v27, %v157_v60  ;;  %v2096_v58 = vrot.slane %v1971_v6, %v210_v57  ;;  %v191_v12 = vmul.f32 %v2077_v47, %v181_v51 }
 0x123   :  { %v192_v38 = vmul.f32 %v2080_v59, %v182_v9  ;;  %v206_v6 = vsel %vm205_vm9, %v1832_v14, %v1836_v16  ;;  %v207_v57 = vsel %vm205_vm9, %v1836_v16, %v1832_v14  ;;  %v172_v5 = vmul.f32 %v1878_v33, %v166_v36 }
 0x124   :  { %v116_v28 = vadd.f32 %v114_v7, %v91_v23  ;;  %v147_v23 = vmul.f32 %v1872_v31, %v1628_v3  ;;  %v142_v7 = vadd.f32 %v140_v17, %v117_v53  ;;  %v2115_v3 = vpop.permute.xlu0 %468  ;;  %v173_v31 = vmul.f32 %v1878_v33, %v167_v62 }
 0x125   :  { %v2065_v19 = vpop.permute.xlu1 %475  ;;  %v231_v14 = vsel %vm230_vm10, %v1842_v20, %v1846_v21  ;;  %v232_v16 = vsel %vm230_vm10, %v1846_v21, %v1842_v20  ;;  %v217_v17 = vmul.f32 %v2096_v58, %v207_v57  ;;  %v198_v53 = vmul.f32 %v1815_v8, %v192_v38 }
 0x126   :  { %v141_v56 = vadd.f32 %v139_v46, %v116_v28  ;;  %v216_v46 = vmul.f32 %v2083_v2, %v206_v6  ;;  %v150_v60 = vadd.f32 %v148_v63, %v142_v7  ;;  %v197_v28 = vmul.f32 %v1815_v8, %v191_v12 }
 0x127   :  { %v241_v51 = vmul.f32 %v2122_v22, %v231_v14  ;;  %v242_v9 = vmul.f32 %v2127_v52, %v232_v16  ;;  %v263_v20 = vsel %vm48_vm4, %v1852_v24, %v1858_v26  ;;  %v264_v21 = vsel %vm48_vm4, %v1858_v26, %v1852_v24 }
 0x128   :  { %v149_v45 = vadd.f32 %v147_v23, %v141_v56  ;;  %v175_v62 = vadd.f32 %v173_v31, %v150_v60  ;;  %v2153_v23 = vpop.permute.xlu0 %484  ;;  %v222_v8 = vmul.f32 %v1825_v11, %v216_v46  ;;  %v223_v56 = vmul.f32 %v1825_v11, %v217_v17 }
 0x129   :  { %v2099_v18 = vpop.permute.xlu1 %516  ;;  %v279_v7 = vsel %vm72_vm3, %v1864_v29, %v1868_v30  ;;  %v280_v24 = vsel %vm72_vm3, %v1868_v30, %v1864_v29  ;;  %v265_v26 = vmul.f32 %v264_v21, %v1993_v43  ;;  %v266_v12 = vmul.f32 %v263_v20, %v1996_v10 }
 0x12a   :  { %v174_v36 = vadd.f32 %v172_v5, %v149_v45  ;;  %v200_v6 = vadd.f32 %v198_v53, %v175_v62  ;;  %v247_v57 = vmul.f32 %v1899_v40, %v241_v51  ;;  %v248_v11 = vmul.f32 %v1899_v40, %v242_v9 }
 0x12b   :  { %v281_v5 = vmul.f32 %v280_v24, %v1974_v48  ;;  %v282_v31 = vmul.f32 %v279_v7, %v1977_v61  ;;  %v295_v14 = vsel %vm97_vm5, %v1874_v32, %v1880_v34  ;;  %v296_v29 = vsel %vm97_vm5, %v1880_v34, %v1874_v32 }
 0x12c   :  { %v199_v38 = vadd.f32 %v197_v28, %v174_v36  ;;  %v225_v46 = vadd.f32 %v223_v56, %v200_v6  ;;  %v271_v40 = vmul.f32 %v1905_v44, %v265_v26  ;;  %v272_v17 = vmul.f32 %v1905_v44, %v266_v12  ;;  %v2193_v28 = vpop.permute.xlu0 %477 }
 0x12d   :  { %v2137_v33 = vpop.permute.xlu1 %493  ;;  %v311_v45 = vsel %vm122_vm6, %v1884_v35, %v1890_v37  ;;  %v312_v60 = vsel %vm122_vm6, %v1890_v37, %v1884_v35  ;;  %v297_v32 = vmul.f32 %v296_v29, %v1998_v15  ;;  %v298_v34 = vmul.f32 %v295_v14, %v2009_v25 }
 0x12e   :  { %v224_v16 = vadd.f32 %v222_v8, %v199_v38  ;;  %v250_v51 = vadd.f32 %v248_v11, %v225_v46  ;;  %v287_v44 = vmul.f32 %v1910_v50, %v281_v5  ;;  %v288_v9 = vmul.f32 %v1910_v50, %v282_v31  ;;  %v3131_v5 = vld [vmem:[#allocation11_spill] sm:$0xff]  ;;  %v3132_v31 = vld [vmem:[#allocation21_spill] sm:$0xff] }
 0x12f   :  { %v313_v21 = vmul.f32 %v312_v60, %v2024_v49  ;;  %v314_v36 = vmul.f32 %v311_v45, %v2027_v4  ;;  %v303_v8 = vmul.f32 %v1916_v55, %v297_v32  ;;  %v304_v56 = vmul.f32 %v1916_v55, %v298_v34 }
 0x130   :  { %v249_v53 = vadd.f32 %v247_v57, %v224_v16  ;;  %v274_v35 = vadd.f32 %v272_v17, %v250_v51  ;;  %v2203_v37 = vpop.permute.xlu0 %491  ;;  %v335_v38 = vsel %vm155_vm7, %v1901_v42, %v1942_v0  ;;  %v336_v6 = vsel %vm155_vm7, %v1942_v0, %v1901_v42  ;;  %v3133_v0 = vld [vmem:[#allocation3_spill] sm:$0xff]  ;;  %v3135_v17 = vld [vmem:[#allocation4_spill] sm:$0xff]  ;;  %v3136_v51 = vld [vmem:[#allocation13_spill] sm:$0xff] }
 0x131   :  { %v2155_v63 = vpop.permute.xlu1 %507  ;;  %v319_v50 = vmul.f32 %v1926_v1, %v313_v21  ;;  %v320_v12 = vmul.f32 %v1926_v1, %v314_v36  ;;  %v351_v14 = vsel %vm180_vm8, %v3132_v31, %v3131_v5  ;;  %v352_v1 = vsel %vm180_vm8, %v3131_v5, %v3132_v31  ;;  %v3134_v42 = vld [vmem:[#allocation15_spill] sm:$0xff]  ;;  %v3141_v5 = vld [vmem:[#allocation9_spill] sm:$0xff] }
 0x132   :  { %v273_v62 = vadd.f32 %v271_v40, %v249_v53  ;;  %v290_v24 = vadd.f32 %v288_v9, %v274_v35  ;;  %v337_v29 = vmul.f32 %v335_v38, %v2057_v13  ;;  %v338_v16 = vmul.f32 %v336_v6, %v2060_v27 }
 0x133   :  { %v327_v40 = vmul.f32 %v3134_v42, %v3133_v0  ;;  %v328_v45 = vmul.f32 %v3134_v42, %v3135_v17  ;;  %v353_v34 = vmul.f32 %v351_v14, %v2077_v47  ;;  %v354_v53 = vmul.f32 %v352_v1, %v2080_v59  ;;  %v3143_v0 = vld [vmem:[#allocation17_spill] sm:$0xff] }
 0x134   :  { %v289_v7 = vadd.f32 %v287_v44, %v273_v62  ;;  %v2219_v57 = vpop.permute.xlu0 %532  ;;  %v306_v11 = vadd.f32 %v304_v56, %v290_v24  ;;  %v3137_v44 = vld [vmem:[#allocation12_spill] sm:$0xff]  ;;  %v3138_v62 = vld [vmem:[#allocation18_spill] sm:$0xff] }
 0x135   :  { %v2181_v30 = vpop.permute.xlu1 %509  ;;  %v367_v9 = vsel %vm205_vm9, %v3137_v44, %v3136_v51  ;;  %v368_v21 = vsel %vm205_vm9, %v3136_v51, %v3137_v44  ;;  %v343_v35 = vmul.f32 %v3138_v62, %v337_v29  ;;  %v3139_v56 = vld [vmem:[#allocation16_spill] sm:$0xff]  ;;  %v359_v31 = vmul.f32 %v3141_v5, %v353_v34  ;;  %v3144_v34 = vld [vmem:[#allocation10_spill] sm:$0xff] }
 0x136   :  { %v305_v55 = vadd.f32 %v303_v8, %v289_v7  ;;  %v322_v32 = vadd.f32 %v320_v12, %v306_v11  ;;  %v344_v8 = vmul.f32 %v3138_v62, %v338_v16  ;;  %v3140_v7 = vld [vmem:[#allocation14_spill] sm:$0xff]  ;;  %v369_v38 = vmul.f32 %v367_v9, %v2083_v2  ;;  %v3142_v16 = vld [vmem:[#allocation19_spill] sm:$0xff]  ;;  %v3146_v9 = vld [vmem:[#allocation20_spill] sm:$0xff] }
 0x137   :  { %v383_v24 = vsel %vm230_vm10, %v3140_v7, %v3139_v56  ;;  %v370_v6 = vmul.f32 %v368_v21, %v2096_v58  ;;  %v360_v14 = vmul.f32 %v3141_v5, %v354_v53  ;;  %v407_v42 = vsel %vm48_vm4, %v3143_v0, %v3142_v16  ;;  %v3145_v44 = vld [vmem:[#allocation22_spill] sm:$0xff]  ;;  %v3149_v5 = vld [vmem:[#allocation24_spill] sm:$0xff] }
 0x138   :  { %v321_v60 = vadd.f32 %v319_v50, %v305_v55  ;;  %v2247_v36 = vpop.permute.xlu0 %556  ;;  %v384_v50 = vsel %vm230_vm10, %v3139_v56, %v3140_v7  ;;  %v330_v55 = vadd.f32 %v328_v45, %v322_v32  ;;  %v385_v1 = vmul.f32 %v2122_v22, %v383_v24  ;;  %v3147_v24 = vld [vmem:[#allocation23_spill] sm:$0xff] }
 0x139   :  { %v2199_v20 = vpop.permute.xlu1 %523  ;;  %v386_v29 = vmul.f32 %v2127_v52, %v384_v50  ;;  %v408_v17 = vsel %vm48_vm4, %v3142_v16, %v3143_v0  ;;  %v375_v53 = vmul.f32 %v3144_v34, %v369_v38  ;;  %v376_v51 = vmul.f32 %v3144_v34, %v370_v6 }
 0x13a   :  { %v329_v11 = vadd.f32 %v327_v40, %v321_v60  ;;  %v346_v40 = vadd.f32 %v344_v8, %v330_v55  ;;  %v423_v21 = vsel %vm72_vm3, %v3146_v9, %v3145_v44  ;;  %v424_v62 = vsel %vm72_vm3, %v3145_v44, %v3146_v9 }
 0x13b   :  { %v410_v8 = vmul.f32 %v407_v42, %v1996_v10  ;;  %v391_v50 = vmul.f32 %v3147_v24, %v385_v1  ;;  %v392_v38 = vmul.f32 %v3147_v24, %v386_v29  ;;  %v425_v6 = vmul.f32 %v424_v62, %v1974_v48  ;;  %v3150_v42 = vld [vmem:[#allocation25_spill] sm:$0xff] }
 0x13c   :  { %v345_v45 = vadd.f32 %v343_v35, %v329_v11  ;;  %v2277_v32 = vpop.permute.xlu0 %572  ;;  %v409_v35 = vmul.f32 %v408_v17, %v1993_v43  ;;  %v362_v7 = vadd.f32 %v360_v14, %v346_v40  ;;  %v426_v55 = vmul.f32 %v423_v21, %v1977_v61  ;;  %v3148_v11 = vld [vmem:[#allocation26_spill] sm:$0xff]  ;;  %v3152_v40 = vld [vmem:[#allocation28_spill] sm:$0xff] }
 0x13d   :  { %v2207_v26 = vpop.permute.xlu1 %525  ;;  %v439_v16 = vsel %vm97_vm5, %v3149_v5, %v3148_v11  ;;  %v440_v0 = vsel %vm97_vm5, %v3148_v11, %v3149_v5  ;;  %v416_v17 = vmul.f32 %v3150_v42, %v410_v8 }
 0x13e   :  { %v361_v56 = vadd.f32 %v359_v31, %v345_v45  ;;  %v378_v1 = vadd.f32 %v376_v51, %v362_v7  ;;  %v415_v29 = vmul.f32 %v3150_v42, %v409_v35  ;;  %v3151_v45 = vld [vmem:[#allocation29_spill] sm:$0xff]  ;;  %v441_v21 = vmul.f32 %v440_v0, %v1998_v15  ;;  %v3153_v35 = vld [vmem:[#allocation27_spill] sm:$0xff] }
 0x13f   :  { %v455_v34 = vsel %vm122_vm6, %v3152_v40, %v3151_v45  ;;  %v456_v44 = vsel %vm122_vm6, %v3151_v45, %v3152_v40  ;;  %v431_v8 = vmul.f32 %v3153_v35, %v425_v6 }
 0x140   :  { %v377_v14 = vadd.f32 %v375_v53, %v361_v56  ;;  %v2315_v9 = vpop.permute.xlu0 %588  ;;  %v442_v53 = vmul.f32 %v439_v16, %v2009_v25  ;;  %v394_v62 = vadd.f32 %v392_v38, %v378_v1  ;;  %v432_v56 = vmul.f32 %v3153_v35, %v426_v55 }
 0x141   :  { %v2231_v46 = vpop.permute.xlu1 %547  ;;  %v457_v24 = vmul.f32 %v456_v44, %v2024_v49  ;;  %v458_v11 = vmul.f32 %v455_v34, %v2027_v4  ;;  %v447_v45 = vmul.f32 %v2039_v54, %v441_v21  ;;  %v480_v1 = vsel %vm155_vm7, %v2193_v28, %v2065_v19 }
 0x142   :  { %v393_v51 = vadd.f32 %v391_v50, %v377_v14  ;;  %v418_v42 = vadd.f32 %v416_v17, %v394_v62  ;;  %v448_v0 = vmul.f32 %v2039_v54, %v442_v53  ;;  %v479_v14 = vsel %vm155_vm7, %v2065_v19, %v2193_v28  ;;  %v3154_v53 = vld [vmem:[#allocation6_spill] sm:$0xff]  ;;  %v3155_v28 = vld [vmem:[#allocation5_spill] sm:$0xff] }
 0x143   :  { %v463_v6 = vmul.f32 %v2063_v39, %v457_v24  ;;  %v464_v55 = vmul.f32 %v2063_v39, %v458_v11  ;;  %v495_v17 = vsel %vm180_vm8, %v2203_v37, %v2137_v33  ;;  %v496_v39 = vsel %vm180_vm8, %v2137_v33, %v2203_v37 }
 0x144   :  { %v417_v5 = vadd.f32 %v415_v29, %v393_v51  ;;  %v434_v16 = vadd.f32 %v432_v56, %v418_v42  ;;  %v2327_v50 = vpop.permute.xlu0 %604  ;;  %v481_v34 = vmul.f32 %v479_v14, %v2057_v13  ;;  %v482_v44 = vmul.f32 %v480_v1, %v2060_v27 }
 0x145   :  { %v2259_v12 = vpop.permute.xlu1 %549  ;;  %v471_v19 = vmul.f32 %v2115_v3, %v3154_v53  ;;  %v472_v51 = vmul.f32 %v2115_v3, %v3155_v28  ;;  %v498_v56 = vmul.f32 %v496_v39, %v2080_v59  ;;  %v511_v33 = vsel %vm205_vm9, %v2155_v63, %v2181_v30 }
 0x146   :  { %v433_v40 = vadd.f32 %v431_v8, %v417_v5  ;;  %v450_v29 = vadd.f32 %v448_v0, %v434_v16  ;;  %v497_v8 = vmul.f32 %v495_v17, %v2077_v47  ;;  %v512_v37 = vsel %vm205_vm9, %v2181_v30, %v2155_v63  ;;  %v3156_v16 = vld [vmem:[#allocation30_spill] sm:$0xff] }
 0x147   :  { %v487_v3 = vmul.f32 %v2153_v23, %v481_v34  ;;  %v488_v11 = vmul.f32 %v2153_v23, %v482_v44  ;;  %v527_v5 = vsel %vm230_vm10, %v2199_v20, %v2207_v26  ;;  %v528_v42 = vsel %vm230_vm10, %v2207_v26, %v2199_v20 }
 0x148   :  { %v449_v54 = vadd.f32 %v447_v45, %v433_v40  ;;  %v466_v35 = vadd.f32 %v464_v55, %v450_v29  ;;  %v2363_v24 = vpop.permute.xlu0 %612  ;;  %v513_v0 = vmul.f32 %v511_v33, %v2083_v2  ;;  %v514_v63 = vmul.f32 %v512_v37, %v2096_v58 }
 0x149   :  { %v2275_v60 = vpop.permute.xlu1 %563  ;;  %v504_v23 = vmul.f32 %v3156_v16, %v498_v56  ;;  %v529_v55 = vmul.f32 %v2122_v22, %v527_v5  ;;  %v530_v14 = vmul.f32 %v2127_v52, %v528_v42  ;;  %v551_v20 = vsel %vm48_vm4, %v2231_v46, %v2259_v12 }
 0x14a   :  { %v465_v62 = vadd.f32 %v463_v6, %v449_v54  ;;  %v474_v30 = vadd.f32 %v472_v51, %v466_v35  ;;  %v503_v6 = vmul.f32 %v3156_v16, %v497_v8  ;;  %v552_v26 = vsel %vm48_vm4, %v2259_v12, %v2231_v46 }
 0x14b   :  { %v519_v39 = vmul.f32 %v2099_v18, %v513_v0  ;;  %v520_v34 = vmul.f32 %v2099_v18, %v514_v63  ;;  %v553_v46 = vmul.f32 %v552_v26, %v1993_v43  ;;  %v554_v12 = vmul.f32 %v551_v20, %v1996_v10 }
 0x14c   :  { %v473_v40 = vadd.f32 %v471_v19, %v465_v62  ;;  %v490_v54 = vadd.f32 %v488_v11, %v474_v30  ;;  %v629_v29 = vpop.permute.xlu0 %628  ;;  %v535_v51 = vmul.f32 %v2219_v57, %v529_v55  ;;  %v536_v18 = vmul.f32 %v2219_v57, %v530_v14 }
 0x14d   :  { %v2303_v31 = vpop.permute.xlu1 %565  ;;  %v559_v37 = vmul.f32 %v2247_v36, %v553_v46 }
 0x14e   :  { %v489_v1 = vadd.f32 %v487_v3, %v473_v40  ;;  %v567_v44 = vsel %vm72_vm3, %v2275_v60, %v2303_v31  ;;  %v568_v53 = vsel %vm72_vm3, %v2303_v31, %v2275_v60  ;;  %v506_v28 = vadd.f32 %v504_v23, %v490_v54 }
 0x14f   :  { %v569_v62 = vmul.f32 %v568_v53, %v1974_v48  ;;  %v570_v35 = vmul.f32 %v567_v44, %v1977_v61  ;;  %v560_v3 = vmul.f32 %v2247_v36, %v554_v12 }
 0x150   :  { %v505_v19 = vadd.f32 %v503_v6, %v489_v1  ;;  %v522_v33 = vadd.f32 %v520_v34, %v506_v28  ;;  %v622_v5 = vpop.permute.xlu0 %621  ;;  %v3157_v28 = vld [vmem:[#allocation8_spill] sm:$0xff] }
 0x151   :  { %v2321_v7 = vpop.permute.xlu1 %579  ;;  %v576_v30 = vmul.f32 %v2277_v32, %v570_v35 }
 0x152   :  { %v521_v56 = vadd.f32 %v519_v39, %v505_v19 }
 0x154   :  { %v537_v63 = vadd.f32 %v535_v51, %v521_v56  ;;  %v636_v20 = vpop.permute.xlu0 %635  ;;  %v615_v51 = vmul.f32 %v2363_v24, %v3157_v28  ;;  %v1556_v28 = vmov 36  }
 0x155   :  { %v582_v38 = vpop.permute.xlu1 %581  ;;  %1461 = vset.pattern.permute.xlu1 %v1556_v28  ;;  %v1579_v28 = vmov 58  }
 0x156   :  { %v583_v8 = vsel %vm97_vm5, %v2321_v7, %v582_v38  ;;  %v584_v60 = vsel %vm97_vm5, %v582_v38, %v2321_v7  ;;  %v538_v7 = vadd.f32 %v536_v18, %v522_v33  ;;  %v575_v38 = vmul.f32 %v2277_v32, %v569_v62  ;;  %v3158_v18 = vld [vmem:[#allocation7_spill] sm:$0xff] }
 0x157   :  { %v585_v42 = vmul.f32 %v584_v60, %v1998_v15  ;;  %v586_v0 = vmul.f32 %v583_v8, %v2009_v25  ;;  %v561_v6 = vadd.f32 %v559_v37, %v537_v63  ;;  %v616_v62 = vmul.f32 %v2363_v24, %v3158_v18 }
 0x158   :  { %v562_v23 = vadd.f32 %v560_v3, %v538_v7  ;;  %v1557_v18 = vmov 37  }
 0x159   :  { %v596_v21 = vpop.permute.xlu1 %595  ;;  %v577_v55 = vadd.f32 %v575_v38, %v561_v6 }
 0x15a   :  { %v578_v14 = vadd.f32 %v576_v30, %v562_v23 }
 0x15d   :  { %v598_v45 = vpop.permute.xlu1 %597 }
 0x15e   :  { %v599_v57 = vsel %vm122_vm6, %v596_v21, %v598_v45  ;;  %v600_v11 = vsel %vm122_vm6, %v598_v45, %v596_v21  ;;  %v591_v21 = vmul.f32 %v2315_v9, %v585_v42  ;;  %v592_v45 = vmul.f32 %v2315_v9, %v586_v0 }
 0x15f   :  { %v601_v36 = vmul.f32 %v600_v11, %v2024_v49  ;;  %v602_v16 = vmul.f32 %v599_v57, %v2027_v4 }
 0x160   :  { %v593_v34 = vadd.f32 %v591_v21, %v577_v55  ;;  %v594_v44 = vadd.f32 %v592_v45, %v578_v14 }
 0x161   :  { %v2389_v17 = vpop.permute.xlu1 %644  ;;  %v607_v1 = vmul.f32 %v2327_v50, %v601_v36  ;;  %v608_v54 = vmul.f32 %v2327_v50, %v602_v16  ;;  %v677_v50 = vpop.permute.xlu0 %676 }
 0x163   :  { %v609_v35 = vadd.f32 %v607_v1, %v593_v34  ;;  %v610_v8 = vadd.f32 %v608_v54, %v594_v44 }
 0x165   :  { %v620_v31 = vpop.permute.xlu1 %619  ;;  %v618_v3 = vadd.f32 %v616_v62, %v610_v8  ;;  %v617_v57 = vadd.f32 %v615_v51, %v609_v35  ;;  %v668_v7 = vpop.permute.xlu0 %667  ;;  %v2474_v51 = vld [vmem:[%s3052_s2] sm:$0xff]  ;;  %v1558_v62 = vmov 39   ;;  %v1559_v35 = vmov 42  }
 0x166   :  { %v623_v32 = vsel %vm155_vm7, %v620_v31, %v622_v5  ;;  %v624_v39 = vsel %vm155_vm7, %v622_v5, %v620_v31  ;;  %v1560_v8 = vmov 40  }
 0x167   :  { %v625_v46 = vmul.f32 %v623_v32, %v2057_v13  ;;  %v626_v12 = vmul.f32 %v624_v39, %v2060_v27 }
 0x169   :  { %v661_v40 = vpop.permute.xlu1 %660  ;;  %v631_v56 = vmul.f32 %v629_v29, %v625_v46  ;;  %v632_v33 = vmul.f32 %v629_v29, %v626_v12 }
 0x16b   :  { %v633_v38 = vadd.f32 %v631_v56, %v617_v57  ;;  %v634_v29 = vadd.f32 %v632_v33, %v618_v3  ;;  %v3159_v56 = vmov 0   ;;  %v1563_v33 = vmov 44  }
 0x16c   :  { %v1565_v3 = vmov 46   ;;  %v1566_v57 = vmov 47  }
 0x16d   :  { %v638_v26 = vpop.permute.xlu1 %637 }
 0x16e   :  { %v639_v53 = vsel %vm180_vm8, %v636_v20, %v638_v26  ;;  %v640_v9 = vsel %vm180_vm8, %v638_v26, %v636_v20 }
 0x16f   :  { %v641_v60 = vmul.f32 %v639_v53, %v2077_v47  ;;  %v642_v31 = vmul.f32 %v640_v9, %v2080_v59 }
 0x171   :  { %v652_v19 = vpop.permute.xlu1 %651  ;;  %v647_v42 = vmul.f32 %v2389_v17, %v641_v60  ;;  %v648_v24 = vmul.f32 %v2389_v17, %v642_v31  ;;  %v1561_v60 = vmov 43   ;;  %v1562_v31 = vmov 41  }
 0x173   :  { %v649_v21 = vadd.f32 %v647_v42, %v633_v38  ;;  %v650_v45 = vadd.f32 %v648_v24, %v634_v29  ;;  %v24_v29 = vld [vmem:[%s3055_s3] sm:$0xff] }
 0x175   :  { %v654_v37 = vpop.permute.xlu1 %653 }
 0x176   :  { %v655_v11 = vsel %vm205_vm9, %v652_v19, %v654_v37  ;;  %v656_v5 = vsel %vm205_vm9, %v654_v37, %v652_v19  ;;  %v1564_v37 = vmov 45  }
 0x177   :  { %v657_v0 = vmul.f32 %v655_v11, %v2083_v2  ;;  %v658_v63 = vmul.f32 %v656_v5, %v2096_v58 }
 0x179   :  { %v663_v30 = vmul.f32 %v661_v40, %v657_v0  ;;  %v664_v36 = vmul.f32 %v661_v40, %v658_v63  ;;  %v670_v16 = vpop.permute.xlu1 %669 }
 0x17a   :  { %v671_v6 = vsel %vm230_vm10, %v668_v7, %v670_v16  ;;  %v672_v23 = vsel %vm230_vm10, %v670_v16, %v668_v7 }
 0x17b   :  { %v673_v17 = vmul.f32 %v2122_v22, %v671_v6  ;;  %v674_v55 = vmul.f32 %v2127_v52, %v672_v23  ;;  %v665_v14 = vadd.f32 %v663_v30, %v649_v21  ;;  %v666_v20 = vadd.f32 %v664_v36, %v650_v45 }
 0x17c   :  { %v1567_v6 = vmov 48   ;;  %v1568_v23 = vmov 51   ;;  %v1569_v21 = vmov 49   ;;  %v1570_v45 = vmov 52  }
 0x17d   :  { %v679_v26 = vmul.f32 %v677_v50, %v673_v17  ;;  %v680_v1 = vmul.f32 %v677_v50, %v674_v55  ;;  %v1571_v17 = vmov 50   ;;  %v1572_v55 = vmov 60  }
 0x17f   :  { %v2459_v54 = vadd.f32 %v679_v26, %v665_v14  ;;  %v2461_v40 = vadd.f32 %v680_v1, %v666_v20  ;;  %v1573_v14 = vmov 53   ;;  %v1574_v20 = vmov 61  }
 0x180   :  { %v1575_v26 = vmov 54   ;;  %v1576_v1 = vmov 55  }
 0x181   :  { %v685_v32 = vrot.slane %v2459_v54, 4  ;;  %v686_v39 = vrot.slane %v2461_v40, 4  ;;  %v683_v34 = vmul.f32 %v2459_v54, %v2459_v54  ;;  %v684_v22 = vmul.f32 %v2461_v40, %v2461_v40 }
 0x183   :  { %v687_v52 = vadd.f32 %v685_v32, %v2459_v54  ;;  %v688_v44 = vadd.f32 %v686_v39, %v2461_v40  ;;  %v689_v53 = vrot.slane %v683_v34, 4  ;;  %v690_v9 = vrot.slane %v684_v22, 4 }
 0x184   :  { %v3160_v32 = vmov 1  }
 0x185   :  { %v693_v46 = vadd.f32 %v688_v44, %v687_v52  ;;  %v691_v12 = vadd.f32 %v689_v53, %v683_v34  ;;  %v692_v19 = vadd.f32 %v690_v9, %v684_v22 }
 0x187   :  { %694 = vadd.xlane.f32.xlu0 %v693_v46  ;;  %v697_v50 = vadd.f32 %v692_v19, %v691_v12  ;;  %v1577_v19 = vmov 56  }
 0x189   :  { %698 = vadd.xlane.f32.xlu1 %v697_v50  ;;  %v1578_v50 = vmov 57  }
 0x19a   :  { %738 = vperm.xlu1 %1461, %v2474_v51  }
 0x19d   :  { %768 = vperm.xlu0 %1463, %v2474_v51  }
 0x19e   :  { %1462 = vset.pattern.permute.xlu1 %v1557_v18  ;;  %v1580_v18 = vmov 59  }
 0x19f   :  { %752 = vperm.xlu1 %1462, %v2474_v51  }
 0x1a1   :  { %1464 = vset.pattern.permute.xlu0 %v1558_v62  ;;  %v1581_v62 = vmov 62  }
 0x1a2   :  { %784 = vperm.xlu0 %1464, %v2474_v51  }
 0x1a3   :  { %1467 = vset.pattern.permute.xlu1 %v1559_v35  ;;  %v1582_v35 = vmov 63  }
 0x1a4   :  { %824 = vperm.xlu1 %1467, %v2474_v51  }
 0x1a6   :  { %1465 = vset.pattern.permute.xlu0 %v1560_v8  ;;  %v1583_v8 = vmov 64  }
 0x1a7   :  { %792 = vperm.xlu0 %1465, %v2474_v51  }
 0x1a8   :  { %1468 = vset.pattern.permute.xlu1 %v1561_v60  ;;  %v1584_v60 = vmov 65  }
 0x1a9   :  { %840 = vperm.xlu1 %1468, %v2474_v51  }
 0x1ab   :  { %1466 = vset.pattern.permute.xlu0 %v1562_v31  ;;  %v1585_v31 = vmov 66  }
 0x1ac   :  { %808 = vperm.xlu0 %1466, %v2474_v51  }
 0x1ad   :  { %1472 = vset.pattern.permute.xlu1 %v3159_v56 }
 0x1b0   :  { %1469 = vset.pattern.permute.xlu0 %v1563_v33 }
 0x1b1   :  { %856 = vperm.xlu0 %1469, %v2474_v51  }
 0x1b5   :  { %1470 = vset.pattern.permute.xlu0 %v1564_v37 }
 0x1b6   :  { %878 = vperm.xlu0 %1470, %v2474_v51  }
 0x1ba   :  { %1471 = vset.pattern.permute.xlu0 %v1565_v3 }
 0x1bb   :  { %894 = vperm.xlu0 %1471, %v2474_v51  }
 0x1bf   :  { %1473 = vset.pattern.permute.xlu0 %v1566_v57 }
 0x214   :  { %v695_v11 = vpop.xlane.xlu0 %694 }
 0x215   :  { %v696_v5 = vmul.f32 0.001953125, %v695_v11 }
 0x216   :  { %v699_v42 = vpop.xlane.xlu1 %698 }
 0x217   :  { %v701_v24 = vmul.f32 %v696_v5, %v696_v5  ;;  %v700_v0 = vmul.f32 0.001953125, %v699_v42 }
 0x219   :  { %v702_v63 = vsub.f32 %v700_v0, %v701_v24 }
 0x21a   :  { %v2532_v3 = vpop.permute.xlu1 %738 }
 0x21b   :  { %v703_v7 = vmax.f32 %v702_v63, 0.0 }
 0x21c   :  { %v2504_v39 = vpop.permute.xlu0 %768 }
 0x21d   :  { %v704_v38 = vadd.f32 1e-05, %v703_v7 }
 0x21e   :  { %v2536_v11 = vpop.permute.xlu1 %752 }
 0x21f   :  { %1501 = vrsqrt.f32 %v704_v38 }
 0x221   :  { %v2506_v34 = vpop.permute.xlu0 %784 }
 0x223   :  { %v2540_v42 = vpop.permute.xlu1 %824 }
 0x226   :  { %v2508_v22 = vpop.permute.xlu0 %792 }
 0x228   :  { %v2544_v0 = vpop.permute.xlu1 %840 }
 0x229   :  { %v1502_v30 = vpop.eup %1501 }
 0x22a   :  { %v706_v36 = vmul.f32 %v1502_v30, %v24_v29 }
 0x22b   :  { %v2510_v52 = vpop.permute.xlu0 %808 }
 0x22c   :  { %709 = vperm.xlu1 %1472, %v706_v36   ;;  %v714_v16 = vmul.f32 %v706_v36, %v696_v5 }
 0x22e   :  { %716 = vrot.lane.b32.xlu0 %v714_v16, %s1521_s24 }
 0x230   :  { %1477 = vset.pattern.permute.xlu1 %v1568_v23  ;;  %v2512_v44 = vpop.permute.xlu0 %856 }
 0x231   :  { %966 = vperm.xlu1 %1477, %v2474_v51  }
 0x232   :  { %910 = vperm.xlu0 %1473, %v2474_v51  }
 0x235   :  { %1478 = vset.pattern.permute.xlu1 %v1570_v45  ;;  %v2514_v53 = vpop.permute.xlu0 %878 }
 0x236   :  { %1474 = vset.pattern.permute.xlu0 %v1567_v6  ;;  %982 = vperm.xlu1 %1478, %v2474_v51  }
 0x237   :  { %926 = vperm.xlu0 %1474, %v2474_v51  }
 0x23a   :  { %1487 = vset.pattern.permute.xlu1 %v1572_v55  ;;  %v2516_v9 = vpop.permute.xlu0 %894 }
 0x23b   :  { %1475 = vset.pattern.permute.xlu0 %v1569_v21  ;;  %1108 = vperm.xlu1 %1487, %v2474_v51  }
 0x23c   :  { %934 = vperm.xlu0 %1475, %v2474_v51  }
 0x23f   :  { %1488 = vset.pattern.permute.xlu1 %v1574_v20 }
 0x240   :  { %1476 = vset.pattern.permute.xlu0 %v1571_v17  ;;  %1124 = vperm.xlu1 %1488, %v2474_v51  }
 0x241   :  { %950 = vperm.xlu0 %1476, %v2474_v51  }
 0x245   :  { %1479 = vset.pattern.permute.xlu0 %v1573_v14  ;;  %v1586_v14 = vmov 67  }
 0x246   :  { %998 = vperm.xlu0 %1479, %v2474_v51  }
 0x24a   :  { %1480 = vset.pattern.permute.xlu0 %v1575_v26  ;;  %v1587_v26 = vmov 69  }
 0x24b   :  { %1020 = vperm.xlu0 %1480, %v2474_v51   ;;  %1496 = vset.pattern.permute.xlu1 %v1587_v26 }
 0x24f   :  { %1481 = vset.pattern.permute.xlu0 %v1576_v1 }
 0x250   :  { %1036 = vperm.xlu0 %1481, %v2474_v51  }
 0x254   :  { %1482 = vset.pattern.permute.xlu0 %v3160_v32 }
 0x2a0   :  { %v717_v46 = vpop.permute.xlu0 %716 }
 0x2a1   :  { %v719_v12 = vsub.f32 %v24_v29, %v717_v46 }
 0x2a3   :  { %722 = vperm.xlu0 %1482, %v719_v12  }
 0x2a7   :  { %1483 = vset.pattern.permute.xlu0 %v1577_v19 }
 0x2a8   :  { %1052 = vperm.xlu0 %1483, %v2474_v51  }
 0x2ab   :  { %v710_v7 = vpop.permute.xlu1 %709 }
 0x2ac   :  { %1484 = vset.pattern.permute.xlu0 %v1578_v50  ;;  %v712_v38 = vmul.f32 %v710_v7, %v2459_v54  ;;  %v713_v30 = vmul.f32 %v710_v7, %v2461_v40  ;;  %v1588_v50 = vmov 68   ;;  %v3162_v7 = vmov 3  }
 0x2ad   :  { %1068 = vperm.xlu0 %1484, %v2474_v51  }
 0x2b1   :  { %1485 = vset.pattern.permute.xlu0 %v1579_v28  ;;  %v2526_v56 = vpop.permute.xlu0 %910 }
 0x2b2   :  { %1076 = vperm.xlu0 %1485, %v2474_v51  }
 0x2b6   :  { %1486 = vset.pattern.permute.xlu0 %v1580_v18  ;;  %v2528_v33 = vpop.permute.xlu0 %926  ;;  %v1589_v18 = vmov 71  }
 0x2b7   :  { %1092 = vperm.xlu0 %1486, %v2474_v51  }
 0x2bb   :  { %1489 = vset.pattern.permute.xlu0 %v1581_v62  ;;  %v2530_v37 = vpop.permute.xlu0 %934 }
 0x2bc   :  { %1140 = vperm.xlu0 %1489, %v2474_v51  }
 0x2c0   :  { %1490 = vset.pattern.permute.xlu0 %v1582_v35  ;;  %v2534_v57 = vpop.permute.xlu0 %950 }
 0x2c1   :  { %1162 = vperm.xlu0 %1490, %v2474_v51  }
 0x2c5   :  { %1491 = vset.pattern.permute.xlu0 %v1583_v8  ;;  %v2538_v5 = vpop.permute.xlu0 %998 }
 0x2c6   :  { %1178 = vperm.xlu0 %1491, %v2474_v51  }
 0x2ca   :  { %1492 = vset.pattern.permute.xlu0 %v1584_v60  ;;  %v2542_v24 = vpop.permute.xlu0 %1020 }
 0x2cb   :  { %1194 = vperm.xlu0 %1492, %v2474_v51  }
 0x2cf   :  { %1493 = vset.pattern.permute.xlu0 %v1585_v31  ;;  %v2546_v63 = vpop.permute.xlu0 %1036 }
 0x322   :  { %v723_v29 = vpop.permute.xlu0 %722 }
 0x323   :  { %v725_v36 = vadd.f32 %v723_v29, %v712_v38  ;;  %v726_v16 = vadd.f32 %v723_v29, %v713_v30  ;;  %v2663_v30 = vpop.permute.xlu1 %966 }
 0x325   :  { %v2550_v6 = vmax.f32 %v725_v36, 0.0  ;;  %v2556_v23 = vmax.f32 %v726_v16, 0.0 }
 0x327   :  { %743 = vrot.lane.b32.xlu0 %v2550_v6, %s1516_s22  ;;  %729 = vrot.lane.b32.xlu1 %v2550_v6, %s1513_s19  ;;  %v864_v54 = vrot.slane %v2556_v23, 1  ;;  %v866_v40 = vrot.slane %v2556_v23, 5  ;;  %v863_v17 = vrot.slane %v2550_v6, 1  ;;  %v865_v55 = vrot.slane %v2550_v6, 5  ;;  %v2659_v29 = vpop.permute.xlu0 %1052  ;;  %v2671_v16 = vpop.permute.xlu1 %982 }
 0x328   :  { %v1006_v1 = vrot.slane %v2556_v23, 2  ;;  %v1008_v32 = vrot.slane %v2556_v23, 6  ;;  %v1005_v46 = vrot.slane %v2550_v6, 2  ;;  %v1007_v12 = vrot.slane %v2550_v6, 6 }
 0x329   :  { %v2573_v45 = vsel %vm39_vm0, %v864_v54, %v866_v40  ;;  %v2583_v20 = vsel %vm39_vm0, %v863_v17, %v865_v55  ;;  %v1148_v62 = vrot.slane %v2556_v23, 3  ;;  %v1150_v35 = vrot.slane %v2556_v23, 7 }
 0x32a   :  { %v2598_v19 = vsel %vm40_vm1, %v1006_v1, %v1008_v32  ;;  %v2606_v28 = vsel %vm40_vm1, %v1005_v46, %v1007_v12  ;;  %v1147_v60 = vrot.slane %v2550_v6, 3  ;;  %v1149_v31 = vrot.slane %v2550_v6, 7 }
 0x32b   :  { %801 = vrot.lane.b32.xlu0 %v2556_v23, %s1522_s25  ;;  %731 = vrot.lane.b32.xlu1 %v2556_v23, %s1513_s19  ;;  %v2624_v8 = vsel %vm41_vm2, %v1148_v62, %v1150_v35  ;;  %v2679_v21 = vpop.permute.xlu1 %1108 }
 0x32c   :  { %v2635_v38 = vsel %vm41_vm2, %v1147_v60, %v1149_v31  ;;  %v2665_v36 = vpop.permute.xlu0 %1068  ;;  %3166 = vst [vmem:[#allocation15_spill] sm:$0xff] %v2679_v21 }
 0x32d   :  { %3163 = vst [vmem:[#allocation11_spill] sm:$0xff] %v2665_v36 }
 0x32f   :  { %815 = vrot.lane.b32.xlu0 %v2550_v6, %s1524_s26  ;;  %745 = vrot.lane.b32.xlu1 %v2556_v23, %s1516_s22  ;;  %v2687_v55 = vpop.permute.xlu1 %1124 }
 0x330   :  { %3168 = vst [vmem:[#allocation13_spill] sm:$0xff] %v2687_v55 }
 0x331   :  { %v2673_v54 = vpop.permute.xlu0 %1076 }
 0x332   :  { %3164 = vst [vmem:[#allocation21_spill] sm:$0xff] %v2673_v54 }
 0x333   :  { %1210 = vperm.xlu0 %1493, %v2474_v51   ;;  %759 = vrot.lane.b32.xlu1 %v2550_v6, %s1518_s23 }
 0x336   :  { %v2677_v40 = vpop.permute.xlu0 %1092 }
 0x337   :  { %943 = vrot.lane.b32.xlu0 %v2573_v45, %s1522_s25  ;;  %761 = vrot.lane.b32.xlu1 %v2556_v23, %s1518_s23  ;;  %3165 = vst [vmem:[#allocation3_spill] sm:$0xff] %v2677_v40 }
 0x338   :  { %1494 = vset.pattern.permute.xlu0 %v1586_v14 }
 0x33b   :  { %775 = vrot.lane.b32.xlu1 %v2550_v6, %s1521_s24  ;;  %957 = vrot.lane.b32.xlu0 %v2583_v20, %s1524_s26  ;;  %v2683_v17 = vpop.permute.xlu0 %1140 }
 0x33c   :  { %3167 = vst [vmem:[#allocation4_spill] sm:$0xff] %v2683_v17 }
 0x33f   :  { %777 = vrot.lane.b32.xlu1 %v2556_v23, %s1521_s24  ;;  %1218 = vperm.xlu0 %1494, %v2474_v51  }
 0x340   :  { %v2691_v14 = vpop.permute.xlu0 %1162 }
 0x341   :  { %3169 = vst [vmem:[#allocation12_spill] sm:$0xff] %v2691_v14 }
 0x343   :  { %799 = vrot.lane.b32.xlu1 %v2550_v6, %s1522_s25  ;;  %1085 = vrot.lane.b32.xlu0 %v2598_v19, %s1522_s25 }
 0x344   :  { %1495 = vset.pattern.permute.xlu0 %v1588_v50 }
 0x345   :  { %v2695_v32 = vpop.permute.xlu0 %1178 }
 0x346   :  { %3170 = vst [vmem:[#allocation18_spill] sm:$0xff] %v2695_v32 }
 0x347   :  { %817 = vrot.lane.b32.xlu1 %v2556_v23, %s1524_s26  ;;  %1099 = vrot.lane.b32.xlu0 %v2606_v28, %s1524_s26 }
 0x34a   :  { %v2701_v12 = vpop.permute.xlu0 %1194 }
 0x34b   :  { %831 = vrot.lane.b32.xlu1 %v2550_v6, %s1529_s27  ;;  %1234 = vperm.xlu0 %1495, %v2474_v51   ;;  %3171 = vst [vmem:[#allocation16_spill] sm:$0xff] %v2701_v12 }
 0x34f   :  { %833 = vrot.lane.b32.xlu1 %v2556_v23, %s1529_s27  ;;  %1498 = vset.pattern.permute.xlu0 %v1589_v18 }
 0x350   :  { %1282 = vperm.xlu0 %1498, %v2474_v51  }
 0x353   :  { %847 = vrot.lane.b32.xlu1 %v2550_v6, %s1532_s28 }
 0x354   :  { %1227 = vrot.lane.b32.xlu0 %v2624_v8, %s1522_s25 }
 0x355   :  { %1500 = vset.pattern.permute.xlu0 %v3162_v7 }
 0x357   :  { %849 = vrot.lane.b32.xlu1 %v2556_v23, %s1532_s28 }
 0x358   :  { %1241 = vrot.lane.b32.xlu0 %v2635_v38, %s1524_s26 }
 0x35b   :  { %869 = vrot.lane.b32.xlu1 %v2583_v20, %s1513_s19 }
 0x35c   :  { %1273 = vrot.lane.b32.xlu0 %v2635_v38, %s1532_s28 }
 0x35f   :  { %871 = vrot.lane.b32.xlu1 %v2573_v45, %s1513_s19 }
 0x363   :  { %885 = vrot.lane.b32.xlu1 %v2583_v20, %s1516_s22 }
 0x367   :  { %887 = vrot.lane.b32.xlu1 %v2573_v45, %s1516_s22 }
 0x36b   :  { %901 = vrot.lane.b32.xlu1 %v2583_v20, %s1518_s23 }
 0x36f   :  { %903 = vrot.lane.b32.xlu1 %v2573_v45, %s1518_s23 }
 0x373   :  { %917 = vrot.lane.b32.xlu1 %v2583_v20, %s1521_s24 }
 0x377   :  { %919 = vrot.lane.b32.xlu1 %v2573_v45, %s1521_s24 }
 0x37b   :  { %941 = vrot.lane.b32.xlu1 %v2583_v20, %s1522_s25 }
 0x37f   :  { %959 = vrot.lane.b32.xlu1 %v2573_v45, %s1524_s26 }
 0x383   :  { %973 = vrot.lane.b32.xlu1 %v2583_v20, %s1529_s27 }
 0x387   :  { %975 = vrot.lane.b32.xlu1 %v2573_v45, %s1529_s27 }
 0x38b   :  { %989 = vrot.lane.b32.xlu1 %v2583_v20, %s1532_s28 }
 0x38f   :  { %991 = vrot.lane.b32.xlu1 %v2573_v45, %s1532_s28 }
 0x393   :  { %1011 = vrot.lane.b32.xlu1 %v2606_v28, %s1513_s19 }
 0x397   :  { %1013 = vrot.lane.b32.xlu1 %v2598_v19, %s1513_s19 }
 0x399   :  { %v730_v26 = vpop.permute.xlu1 %729  ;;  %v744_v62 = vpop.permute.xlu0 %743 }
 0x39b   :  { %1027 = vrot.lane.b32.xlu1 %v2606_v28, %s1516_s22 }
 0x39d   :  { %v732_v1 = vpop.permute.xlu1 %731 }
 0x39e   :  { %v733_v7 = vsel %vm48_vm4, %v730_v26, %v732_v1  ;;  %v734_v12 = vsel %vm48_vm4, %v732_v1, %v730_v26 }
 0x39f   :  { %1029 = vrot.lane.b32.xlu1 %v2598_v19, %s1516_s22 }
 0x3a1   :  { %v746_v46 = vpop.permute.xlu1 %745 }
 0x3a2   :  { %v747_v35 = vsel %vm72_vm3, %v744_v62, %v746_v46  ;;  %v748_v60 = vsel %vm72_vm3, %v746_v46, %v744_v62  ;;  %v735_v46 = vmul.f32 %v734_v12, %v1993_v43  ;;  %v736_v62 = vmul.f32 %v733_v7, %v1996_v10 }
 0x3a3   :  { %1043 = vrot.lane.b32.xlu1 %v2606_v28, %s1518_s23  ;;  %v749_v17 = vmul.f32 %v748_v60, %v1974_v48  ;;  %v750_v55 = vmul.f32 %v747_v35, %v1977_v61 }
 0x3a5   :  { %v760_v50 = vpop.permute.xlu1 %759  ;;  %v755_v35 = vmul.f32 %v2536_v11, %v749_v17  ;;  %v756_v60 = vmul.f32 %v2536_v11, %v750_v55 }
 0x3a7   :  { %1045 = vrot.lane.b32.xlu1 %v2598_v19, %s1518_s23 }
 0x3a9   :  { %v762_v18 = vpop.permute.xlu1 %761 }
 0x3aa   :  { %v763_v32 = vsel %vm97_vm5, %v760_v50, %v762_v18  ;;  %v764_v14 = vsel %vm97_vm5, %v762_v18, %v760_v50  ;;  %v802_v18 = vpop.permute.xlu0 %801 }
 0x3ab   :  { %1059 = vrot.lane.b32.xlu1 %v2606_v28, %s1521_s24  ;;  %v765_v21 = vmul.f32 %v764_v14, %v1998_v15  ;;  %v766_v26 = vmul.f32 %v763_v32, %v2009_v25  ;;  %v741_v14 = vmul.f32 %v2532_v3, %v735_v46  ;;  %v742_v32 = vmul.f32 %v2532_v3, %v736_v62 }
 0x3ad   :  { %v776_v31 = vpop.permute.xlu1 %775  ;;  %v771_v54 = vmul.f32 %v2504_v39, %v765_v21  ;;  %v757_v36 = vadd.f32 %v755_v35, %v741_v14  ;;  %v758_v17 = vadd.f32 %v756_v60, %v742_v32 }
 0x3ae   :  { %v816_v3 = vpop.permute.xlu0 %815 }
 0x3af   :  { %1061 = vrot.lane.b32.xlu1 %v2598_v19, %s1521_s24  ;;  %v773_v62 = vadd.f32 %v771_v54, %v757_v36  ;;  %v795_v36 = vmul.f32 %v2508_v22, %v2550_v6  ;;  %v796_v54 = vmul.f32 %v2508_v22, %v2556_v23  ;;  %v3172_v22 = vmov 2  }
 0x3b1   :  { %v778_v1 = vpop.permute.xlu1 %777 }
 0x3b2   :  { %v779_v40 = vsel %vm122_vm6, %v776_v31, %v778_v1  ;;  %v780_v50 = vsel %vm122_vm6, %v778_v1, %v776_v31  ;;  %v772_v31 = vmul.f32 %v2504_v39, %v766_v26 }
 0x3b3   :  { %v781_v12 = vmul.f32 %v780_v50, %v2024_v49  ;;  %v782_v7 = vmul.f32 %v779_v40, %v2027_v4  ;;  %1083 = vrot.lane.b32.xlu1 %v2606_v28, %s1522_s25 }
 0x3b4   :  { %v774_v21 = vadd.f32 %v772_v31, %v758_v17 }
 0x3b5   :  { %v800_v1 = vpop.permute.xlu1 %799  ;;  %v787_v11 = vmul.f32 %v2506_v34, %v781_v12  ;;  %v788_v55 = vmul.f32 %v2506_v34, %v782_v7  ;;  %v1590_v7 = vmov 70  }
 0x3b6   :  { %v803_v40 = vsel %vm155_vm7, %v800_v1, %v802_v18  ;;  %v804_v46 = vsel %vm155_vm7, %v802_v18, %v800_v1 }
 0x3b7   :  { %1250 = vperm.xlu1 %1496, %v2474_v51   ;;  %v789_v35 = vadd.f32 %v787_v11, %v773_v62  ;;  %v790_v34 = vadd.f32 %v788_v55, %v774_v21  ;;  %v805_v60 = vmul.f32 %v803_v40, %v2057_v13  ;;  %v806_v12 = vmul.f32 %v804_v46, %v2060_v27 }
 0x3b9   :  { %v818_v50 = vpop.permute.xlu1 %817  ;;  %v797_v31 = vadd.f32 %v795_v36, %v789_v35  ;;  %v798_v1 = vadd.f32 %v796_v54, %v790_v34  ;;  %v811_v17 = vmul.f32 %v2510_v52, %v805_v60  ;;  %v812_v11 = vmul.f32 %v2510_v52, %v806_v12  ;;  %v2787_v36 = vld [vmem:[%s3054_s1 + $0x10] ss:$0 sm:$0xff]  ;;  %v2793_v54 = vld [vmem:[%s3054_s1 + $0x18] ss:$0 sm:$0xff] }
 0x3ba   :  { %v819_v39 = vsel %vm180_vm8, %v816_v3, %v818_v50  ;;  %v820_v26 = vsel %vm180_vm8, %v818_v50, %v816_v3 }
 0x3bb   :  { %1497 = vset.pattern.permute.xlu1 %v1590_v7  ;;  %v821_v18 = vmul.f32 %v819_v39, %v2077_v47  ;;  %v822_v14 = vmul.f32 %v820_v26, %v2080_v59  ;;  %v813_v46 = vadd.f32 %v811_v17, %v797_v31  ;;  %v814_v3 = vadd.f32 %v812_v11, %v798_v1 }
 0x3bc   :  { %1266 = vperm.xlu1 %1497, %v2474_v51  }
 0x3bd   :  { %v832_v32 = vpop.permute.xlu1 %831  ;;  %v827_v51 = vmul.f32 %v2540_v42, %v821_v18  ;;  %v828_v6 = vmul.f32 %v2540_v42, %v822_v14 }
 0x3bf   :  { %v829_v21 = vadd.f32 %v827_v51, %v813_v46  ;;  %v830_v42 = vadd.f32 %v828_v6, %v814_v3 }
 0x3c0   :  { %1101 = vrot.lane.b32.xlu1 %v2598_v19, %s1524_s26 }
 0x3c1   :  { %v834_v55 = vpop.permute.xlu1 %833  ;;  %1499 = vset.pattern.permute.xlu1 %v3172_v22 }
 0x3c2   :  { %v835_v23 = vsel %vm205_vm9, %v832_v32, %v834_v55  ;;  %v836_v40 = vsel %vm205_vm9, %v834_v55, %v832_v32 }
 0x3c3   :  { %v837_v52 = vmul.f32 %v835_v23, %v2083_v2  ;;  %v838_v62 = vmul.f32 %v836_v40, %v2096_v58 }
 0x3c4   :  { %1115 = vrot.lane.b32.xlu1 %v2606_v28, %s1529_s27 }
 0x3c5   :  { %v843_v50 = vmul.f32 %v2544_v0, %v837_v52  ;;  %v844_v39 = vmul.f32 %v2544_v0, %v838_v62  ;;  %v848_v26 = vpop.permute.xlu1 %847 }
 0x3c7   :  { %v845_v35 = vadd.f32 %v843_v50, %v829_v21  ;;  %v846_v34 = vadd.f32 %v844_v39, %v830_v42 }
 0x3c8   :  { %1117 = vrot.lane.b32.xlu1 %v2598_v19, %s1529_s27 }
 0x3c9   :  { %v850_v60 = vpop.permute.xlu1 %849 }
 0x3ca   :  { %v851_v12 = vsel %vm230_vm10, %v848_v26, %v850_v60  ;;  %v852_v7 = vsel %vm230_vm10, %v850_v60, %v848_v26 }
 0x3cb   :  { %v853_v0 = vmul.f32 %v2787_v36, %v851_v12  ;;  %v854_v18 = vmul.f32 %v2793_v54, %v852_v7 }
 0x3cc   :  { %1131 = vrot.lane.b32.xlu1 %v2606_v28, %s1532_s28 }
 0x3cd   :  { %v859_v14 = vmul.f32 %v2512_v44, %v853_v0  ;;  %v860_v32 = vmul.f32 %v2512_v44, %v854_v18  ;;  %v870_v31 = vpop.permute.xlu1 %869 }
 0x3cf   :  { %v861_v1 = vadd.f32 %v859_v14, %v845_v35  ;;  %v862_v17 = vadd.f32 %v860_v32, %v846_v34 }
 0x3d0   :  { %1133 = vrot.lane.b32.xlu1 %v2598_v19, %s1532_s28 }
 0x3d1   :  { %v872_v11 = vpop.permute.xlu1 %871 }
 0x3d2   :  { %v873_v51 = vsel %vm48_vm4, %v870_v31, %v872_v11  ;;  %v874_v6 = vsel %vm48_vm4, %v872_v11, %v870_v31 }
 0x3d3   :  { %v875_v55 = vmul.f32 %v874_v6, %v1993_v43  ;;  %v876_v22 = vmul.f32 %v873_v51, %v1996_v10 }
 0x3d4   :  { %1153 = vrot.lane.b32.xlu1 %v2635_v38, %s1513_s19 }
 0x3d5   :  { %v881_v44 = vmul.f32 %v2514_v53, %v875_v55  ;;  %v882_v23 = vmul.f32 %v2514_v53, %v876_v22  ;;  %v886_v40 = vpop.permute.xlu1 %885 }
 0x3d7   :  { %v883_v46 = vadd.f32 %v881_v44, %v861_v1  ;;  %v884_v3 = vadd.f32 %v882_v23, %v862_v17 }
 0x3d8   :  { %1155 = vrot.lane.b32.xlu1 %v2624_v8, %s1513_s19 }
 0x3d9   :  { %v888_v52 = vpop.permute.xlu1 %887 }
 0x3da   :  { %v889_v62 = vsel %vm72_vm3, %v886_v40, %v888_v52  ;;  %v890_v21 = vsel %vm72_vm3, %v888_v52, %v886_v40 }
 0x3db   :  { %v891_v42 = vmul.f32 %v890_v21, %v1974_v48  ;;  %v892_v50 = vmul.f32 %v889_v62, %v1977_v61 }
 0x3dc   :  { %1169 = vrot.lane.b32.xlu1 %v2635_v38, %s1516_s22 }
 0x3dd   :  { %v897_v53 = vmul.f32 %v2516_v9, %v891_v42  ;;  %v898_v39 = vmul.f32 %v2516_v9, %v892_v50  ;;  %v902_v26 = vpop.permute.xlu1 %901  ;;  %v2834_v9 = vpop.permute.xlu0 %1210 }
 0x3df   :  { %v899_v35 = vadd.f32 %v897_v53, %v883_v46  ;;  %v900_v34 = vadd.f32 %v898_v39, %v884_v3  ;;  %v937_v46 = vmul.f32 %v2530_v37, %v2583_v20  ;;  %v938_v3 = vmul.f32 %v2530_v37, %v2573_v45 }
 0x3e0   :  { %1171 = vrot.lane.b32.xlu1 %v2624_v8, %s1516_s22 }
 0x3e1   :  { %v904_v60 = vpop.permute.xlu1 %903  ;;  %v944_v55 = vpop.permute.xlu0 %943 }
 0x3e2   :  { %v905_v12 = vsel %vm97_vm5, %v902_v26, %v904_v60  ;;  %v906_v7 = vsel %vm97_vm5, %v904_v60, %v902_v26 }
 0x3e3   :  { %v907_v0 = vmul.f32 %v906_v7, %v1998_v15  ;;  %v908_v18 = vmul.f32 %v905_v12, %v2009_v25 }
 0x3e4   :  { %1185 = vrot.lane.b32.xlu1 %v2635_v38, %s1518_s23 }
 0x3e5   :  { %v913_v14 = vmul.f32 %v2526_v56, %v907_v0  ;;  %v914_v32 = vmul.f32 %v2526_v56, %v908_v18  ;;  %v918_v31 = vpop.permute.xlu1 %917 }
 0x3e7   :  { %v915_v1 = vadd.f32 %v913_v14, %v899_v35  ;;  %v916_v17 = vadd.f32 %v914_v32, %v900_v34 }
 0x3e8   :  { %1187 = vrot.lane.b32.xlu1 %v2624_v8, %s1518_s23 }
 0x3e9   :  { %v920_v11 = vpop.permute.xlu1 %919 }
 0x3ea   :  { %v921_v51 = vsel %vm122_vm6, %v918_v31, %v920_v11  ;;  %v922_v6 = vsel %vm122_vm6, %v920_v11, %v918_v31 }
 0x3eb   :  { %v923_v22 = vmul.f32 %v922_v6, %v2024_v49  ;;  %v924_v44 = vmul.f32 %v921_v51, %v2027_v4 }
 0x3ec   :  { %1201 = vrot.lane.b32.xlu1 %v2635_v38, %s1521_s24 }
 0x3ed   :  { %v929_v56 = vmul.f32 %v2528_v33, %v923_v22  ;;  %v930_v23 = vmul.f32 %v2528_v33, %v924_v44  ;;  %v942_v40 = vpop.permute.xlu1 %941  ;;  %v958_v33 = vpop.permute.xlu0 %957 }
 0x3ee   :  { %v945_v52 = vsel %vm155_vm7, %v942_v40, %v944_v55  ;;  %v946_v62 = vsel %vm155_vm7, %v944_v55, %v942_v40 }
 0x3ef   :  { %v931_v21 = vadd.f32 %v929_v56, %v915_v1  ;;  %v932_v42 = vadd.f32 %v930_v23, %v916_v17  ;;  %v947_v50 = vmul.f32 %v945_v52, %v2057_v13  ;;  %v948_v53 = vmul.f32 %v946_v62, %v2060_v27 }
 0x3f0   :  { %1203 = vrot.lane.b32.xlu1 %v2624_v8, %s1521_s24 }
 0x3f1   :  { %v939_v20 = vadd.f32 %v937_v46, %v931_v21  ;;  %v940_v39 = vadd.f32 %v938_v3, %v932_v42  ;;  %v953_v37 = vmul.f32 %v2534_v57, %v947_v50  ;;  %v954_v45 = vmul.f32 %v2534_v57, %v948_v53  ;;  %v960_v26 = vpop.permute.xlu1 %959 }
 0x3f2   :  { %v961_v35 = vsel %vm180_vm8, %v958_v33, %v960_v26  ;;  %v962_v34 = vsel %vm180_vm8, %v960_v26, %v958_v33 }
 0x3f3   :  { %v955_v60 = vadd.f32 %v953_v37, %v939_v20  ;;  %v956_v12 = vadd.f32 %v954_v45, %v940_v39  ;;  %v963_v7 = vmul.f32 %v961_v35, %v2077_v47  ;;  %v964_v0 = vmul.f32 %v962_v34, %v2080_v59 }
 0x3f4   :  { %1225 = vrot.lane.b32.xlu1 %v2635_v38, %s1522_s25 }
 0x3f5   :  { %v969_v18 = vmul.f32 %v2663_v30, %v963_v7  ;;  %v970_v57 = vmul.f32 %v2663_v30, %v964_v0  ;;  %v974_v14 = vpop.permute.xlu1 %973 }
 0x3f7   :  { %v971_v32 = vadd.f32 %v969_v18, %v955_v60  ;;  %v972_v31 = vadd.f32 %v970_v57, %v956_v12 }
 0x3f8   :  { %1243 = vrot.lane.b32.xlu1 %v2624_v8, %s1524_s26 }
 0x3f9   :  { %v976_v1 = vpop.permute.xlu1 %975 }
 0x3fa   :  { %v977_v17 = vsel %vm205_vm9, %v974_v14, %v976_v1  ;;  %v978_v11 = vsel %vm205_vm9, %v976_v1, %v974_v14 }
 0x3fb   :  { %v979_v51 = vmul.f32 %v977_v17, %v2083_v2  ;;  %v980_v6 = vmul.f32 %v978_v11, %v2096_v58 }
 0x3fc   :  { %1257 = vrot.lane.b32.xlu1 %v2635_v38, %s1529_s27 }
 0x3fd   :  { %v985_v30 = vmul.f32 %v2671_v16, %v979_v51  ;;  %v986_v55 = vmul.f32 %v2671_v16, %v980_v6  ;;  %v990_v22 = vpop.permute.xlu1 %989 }
 0x3ff   :  { %v987_v44 = vadd.f32 %v985_v30, %v971_v32  ;;  %v988_v56 = vadd.f32 %v986_v55, %v972_v31 }
 0x400   :  { %1259 = vrot.lane.b32.xlu1 %v2624_v8, %s1529_s27 }
 0x401   :  { %v992_v23 = vpop.permute.xlu1 %991 }
 0x402   :  { %v993_v40 = vsel %vm230_vm10, %v990_v22, %v992_v23  ;;  %v994_v46 = vsel %vm230_vm10, %v992_v23, %v990_v22 }
 0x403   :  { %v995_v3 = vmul.f32 %v2787_v36, %v993_v40  ;;  %v996_v52 = vmul.f32 %v2793_v54, %v994_v46 }
 0x404   :  { %1275 = vrot.lane.b32.xlu1 %v2624_v8, %s1532_s28 }
 0x405   :  { %v1001_v16 = vmul.f32 %v2538_v5, %v995_v3  ;;  %v1002_v62 = vmul.f32 %v2538_v5, %v996_v52  ;;  %v1012_v21 = vpop.permute.xlu1 %1011 }
 0x407   :  { %v1003_v42 = vadd.f32 %v1001_v16, %v987_v44  ;;  %v1004_v50 = vadd.f32 %v1002_v62, %v988_v56  ;;  %v3173_v62 = vld [vmem:[#allocation11_spill] sm:$0xff] }
 0x409   :  { %v1014_v53 = vpop.permute.xlu1 %1013 }
 0x40a   :  { %v1015_v33 = vsel %vm48_vm4, %v1012_v21, %v1014_v53  ;;  %v1016_v20 = vsel %vm48_vm4, %v1014_v53, %v1012_v21 }
 0x40b   :  { %v1017_v39 = vmul.f32 %v1016_v20, %v1993_v43  ;;  %v1018_v37 = vmul.f32 %v1015_v33, %v1996_v10 }
 0x40d   :  { %v1023_v45 = vmul.f32 %v2542_v24, %v1017_v39  ;;  %v1024_v26 = vmul.f32 %v2542_v24, %v1018_v37  ;;  %v1028_v35 = vpop.permute.xlu1 %1027 }
 0x40f   :  { %v1025_v5 = vadd.f32 %v1023_v45, %v1003_v42  ;;  %v1026_v34 = vadd.f32 %v1024_v26, %v1004_v50  ;;  %v3174_v50 = vld [vmem:[#allocation21_spill] sm:$0xff] }
 0x410   :  { %v1079_v53 = vmul.f32 %v3174_v50, %v2606_v28  ;;  %v1080_v33 = vmul.f32 %v3174_v50, %v2598_v19 }
 0x411   :  { %v1030_v60 = vpop.permute.xlu1 %1029 }
 0x412   :  { %v1031_v12 = vsel %vm72_vm3, %v1028_v35, %v1030_v60  ;;  %v1032_v7 = vsel %vm72_vm3, %v1030_v60, %v1028_v35  ;;  %v3175_v60 = vld [vmem:[#allocation3_spill] sm:$0xff] }
 0x413   :  { %v1033_v0 = vmul.f32 %v1032_v7, %v1974_v48  ;;  %v1034_v18 = vmul.f32 %v1031_v12, %v1977_v61 }
 0x415   :  { %v1039_v57 = vmul.f32 %v2546_v63, %v1033_v0  ;;  %v1040_v14 = vmul.f32 %v2546_v63, %v1034_v18  ;;  %v1044_v32 = vpop.permute.xlu1 %1043  ;;  %v2922_v63 = vpop.permute.xlu0 %1218 }
 0x417   :  { %v1041_v24 = vadd.f32 %v1039_v57, %v1025_v5  ;;  %v1042_v31 = vadd.f32 %v1040_v14, %v1026_v34 }
 0x419   :  { %v1046_v1 = vpop.permute.xlu1 %1045  ;;  %v1086_v16 = vpop.permute.xlu0 %1085 }
 0x41a   :  { %v1047_v17 = vsel %vm97_vm5, %v1044_v32, %v1046_v1  ;;  %v1048_v11 = vsel %vm97_vm5, %v1046_v1, %v1044_v32 }
 0x41b   :  { %v1049_v51 = vmul.f32 %v1048_v11, %v1998_v15  ;;  %v1050_v6 = vmul.f32 %v1047_v17, %v2009_v25 }
 0x41d   :  { %v1055_v30 = vmul.f32 %v2659_v29, %v1049_v51  ;;  %v1056_v55 = vmul.f32 %v2659_v29, %v1050_v6  ;;  %v1060_v22 = vpop.permute.xlu1 %1059 }
 0x41f   :  { %v1057_v44 = vadd.f32 %v1055_v30, %v1041_v24  ;;  %v1058_v56 = vadd.f32 %v1056_v55, %v1042_v31  ;;  %v1100_v24 = vpop.permute.xlu0 %1099 }
 0x421   :  { %v1062_v23 = vpop.permute.xlu1 %1061 }
 0x422   :  { %v1063_v40 = vsel %vm122_vm6, %v1060_v22, %v1062_v23  ;;  %v1064_v46 = vsel %vm122_vm6, %v1062_v23, %v1060_v22 }
 0x423   :  { %v1065_v3 = vmul.f32 %v1064_v46, %v2024_v49  ;;  %v1066_v52 = vmul.f32 %v1063_v40, %v2027_v4  ;;  %v3176_v40 = vld [vmem:[#allocation15_spill] sm:$0xff] }
 0x425   :  { %v1071_v21 = vmul.f32 %v3173_v62, %v1065_v3  ;;  %v1072_v29 = vmul.f32 %v3173_v62, %v1066_v52  ;;  %v1084_v42 = vpop.permute.xlu1 %1083 }
 0x426   :  { %v1087_v20 = vsel %vm155_vm7, %v1084_v42, %v1086_v16  ;;  %v1088_v39 = vsel %vm155_vm7, %v1086_v16, %v1084_v42 }
 0x427   :  { %v1073_v37 = vadd.f32 %v1071_v21, %v1057_v44  ;;  %v1074_v45 = vadd.f32 %v1072_v29, %v1058_v56  ;;  %v1089_v26 = vmul.f32 %v1087_v20, %v2057_v13  ;;  %v1090_v35 = vmul.f32 %v1088_v39, %v2060_v27  ;;  %v3177_v21 = vld [vmem:[#allocation13_spill] sm:$0xff] }
 0x429   :  { %v1081_v5 = vadd.f32 %v1079_v53, %v1073_v37  ;;  %v1082_v34 = vadd.f32 %v1080_v33, %v1074_v45  ;;  %v1095_v12 = vmul.f32 %v3175_v60, %v1089_v26  ;;  %v1096_v28 = vmul.f32 %v3175_v60, %v1090_v35  ;;  %v3178_v33 = vld [vmem:[#allocation4_spill] sm:$0xff] }
 0x42b   :  { %v1097_v7 = vadd.f32 %v1095_v12, %v1081_v5  ;;  %v1098_v19 = vadd.f32 %v1096_v28, %v1082_v34 }
 0x436   :  { %v2944_v0 = vpop.permute.xlu1 %1250 }
 0x43b   :  { %v2946_v18 = vpop.permute.xlu1 %1266 }
 0x43f   :  { %v1102_v57 = vpop.permute.xlu1 %1101 }
 0x440   :  { %v1103_v1 = vsel %vm180_vm8, %v1100_v24, %v1102_v57  ;;  %v1104_v17 = vsel %vm180_vm8, %v1102_v57, %v1100_v24 }
 0x441   :  { %v1105_v6 = vmul.f32 %v1103_v1, %v2077_v47  ;;  %v1106_v30 = vmul.f32 %v1104_v17, %v2080_v59 }
 0x443   :  { %v1116_v14 = vpop.permute.xlu1 %1115  ;;  %v1111_v46 = vmul.f32 %v3176_v40, %v1105_v6  ;;  %v1112_v3 = vmul.f32 %v3176_v40, %v1106_v30 }
 0x445   :  { %v1113_v50 = vadd.f32 %v1111_v46, %v1097_v7  ;;  %v1114_v53 = vadd.f32 %v1112_v3, %v1098_v19  ;;  %v3179_v7 = vld [vmem:[#allocation12_spill] sm:$0xff] }
 0x447   :  { %v1118_v32 = vpop.permute.xlu1 %1117 }
 0x448   :  { %v1119_v11 = vsel %vm205_vm9, %v1116_v14, %v1118_v32  ;;  %v1120_v51 = vsel %vm205_vm9, %v1118_v32, %v1116_v14 }
 0x449   :  { %v1121_v56 = vmul.f32 %v1119_v11, %v2083_v2  ;;  %v1122_v23 = vmul.f32 %v1120_v51, %v2096_v58  ;;  %v3180_v11 = vld [vmem:[#allocation18_spill] sm:$0xff] }
 0x44b   :  { %v1132_v31 = vpop.permute.xlu1 %1131  ;;  %v1127_v29 = vmul.f32 %v3177_v21, %v1121_v56  ;;  %v1128_v42 = vmul.f32 %v3177_v21, %v1122_v23 }
 0x44d   :  { %v1129_v35 = vadd.f32 %v1127_v29, %v1113_v50  ;;  %v1130_v5 = vadd.f32 %v1128_v42, %v1114_v53 }
 0x44f   :  { %v1134_v55 = vpop.permute.xlu1 %1133 }
 0x450   :  { %v1135_v22 = vsel %vm230_vm10, %v1132_v31, %v1134_v55  ;;  %v1136_v44 = vsel %vm230_vm10, %v1134_v55, %v1132_v31  ;;  %v1235_v55 = vpop.permute.xlu0 %1234 }
 0x451   :  { %v1137_v52 = vmul.f32 %v2787_v36, %v1135_v22  ;;  %v1138_v16 = vmul.f32 %v2793_v54, %v1136_v44 }
 0x453   :  { %v1154_v62 = vpop.permute.xlu1 %1153  ;;  %v1143_v20 = vmul.f32 %v3178_v33, %v1137_v52  ;;  %v1144_v39 = vmul.f32 %v3178_v33, %v1138_v16  ;;  %v3181_v52 = vld [vmem:[#allocation16_spill] sm:$0xff] }
 0x454   :  { %v1283_v46 = vpop.permute.xlu0 %1282 }
 0x455   :  { %v1145_v12 = vadd.f32 %v1143_v20, %v1129_v35  ;;  %v1146_v28 = vadd.f32 %v1144_v39, %v1130_v5 }
 0x457   :  { %v1156_v37 = vpop.permute.xlu1 %1155 }
 0x458   :  { %v1157_v45 = vsel %vm48_vm4, %v1154_v62, %v1156_v37  ;;  %v1158_v26 = vsel %vm48_vm4, %v1156_v37, %v1154_v62  ;;  %v1228_v50 = vpop.permute.xlu0 %1227 }
 0x459   :  { %v1159_v34 = vmul.f32 %v1158_v26, %v1993_v43  ;;  %v1160_v60 = vmul.f32 %v1157_v45, %v1996_v10  ;;  %v1221_v45 = vmul.f32 %v2922_v63, %v2635_v38  ;;  %v1222_v26 = vmul.f32 %v2922_v63, %v2624_v8 }
 0x45b   :  { %v1165_v19 = vmul.f32 %v3179_v7, %v1159_v34  ;;  %v1166_v57 = vmul.f32 %v3179_v7, %v1160_v60  ;;  %v1170_v14 = vpop.permute.xlu1 %1169 }
 0x45d   :  { %v1167_v32 = vadd.f32 %v1165_v19, %v1145_v12  ;;  %v1168_v24 = vadd.f32 %v1166_v57, %v1146_v28 }
 0x45f   :  { %v1172_v31 = vpop.permute.xlu1 %1171 }
 0x460   :  { %v1173_v1 = vsel %vm72_vm3, %v1170_v14, %v1172_v31  ;;  %v1174_v17 = vsel %vm72_vm3, %v1172_v31, %v1170_v14 }
 0x461   :  { %v1175_v43 = vmul.f32 %v1174_v17, %v1974_v48  ;;  %v1176_v10 = vmul.f32 %v1173_v1, %v1977_v61 }
 0x463   :  { %v1181_v51 = vmul.f32 %v3180_v11, %v1175_v43  ;;  %v1182_v6 = vmul.f32 %v3180_v11, %v1176_v10  ;;  %v1186_v30 = vpop.permute.xlu1 %1185 }
 0x465   :  { %v1183_v22 = vadd.f32 %v1181_v51, %v1167_v32  ;;  %v1184_v44 = vadd.f32 %v1182_v6, %v1168_v24 }
 0x467   :  { %v1188_v56 = vpop.permute.xlu1 %1187 }
 0x468   :  { %v1189_v23 = vsel %vm97_vm5, %v1186_v30, %v1188_v56  ;;  %v1190_v40 = vsel %vm97_vm5, %v1188_v56, %v1186_v30 }
 0x469   :  { %v1191_v48 = vmul.f32 %v1190_v40, %v1998_v15  ;;  %v1192_v61 = vmul.f32 %v1189_v23, %v2009_v25 }
 0x46b   :  { %v1202_v3 = vpop.permute.xlu1 %1201  ;;  %v1197_v16 = vmul.f32 %v3181_v52, %v1191_v48  ;;  %v1198_v62 = vmul.f32 %v3181_v52, %v1192_v61 }
 0x46d   :  { %v1199_v15 = vadd.f32 %v1197_v16, %v1183_v22  ;;  %v1200_v20 = vadd.f32 %v1198_v62, %v1184_v44 }
 0x46f   :  { %v1204_v21 = vpop.permute.xlu1 %1203 }
 0x470   :  { %v1205_v29 = vsel %vm122_vm6, %v1202_v3, %v1204_v21  ;;  %v1206_v42 = vsel %vm122_vm6, %v1204_v21, %v1202_v3 }
 0x471   :  { %v1207_v53 = vmul.f32 %v1206_v42, %v2024_v49  ;;  %v1208_v33 = vmul.f32 %v1205_v29, %v2027_v4 }
 0x473   :  { %v1213_v25 = vmul.f32 %v2834_v9, %v1207_v53  ;;  %v1214_v39 = vmul.f32 %v2834_v9, %v1208_v33  ;;  %v1226_v37 = vpop.permute.xlu1 %1225  ;;  %v1242_v9 = vpop.permute.xlu0 %1241 }
 0x474   :  { %v1229_v35 = vsel %vm155_vm7, %v1226_v37, %v1228_v50  ;;  %v1230_v49 = vsel %vm155_vm7, %v1228_v50, %v1226_v37 }
 0x475   :  { %v1215_v4 = vadd.f32 %v1213_v25, %v1199_v15  ;;  %v1216_v5 = vadd.f32 %v1214_v39, %v1200_v20  ;;  %v1231_v34 = vmul.f32 %v1229_v35, %v2057_v13  ;;  %v1232_v60 = vmul.f32 %v1230_v49, %v2060_v27 }
 0x477   :  { %v1223_v12 = vadd.f32 %v1221_v45, %v1215_v4  ;;  %v1224_v28 = vadd.f32 %v1222_v26, %v1216_v5  ;;  %v1237_v7 = vmul.f32 %v1235_v55, %v1231_v34  ;;  %v1238_v38 = vmul.f32 %v1235_v55, %v1232_v60  ;;  %v1244_v19 = vpop.permute.xlu1 %1243  ;;  %v1274_v51 = vpop.permute.xlu0 %1273  ;;  %v1508_v26 = vld [vmem:[%s3055_s3] sm:$0xff] }
 0x478   :  { %v1245_v8 = vsel %vm180_vm8, %v1242_v9, %v1244_v19  ;;  %v1246_v63 = vsel %vm180_vm8, %v1244_v19, %v1242_v9 }
 0x479   :  { %v1247_v57 = vmul.f32 %v1245_v8, %v2077_v47  ;;  %v1248_v14 = vmul.f32 %v1246_v63, %v2080_v59  ;;  %v1239_v32 = vadd.f32 %v1237_v7, %v1223_v12  ;;  %v1240_v13 = vadd.f32 %v1238_v38, %v1224_v28  ;;  %v1509_v38 = vld [vmem:[%s3053_s0] sm:$0xff]  ;;  %v1510_v8 = vld [vmem:[%s3053_s0 + $0x8] sm:$0xff] }
 0x47b   :  { %v1253_v27 = vmul.f32 %v2944_v0, %v1247_v57  ;;  %v1254_v24 = vmul.f32 %v2944_v0, %v1248_v14  ;;  %v1258_v31 = vpop.permute.xlu1 %1257 }
 0x47d   :  { %v1255_v1 = vadd.f32 %v1253_v27, %v1239_v32  ;;  %v1256_v17 = vadd.f32 %v1254_v24, %v1240_v13 }
 0x47f   :  { %v1260_v43 = vpop.permute.xlu1 %1259 }
 0x480   :  { %v1261_v10 = vsel %vm205_vm9, %v1258_v31, %v1260_v43  ;;  %v1262_v11 = vsel %vm205_vm9, %v1260_v43, %v1258_v31 }
 0x481   :  { %v1263_v47 = vmul.f32 %v1261_v10, %v2083_v2  ;;  %v1264_v59 = vmul.f32 %v1262_v11, %v2096_v58 }
 0x483   :  { %v1269_v6 = vmul.f32 %v2946_v18, %v1263_v47  ;;  %v1270_v30 = vmul.f32 %v2946_v18, %v1264_v59  ;;  %v1276_v0 = vpop.permute.xlu1 %1275 }
 0x484   :  { %v1277_v55 = vsel %vm230_vm10, %v1274_v51, %v1276_v0  ;;  %v1278_v22 = vsel %vm230_vm10, %v1276_v0, %v1274_v51 }
 0x485   :  { %v1279_v44 = vmul.f32 %v2787_v36, %v1277_v55  ;;  %v1280_v56 = vmul.f32 %v2793_v54, %v1278_v22  ;;  %v1271_v23 = vadd.f32 %v1269_v6, %v1255_v1  ;;  %v1272_v2 = vadd.f32 %v1270_v30, %v1256_v17 }
 0x487   :  { %v1285_v40 = vmul.f32 %v1283_v46, %v1279_v44  ;;  %v1286_v58 = vmul.f32 %v1283_v46, %v1280_v56 }
 0x489   :  { %v1287_v48 = vadd.f32 %v1285_v40, %v1271_v23  ;;  %v1288_v61 = vadd.f32 %v1286_v58, %v1272_v2 }
 0x48b   :  { %v1291_v3 = vrot.slane %v1287_v48, 4  ;;  %v1292_v52 = vrot.slane %v1288_v61, 4  ;;  %v1289_v18 = vmul.f32 %v1287_v48, %v1287_v48  ;;  %v1290_v16 = vmul.f32 %v1288_v61, %v1288_v61 }
 0x48d   :  { %v1293_v62 = vadd.f32 %v1291_v3, %v1287_v48  ;;  %v1294_v21 = vadd.f32 %v1292_v52, %v1288_v61  ;;  %v1295_v29 = vrot.slane %v1289_v18, 4  ;;  %v1296_v42 = vrot.slane %v1290_v16, 4 }
 0x48f   :  { %v1299_v41 = vadd.f32 %v1294_v21, %v1293_v62  ;;  %v1297_v50 = vadd.f32 %v1295_v29, %v1289_v18  ;;  %v1298_v53 = vadd.f32 %v1296_v42, %v1290_v16 }
 0x491   :  { %1300 = vadd.xlane.f32.xlu0 %v1299_v41  ;;  %v1303_v36 = vadd.f32 %v1298_v53, %v1297_v50 }
 0x493   :  { %1304 = vadd.xlane.f32.xlu1 %v1303_v36 }
 0x51e   :  { %v1301_v54 = vpop.xlane.xlu0 %1300 }
 0x51f   :  { %v1302_v33 = vmul.f32 0.001953125, %v1301_v54 }
 0x520   :  { %v1305_v15 = vpop.xlane.xlu1 %1304 }
 0x521   :  { %v1307_v46 = vmul.f32 %v1302_v33, %v1302_v33  ;;  %v1306_v20 = vmul.f32 0.001953125, %v1305_v15 }
 0x523   :  { %v1308_v25 = vsub.f32 %v1306_v20, %v1307_v46 }
 0x525   :  { %v1309_v39 = vmax.f32 %v1308_v25, 0.0 }
 0x527   :  { %v1310_v37 = vadd.f32 1e-05, %v1309_v39 }
 0x529   :  { %1503 = vrsqrt.f32 %v1310_v37 }
 0x533   :  { %v1504_v45 = vpop.eup %1503 }
 0x534   :  { %v1312_v35 = vmul.f32 %v1508_v26, %v1504_v45 }
 0x536   :  { %1315 = vperm.xlu1 %1499, %v1312_v35   ;;  %v1320_v49 = vmul.f32 %v1312_v35, %v1302_v33 }
 0x538   :  { %1322 = vrot.lane.b32.xlu0 %v1320_v49, %s1521_s24 }
 0x5aa   :  { %v1323_v4 = vpop.permute.xlu0 %1322 }
 0x5ab   :  { %v1325_v5 = vsub.f32 %v1508_v26, %v1323_v4 }
 0x5ad   :  { %1328 = vperm.xlu0 %1500, %v1325_v5  }
 0x5b5   :  { %v1316_v34 = vpop.permute.xlu1 %1315 }
 0x5b6   :  { %v1318_v60 = vmul.f32 %v1316_v34, %v1287_v48  ;;  %v1319_v9 = vmul.f32 %v1316_v34, %v1288_v61 }
 0x62c   :  { %v1329_v12 = vpop.permute.xlu0 %1328 }
 0x62d   :  { %v1331_v28 = vadd.f32 %v1329_v12, %v1318_v60  ;;  %v1332_v7 = vadd.f32 %v1329_v12, %v1319_v9 }
 0x62f   :  { %v1333_v19 = vadd.f32 %v1509_v38, %v1331_v28  ;;  %v1334_v63 = vadd.f32 %v1510_v8, %v1332_v7 }
 0x631   :  { %v1335_v57 = vmax.f32 %v1333_v19, 0.0  ;;  %v1336_v14 = vmax.f32 %v1334_v63, 0.0 }
 0x633   :  { %1337 = vst [vmem:[%s3056_s4] sm:$0xff] %v1335_v57  ;;  %1338 = vst [vmem:[%s3056_s4 + $0x8] sm:$0xff] %v1336_v14 }

</bundles_post_ra>
